<compile_context>
chip_gen: v7x
topology: tpu7x:2x2x1
jax: 0.10.0
libtpu: 0.0.40
codegen_flags: <defaults>
</compile_context>

<pallas_src>
import functools
import math

import numpy as np

import jax
import jax.numpy as jnp
from jax import lax
from jax.experimental import pallas as pl
from jax.experimental.pallas import tpu as pltpu


def _self_attn_kernel(x_ref,    # (TBN, C)  float32   flattened batch-tile of nodes
                      lo_ref,   # (TBN, 1)  int32     first kept column of this row's graph (tile-relative)
                      hi_ref,   # (TBN, 1)  int32     lo + clamped valid_len of this row's graph
                      wq_ref,   # (C, W)    mm dtype  (pre-scaled by 1/sqrt(W))
                      wk_ref,   # (C, W)    mm dtype
                      wv_ref,   # (C, W)    mm dtype
                      bq_ref,   # (1, W)    float32   (pre-scaled by 1/sqrt(W))
                      bk_ref,   # (1, W)    float32
                      bv_ref,   # (1, W)    float32
                      o_ref,    # (TBN, W)
                      *, approx_recip):
    TBN, _ = x_ref.shape
    mm_dtype = wq_ref.dtype          # bf16 MXU inputs (v6e/v7x) or f32 (v5e / strict)

    # ---- projections: three plain 2D MXU dots over the whole flattened tile --
    x2 = x_ref[...].astype(mm_dtype)
    q = jnp.dot(x2, wq_ref[...], preferred_element_type=jnp.float32) + bq_ref[...]
    k = jnp.dot(x2, wk_ref[...], preferred_element_type=jnp.float32) + bk_ref[...]
    v = jnp.dot(x2, wv_ref[...], preferred_element_type=jnp.float32) + bv_ref[...]

    # ---- block-diagonal scores in ONE MXU op: (TBN, W) x (TBN, W)^T ----------
    scores = lax.dot_general(q.astype(mm_dtype), k.astype(mm_dtype),
                             (((1,), (1,)), ((), ())),
                             preferred_element_type=jnp.float32)   # (TBN, TBN) f32

    # Column j is kept for row i iff lo[i] <= j < hi[i]  (same graph AND within
    # that graph's valid_len).  Everything else gets the -1e12 sentinel.
    lo = lo_ref[...]                                               # (TBN, 1)
    hi = hi_ref[...]                                               # (TBN, 1)
    col = lax.broadcasted_iota(jnp.int32, (1, TBN), 1)
    row = lax.broadcasted_iota(jnp.int32, (TBN, 1), 0)
    keep = jnp.logical_and(col >= lo, col < hi)                    # (TBN, TBN)
    scores = jnp.where(keep, scores, jnp.float32(-1e12))

    # ---- f32 softmax -----------------------------------------------------------
    # Invariant: the sentinel and exp stay in f32, so exp(-1e12 - m) underflows
    # to exactly 0 for every masked column of a row that has >=1 kept column;
    # fully-masked rows (cnt == 0) are zeroed by the row scale below.
    m = jnp.max(scores, axis=-1, keepdims=True)
    e = jnp.exp(scores - m)
    denom = jnp.sum(e, axis=-1, keepdims=True)                     # >= 1, never 0

    # ---- unnormalized attn @ v in ONE MXU op, then one fused row scale -------
    out = jnp.dot(e.astype(mm_dtype), v.astype(mm_dtype),
                  preferred_element_type=jnp.float32)              # (TBN, W)
    row_valid = (row < hi).astype(jnp.float32)                     # row_pos < cnt
    if approx_recip:
        inv = pl.reciprocal(denom, approx=True)                    # EUP slot
    else:
        inv = 1.0 / denom                                          # exact (f32 path)
    o_ref[...] = (out * (row_valid * inv)).astype(o_ref.dtype)


def _device_kind():
    try:
        return jax.devices()[0].device_kind.lower()
    except Exception:
        return ""


def _default_grid_steps():
    # v7x has 2 TensorCores/chip -> give the scheduler 2 "parallel" grid steps.
    # Single-TC chips (v5e/v6e): collapse to 1 step (per-step overhead dominates).
    return 2 if "v7" in _device_kind() else 1


def _default_matmul_dtype():
    # v5e: no bf16 VPU datapath and the MXU is not the bottleneck at C=8/W=32,
    # so bf16 casts are pure added VALU work -> keep f32. v6e/v7x: bf16 MXU inputs.
    kind = _device_kind()
    if ("v5e" in kind) or ("v5 lite" in kind) or ("v5lite" in kind):
        return jnp.float32
    return jnp.bfloat16


def self_attention_fc_layer(x, valid_lens, params, *, grid_steps=None,
                            matmul_dtype=None):
    """x: (B, N, C) float32; valid_lens: (B,) int; params: dict of (C,W)/(W,)."""
    B, N, C = x.shape
    W = params["wq"].shape[1]
    scale = 1.0 / math.sqrt(W)

    if matmul_dtype is None:
        matmul_dtype = _default_matmul_dtype()
    if grid_steps is None:
        grid_steps = _default_grid_steps()
    approx_recip = np.dtype(matmul_dtype) != np.dtype(np.float32)

    # Fold the 1/sqrt(W) score scale into Wq/bq (zero in-kernel cost).
    wq = (params["wq"] * scale).astype(matmul_dtype)
    wk = params["wk"].astype(matmul_dtype)
    wv = params["wv"].astype(matmul_dtype)
    bq = (params["bq"] * scale).reshape(1, W).astype(jnp.float32)
    bk = params["bk"].reshape(1, W).astype(jnp.float32)
    bv = params["bv"].reshape(1, W).astype(jnp.float32)

    # Grid collapse (1 step on single-TC chips, 2 on v7x).  Cap the flattened
    # row count so the (TB*N)^2 f32 score matrix stays small even for huge B.
    G = max(1, min(int(grid_steps), B))
    TB = pl.cdiv(B, G)
    max_rows = 1024                              # (1024,1024) f32 scores = 4 MiB
    if TB * N > max_rows:
        TB = max(1, max_rows // N)
    G = pl.cdiv(B, TB)
    Bp = G * TB
    if Bp != B:                                  # pad graphs with valid_len = 0
        x = jnp.pad(x, ((0, Bp - B), (0, 0), (0, 0)))
        valid_lens = jnp.pad(valid_lens, ((0, Bp - B),))

    TBN = TB * N
    x2 = x.reshape(Bp * N, C)                    # wrapper-side reshape: free

    # Per-row kept-column window [lo, hi) in tile-relative coordinates, plus
    # (implicitly) row validity == (row < hi).  Precomputed here so the kernel
    # needs no integer div/mod and no per-column input.  cnt > N behaves like
    # cnt == N in the reference, so clamp.
    cnt = jnp.clip(valid_lens.astype(jnp.int32), 0, N)
    node = jnp.arange(Bp * N, dtype=jnp.int32)
    graph = node // N
    lo = ((graph % TB) * N).astype(jnp.int32)
    hi = lo + cnt[graph]
    lo = lo.reshape(Bp * N, 1)
    hi = hi.reshape(Bp * N, 1)

    grid_spec = pltpu.PrefetchScalarGridSpec(
        num_scalar_prefetch=0,
        grid=(G,),
        in_specs=[
            pl.BlockSpec((TBN, C), lambda g: (g, 0)),   # flattened node features
            pl.BlockSpec((TBN, 1), lambda g: (g, 0)),   # lo
            pl.BlockSpec((TBN, 1), lambda g: (g, 0)),   # hi
            pl.BlockSpec((C, W), lambda g: (0, 0)),     # wq (grid-invariant)
            pl.BlockSpec((C, W), lambda g: (0, 0)),     # wk
            pl.BlockSpec((C, W), lambda g: (0, 0)),     # wv
            pl.BlockSpec((1, W), lambda g: (0, 0)),     # bq
            pl.BlockSpec((1, W), lambda g: (0, 0)),     # bk
            pl.BlockSpec((1, W), lambda g: (0, 0)),     # bv
        ],
        out_specs=pl.BlockSpec((TBN, W), lambda g: (g, 0)),
    )

    kernel = functools.partial(_self_attn_kernel, approx_recip=approx_recip)

    out2 = pl.pallas_call(
        kernel,
        out_shape=jax.ShapeDtypeStruct((Bp * N, W), x.dtype),
        grid_spec=grid_spec,
        compiler_params=pltpu.CompilerParams(
            # With G==2 on v7x both TensorCores get one step each; with G==1
            # this is a no-op. VMEM use is tens-of-KiB -> no vmem tuning needed.
            dimension_semantics=("parallel",),
        ),
    )(x2, lo, hi, wq, wk, wv, bq, bk, bv)

    out = out2.reshape(Bp, N, W)                 # wrapper-side reshape: free
    if Bp != B:
        out = out[:B]
    return out


def _reference(x, valid_lens, params):
    """Pure-JAX f32 reference matching the PyTorch forward (valid_lens path)."""
    hp = jax.lax.Precision.HIGHEST
    q = jnp.einsum("bnc,cw->bnw", x, params["wq"], precision=hp) + params["bq"]
    k = jnp.einsum("bnc,cw->bnw", x, params["wk"], precision=hp) + params["bk"]
    v = jnp.einsum("bnc,cw->bnw", x, params["wv"], precision=hp) + params["bv"]
    W = q.shape[-1]
    scores = jnp.einsum("bnd,bmd->bnm", q, k, precision=hp) / math.sqrt(W)
    n = scores.shape[1]
    row = jnp.arange(n)[None, :, None]
    col = jnp.arange(n)[None, None, :]
    cnt = valid_lens[:, None, None]
    mask = (row >= cnt) | (col >= cnt)
    scores_masked = jnp.where(mask, -1e12, scores)
    attn = jax.nn.softmax(scores_masked, axis=-1) * (1.0 - mask.astype(jnp.float32))
    return jnp.einsum("bnm,bmd->bnd", attn, v, precision=hp)


if __name__ == "__main__":
    # batch, nodes, in_channels, global_graph_width (small, module-consistent).
    B, N, C, GW = 32, 8, 8, 32

    key = jax.random.PRNGKey(0)
    kx, kq, kbq, kk, kbk, kv, kbv = jax.random.split(key, 7)

    bound = 1.0 / math.sqrt(C)  # nn.Linear-style uniform init, deterministic
    params = {
        "wq": jax.random.uniform(kq, (C, GW), jnp.float32, -bound, bound),
        "bq": jax.random.uniform(kbq, (GW,), jnp.float32, -bound, bound),
        "wk": jax.random.uniform(kk, (C, GW), jnp.float32, -bound, bound),
        "bk": jax.random.uniform(kbk, (GW,), jnp.float32, -bound, bound),
        "wv": jax.random.uniform(kv, (C, GW), jnp.float32, -bound, bound),
        "bv": jax.random.uniform(kbv, (GW,), jnp.float32, -bound, bound),
    }

    x = jax.random.normal(kx, (B, N, C), jnp.float32)
    # Deterministic valid lengths covering 0..N (0 and full both exercised).
    valid_lens = (jnp.arange(B, dtype=jnp.int32) % (N + 1)).astype(jnp.int32)

    # Default path (chip-appropriate dtype / grid).
    out = jax.block_until_ready(self_attention_fc_layer(x, valid_lens, params))
    # Strict f32 path (exact softmax reciprocal), collapsed grid.
    out_f32 = jax.block_until_ready(
        self_attention_fc_layer(x, valid_lens, params,
                                matmul_dtype=jnp.float32, grid_steps=1))
    # Explicit 2-step (v7x-style megacore) path to exercise G > 1.
    out_2step = jax.block_until_ready(
        self_attention_fc_layer(x, valid_lens, params,
                                matmul_dtype=jnp.float32, grid_steps=2))

    ref = _reference(x, valid_lens, params)
    assert out.shape == (B, N, GW)
    assert out_f32.shape == (B, N, GW)
    assert out_2step.shape == (B, N, GW)

    f32_err = float(jnp.max(jnp.abs(out_f32 - ref)))
    f32_2s_err = float(jnp.max(jnp.abs(out_2step - ref)))
    def_err = float(jnp.max(jnp.abs(out - ref)))
    assert jnp.allclose(out_f32, ref, atol=1e-2, rtol=1e-2), (
        "f32 kernel mismatch vs reference, max abs err %e" % f32_err)
    assert jnp.allclose(out_2step, ref, atol=1e-2, rtol=1e-2), (
        "f32 2-step kernel mismatch vs reference, max abs err %e" % f32_2s_err)
    assert jnp.allclose(out, ref, atol=3e-2, rtol=3e-2), (
        "default kernel mismatch vs reference, max abs err %e" % def_err)

    print("KERNEL_OK")
</pallas_src>

<mosaic_0001>
module attributes {stable_mosaic.version = 11 : i64} {
  func.func @_self_attn_kernel(%arg0: i32, %arg1: memref<256x8xf32, #tpu.memory_space<vmem>>, %arg2: memref<256x1xi32, #tpu.memory_space<vmem>>, %arg3: memref<256x1xi32, #tpu.memory_space<vmem>>, %arg4: memref<8x32xbf16, #tpu.memory_space<vmem>>, %arg5: memref<8x32xbf16, #tpu.memory_space<vmem>>, %arg6: memref<8x32xbf16, #tpu.memory_space<vmem>>, %arg7: memref<1x32xf32, #tpu.memory_space<vmem>>, %arg8: memref<1x32xf32, #tpu.memory_space<vmem>>, %arg9: memref<1x32xf32, #tpu.memory_space<vmem>>, %arg10: memref<256x32xf32, #tpu.memory_space<vmem>>) attributes {dimension_semantics = [#tpu.dimension_semantics<parallel>], iteration_bounds = array<i64: 1>, scalar_prefetch = 0 : i64, scratch_operands = 0 : i64, tpu.core_type = #tpu.core_type<tc>, window_params = [{transform_indices = @transform_0, window_bounds = array<i64: 256, 8>}, {transform_indices = @transform_1, window_bounds = array<i64: 256, 1>}, {transform_indices = @transform_2, window_bounds = array<i64: 256, 1>}, {pipeline_mode = #tpu.pipeline_mode<synchronous>, transform_indices = @transform_3, window_bounds = array<i64: 8, 32>}, {pipeline_mode = #tpu.pipeline_mode<synchronous>, transform_indices = @transform_4, window_bounds = array<i64: 8, 32>}, {pipeline_mode = #tpu.pipeline_mode<synchronous>, transform_indices = @transform_5, window_bounds = array<i64: 8, 32>}, {pipeline_mode = #tpu.pipeline_mode<synchronous>, transform_indices = @transform_6, window_bounds = array<i64: 1, 32>}, {pipeline_mode = #tpu.pipeline_mode<synchronous>, transform_indices = @transform_7, window_bounds = array<i64: 1, 32>}, {pipeline_mode = #tpu.pipeline_mode<synchronous>, transform_indices = @transform_8, window_bounds = array<i64: 1, 32>}, {transform_indices = @transform_9, window_bounds = array<i64: 256, 32>}]} {
    %c0 = arith.constant 0 : index
    %c0_0 = arith.constant 0 : index
    %0 = vector.load %arg1[%c0, %c0_0] : memref<256x8xf32, #tpu.memory_space<vmem>>, vector<256x8xf32>
    %1 = arith.truncf %0 : vector<256x8xf32> to vector<256x8xbf16>
    %c0_1 = arith.constant 0 : index
    %c0_2 = arith.constant 0 : index
    %2 = vector.load %arg4[%c0_1, %c0_2] : memref<8x32xbf16, #tpu.memory_space<vmem>>, vector<8x32xbf16>
    %cst = arith.constant dense<0.000000e+00> : vector<256x32xf32>
    %3 = tpu.matmul %1, %2, %cst {dimension_numbers = #tpu.dot_dimension_numbers<[1], [0], [0], [1], [0, 0, 1, 1], [], []>} : vector<256x8xbf16>, vector<8x32xbf16>, vector<256x32xf32> -> vector<256x32xf32>
    %c0_3 = arith.constant 0 : index
    %c0_4 = arith.constant 0 : index
    %4 = vector.load %arg7[%c0_3, %c0_4] : memref<1x32xf32, #tpu.memory_space<vmem>>, vector<1x32xf32>
    %5 = vector.broadcast %4 : vector<1x32xf32> to vector<256x32xf32>
    %6 = arith.addf %3, %5 : vector<256x32xf32>
    %c0_5 = arith.constant 0 : index
    %c0_6 = arith.constant 0 : index
    %7 = vector.load %arg5[%c0_5, %c0_6] : memref<8x32xbf16, #tpu.memory_space<vmem>>, vector<8x32xbf16>
    %cst_7 = arith.constant dense<0.000000e+00> : vector<256x32xf32>
    %8 = tpu.matmul %1, %7, %cst_7 {dimension_numbers = #tpu.dot_dimension_numbers<[1], [0], [0], [1], [0, 0, 1, 1], [], []>} : vector<256x8xbf16>, vector<8x32xbf16>, vector<256x32xf32> -> vector<256x32xf32>
    %c0_8 = arith.constant 0 : index
    %c0_9 = arith.constant 0 : index
    %9 = vector.load %arg8[%c0_8, %c0_9] : memref<1x32xf32, #tpu.memory_space<vmem>>, vector<1x32xf32>
    %10 = vector.broadcast %9 : vector<1x32xf32> to vector<256x32xf32>
    %11 = arith.addf %8, %10 : vector<256x32xf32>
    %c0_10 = arith.constant 0 : index
    %c0_11 = arith.constant 0 : index
    %12 = vector.load %arg6[%c0_10, %c0_11] : memref<8x32xbf16, #tpu.memory_space<vmem>>, vector<8x32xbf16>
    %cst_12 = arith.constant dense<0.000000e+00> : vector<256x32xf32>
    %13 = tpu.matmul %1, %12, %cst_12 {dimension_numbers = #tpu.dot_dimension_numbers<[1], [0], [0], [1], [0, 0, 1, 1], [], []>} : vector<256x8xbf16>, vector<8x32xbf16>, vector<256x32xf32> -> vector<256x32xf32>
    %c0_13 = arith.constant 0 : index
    %c0_14 = arith.constant 0 : index
    %14 = vector.load %arg9[%c0_13, %c0_14] : memref<1x32xf32, #tpu.memory_space<vmem>>, vector<1x32xf32>
    %15 = vector.broadcast %14 : vector<1x32xf32> to vector<256x32xf32>
    %16 = arith.addf %13, %15 : vector<256x32xf32>
    %17 = arith.truncf %6 : vector<256x32xf32> to vector<256x32xbf16>
    %18 = arith.truncf %11 : vector<256x32xf32> to vector<256x32xbf16>
    %cst_15 = arith.constant dense<0.000000e+00> : vector<256x256xf32>
    %19 = tpu.matmul %17, %18, %cst_15 {dimension_numbers = #tpu.dot_dimension_numbers<[1], [1], [0], [0], [0, 0, 1, 0], [], []>} : vector<256x32xbf16>, vector<256x32xbf16>, vector<256x256xf32> -> vector<256x256xf32>
    %c0_16 = arith.constant 0 : index
    %c0_17 = arith.constant 0 : index
    %20 = vector.load %arg2[%c0_16, %c0_17] : memref<256x1xi32, #tpu.memory_space<vmem>>, vector<256x1xi32>
    %c0_18 = arith.constant 0 : index
    %c0_19 = arith.constant 0 : index
    %21 = vector.load %arg3[%c0_18, %c0_19] : memref<256x1xi32, #tpu.memory_space<vmem>>, vector<256x1xi32>
    %22 = tpu.iota {dimensions = array<i32: 1>} : vector<1x256xi32>
    %23 = tpu.iota {dimensions = array<i32: 0>} : vector<256x1xi32>
    %24 = vector.broadcast %22 : vector<1x256xi32> to vector<256x256xi32>
    %25 = vector.broadcast %20 : vector<256x1xi32> to vector<256x256xi32>
    %26 = arith.cmpi sge, %24, %25 : vector<256x256xi32>
    %27 = vector.broadcast %22 : vector<1x256xi32> to vector<256x256xi32>
    %28 = vector.broadcast %21 : vector<256x1xi32> to vector<256x256xi32>
    %29 = arith.cmpi slt, %27, %28 : vector<256x256xi32>
    %30 = arith.andi %26, %29 : vector<256x256xi1>
    %cst_20 = arith.constant -9.99999995E+11 : f32
    %31 = vector.broadcast %cst_20 : f32 to vector<256x256xf32>
    %32 = arith.select %30, %19, %31 : vector<256x256xi1>, vector<256x256xf32>
    %cst_21 = arith.constant dense<0xFF800000> : vector<256xf32>
    %33 = vector.multi_reduction <maximumf>, %32, %cst_21 [1] : vector<256x256xf32> to vector<256xf32>
    %34 = vector.shape_cast %33 : vector<256xf32> to vector<256x1xf32>
    %35 = vector.broadcast %34 : vector<256x1xf32> to vector<256x256xf32>
    %36 = arith.subf %32, %35 : vector<256x256xf32>
    %37 = math.exp %36 : vector<256x256xf32>
    %cst_22 = arith.constant dense<0.000000e+00> : vector<256xf32>
    %38 = vector.multi_reduction <add>, %37, %cst_22 [1] : vector<256x256xf32> to vector<256xf32>
    %39 = vector.shape_cast %38 : vector<256xf32> to vector<256x1xf32>
    %40 = arith.truncf %37 : vector<256x256xf32> to vector<256x256xbf16>
    %41 = arith.truncf %16 : vector<256x32xf32> to vector<256x32xbf16>
    %cst_23 = arith.constant dense<0.000000e+00> : vector<256x32xf32>
    %42 = tpu.matmul %40, %41, %cst_23 {dimension_numbers = #tpu.dot_dimension_numbers<[1], [0], [0], [1], [0, 0, 1, 1], [], []>} : vector<256x256xbf16>, vector<256x32xbf16>, vector<256x32xf32> -> vector<256x32xf32>
    %43 = arith.cmpi slt, %23, %21 : vector<256x1xi32>
    %44 = arith.extui %43 : vector<256x1xi1> to vector<256x1xi32>
    %45 = arith.sitofp %44 : vector<256x1xi32> to vector<256x1xf32>
    %46 = tpu.reciprocal %39 {approx = true} : vector<256x1xf32> -> vector<256x1xf32>
    %47 = arith.mulf %45, %46 : vector<256x1xf32>
    %48 = vector.broadcast %47 : vector<256x1xf32> to vector<256x32xf32>
    %49 = arith.mulf %42, %48 : vector<256x32xf32>
    %c0_24 = arith.constant 0 : index
    %c0_25 = arith.constant 0 : index
    %50 = vector.load %arg10[%c0_24, %c0_25] : memref<256x32xf32, #tpu.memory_space<vmem>>, vector<256x32xf32>
    tpu.vector_store %arg10[%c0_24, %c0_25], %49 {strides = array<i32>} : memref<256x32xf32, #tpu.memory_space<vmem>>, vector<256x32xf32>,
    return
  }
  func.func @transform_0(%arg0: i32) -> (i32, i32) {
    %c0_i32 = arith.constant 0 : i32
    %c0_i32_0 = arith.constant 0 : i32
    return %arg0, %c0_i32 : i32, i32
  }
  func.func @transform_1(%arg0: i32) -> (i32, i32) {
    %c0_i32 = arith.constant 0 : i32
    %c0_i32_0 = arith.constant 0 : i32
    return %arg0, %c0_i32 : i32, i32
  }
  func.func @transform_2(%arg0: i32) -> (i32, i32) {
    %c0_i32 = arith.constant 0 : i32
    %c0_i32_0 = arith.constant 0 : i32
    return %arg0, %c0_i32 : i32, i32
  }
  func.func @transform_3(%arg0: i32) -> (i32, i32) {
    %c0_i32 = arith.constant 0 : i32
    %c0_i32_0 = arith.constant 0 : i32
    %c0_i32_1 = arith.constant 0 : i32
    return %c0_i32, %c0_i32_0 : i32, i32
  }
  func.func @transform_4(%arg0: i32) -> (i32, i32) {
    %c0_i32 = arith.constant 0 : i32
    %c0_i32_0 = arith.constant 0 : i32
    %c0_i32_1 = arith.constant 0 : i32
    return %c0_i32, %c0_i32_0 : i32, i32
  }
  func.func @transform_5(%arg0: i32) -> (i32, i32) {
    %c0_i32 = arith.constant 0 : i32
    %c0_i32_0 = arith.constant 0 : i32
    %c0_i32_1 = arith.constant 0 : i32
    return %c0_i32, %c0_i32_0 : i32, i32
  }
  func.func @transform_6(%arg0: i32) -> (i32, i32) {
    %c0_i32 = arith.constant 0 : i32
    %c0_i32_0 = arith.constant 0 : i32
    %c0_i32_1 = arith.constant 0 : i32
    return %c0_i32, %c0_i32_0 : i32, i32
  }
  func.func @transform_7(%arg0: i32) -> (i32, i32) {
    %c0_i32 = arith.constant 0 : i32
    %c0_i32_0 = arith.constant 0 : i32
    %c0_i32_1 = arith.constant 0 : i32
    return %c0_i32, %c0_i32_0 : i32, i32
  }
  func.func @transform_8(%arg0: i32) -> (i32, i32) {
    %c0_i32 = arith.constant 0 : i32
    %c0_i32_0 = arith.constant 0 : i32
    %c0_i32_1 = arith.constant 0 : i32
    return %c0_i32, %c0_i32_0 : i32, i32
  }
  func.func @transform_9(%arg0: i32) -> (i32, i32) {
    %c0_i32 = arith.constant 0 : i32
    %c0_i32_0 = arith.constant 0 : i32
    return %arg0, %c0_i32 : i32, i32
  }
}

</mosaic_0001>

<bundles_post_ra>
// kernel: tpu_custom_call.1
= control target key start
LH: loop header
LB: loop body
LE: loop exit
PB: predicated region body
PF: predicated region fallthrough
CT: control target
= control target key end

     0   :  { %vm138_vm0 = vcmask 1043456   ;;  %vm89_vm1 = vcmask 64512   ;;  %v3152_v52 = vmov 0   ;;  %vm679_vm2 = vcmask 261120   ;;  %s5361_s3 = inlined_call_operand.vmem [shape: bf16[8,32], index: 3, kind: input, shape index: {}]   ;;  %s5362_s0 = inlined_call_operand.vmem [shape: f32[256,8], index: 0, kind: input, shape index: {}]   ;;  %s5363_s4 = inlined_call_operand.vmem [shape: bf16[8,32], index: 4, kind: input, shape index: {}]   ;;  %s5364_s1 = inlined_call_operand.vmem [shape: s32[256,1], index: 1, kind: input, shape index: {}]   ;;  %s5365_s2 = inlined_call_operand.vmem [shape: s32[256,1], index: 2, kind: input, shape index: {}]   ;;  %s5366_s6 = inlined_call_operand.vmem [shape: f32[1,32], index: 6, kind: input, shape index: {}]   ;;  %s5367_s7 = inlined_call_operand.vmem [shape: f32[1,32], index: 7, kind: input, shape index: {}]   ;;  %s5368_s5 = inlined_call_operand.vmem [shape: bf16[8,32], index: 5, kind: input, shape index: {}]   ;;  %s5369_s8 = inlined_call_operand.vmem [shape: f32[1,32], index: 8, kind: input, shape index: {}]   ;;  %s5370_s9 = inlined_call_operand.vmem [shape: f32[256,32], index: 9, kind: output, shape index: {}]  }
   0x1   :  { %v81_v0 = vld [vmem:[%s5361_s3] sm:$0xf]  ;;  %v50_v2 = vld [vmem:[%s5362_s0 + $0x88] sm:$0xff]  ;;  %v51_v5 = vld [vmem:[%s5362_s0 + $0x90] sm:$0xff]  ;;  %2926 = vset.pattern.permute.xlu0 %v3152_v52  ;;  %2927 = vset.pattern.permute.xlu1 %v3152_v52 }
   0x2   :  { %v49_v1 = vld [vmem:[%s5362_s0 + $0x80] sm:$0xff]  ;;  %2913 = vmatprep.subr.msk.bf16.mxu1 %vm138_vm0, %v81_v0  ;;  %v140_v3 = vsel %vm138_vm0, %v81_v0, 0  ;;  %v52_v6 = vld [vmem:[%s5362_s0 + $0x98] sm:$0xff]  ;;  %2912 = vmatprep.subr.msk.bf16.mxu0 %vm138_vm0, %v81_v0  ;;  %v54_v10 = vld [vmem:[%s5362_s0 + $0xa8] sm:$0xff] }
   0x3   :  { %v3215_v4 = vpack.c.bf16 %v50_v2, %v49_v1  ;;  %v303_v7 = vld [vmem:[%s5363_s4] sm:$0xf]  ;;  %2911 = vmatpush3.bf16.msra.mxu1 %v140_v3  ;;  %v3227_v8 = vpack.c.bf16 %v52_v6, %v51_v5  ;;  %2809 = vmatpush3.bf16.msra.mxu0 %v140_v3  ;;  %v55_v13 = vld [vmem:[%s5362_s0 + $0xb0] sm:$0xff]  ;;  %v56_v14 = vld [vmem:[%s5362_s0 + $0xb8] sm:$0xff] }
   0x4   :  { %v53_v9 = vld [vmem:[%s5362_s0 + $0xa0] sm:$0xff]  ;;  %2914 = vmatprep.subr.msk.bf16.mxu1 %vm138_vm0, %v303_v7  ;;  %v312_v11 = vsel %vm138_vm0, %v303_v7, 0  ;;  %v58_v16 = vld [vmem:[%s5362_s0 + $0xc8] sm:$0xff]  ;;  %v35_v19 = vld [vmem:[%s5362_s0 + $0x10] sm:$0xff]  ;;  %v3277_v25 = vpack.c.bf16 %v56_v14, %v55_v13 }
   0x5   :  { %2826 = vmatprep.mubr.msk.bf16.mxu1 %vm89_vm1, %v3215_v4  ;;  %v3239_v12 = vpack.c.bf16 %v54_v10, %v53_v9  ;;  %v57_v15 = vld [vmem:[%s5362_s0 + $0xc0] sm:$0xff]  ;;  %v34_v18 = vld [vmem:[%s5362_s0 + $0x8] sm:$0xff]  ;;  %v36_v21 = vld [vmem:[%s5362_s0 + $0x18] sm:$0xff] }
   0x6   :  { %2827 = vmatmul.mubr.msk.bf16.vlgmr.msra.gmra.mrb[0].mxu1 %vm89_vm1, %v3227_v8  ;;  %v33_v17 = vld [vmem:[%s5362_s0] sm:$0xff]  ;;  %v38_v23 = vld [vmem:[%s5362_s0 + $0x28] sm:$0xff]  ;;  %v3275_v24 = vpack.c.bf16 %v36_v21, %v35_v19  ;;  %v3282_v27 = vpack.c.bf16 %v58_v16, %v57_v15  ;;  %v59_v28 = vld [vmem:[%s5362_s0 + $0xd0] sm:$0xff] }
   0x7   :  { %2843 = vmatpush3.bf16.msra.mxu1 %v312_v11  ;;  %2830 = vmatprep.mubr.msk.bf16.mxu1 %vm89_vm1, %v3239_v12  ;;  %v65_v20 = vpack.c.bf16 %v34_v18, %v33_v17  ;;  %v37_v22 = vld [vmem:[%s5362_s0 + $0x20] sm:$0xff]  ;;  %v39_v29 = vld [vmem:[%s5362_s0 + $0x30] sm:$0xff]  ;;  %v40_v30 = vld [vmem:[%s5362_s0 + $0x38] sm:$0xff] }
   0x8   :  { %v3279_v26 = vpack.c.bf16 %v38_v23, %v37_v22  ;;  %v60_v31 = vld [vmem:[%s5362_s0 + $0xd8] sm:$0xff]  ;;  %v41_v32 = vld [vmem:[%s5362_s0 + $0x40] sm:$0xff]  ;;  %v42_v33 = vld [vmem:[%s5362_s0 + $0x48] sm:$0xff]  ;;  %v3316_v36 = vpack.c.bf16 %v40_v30, %v39_v29 }
   0x9   :  { %2810 = vmatprep.mubr.msk.bf16.mxu0 %vm89_vm1, %v65_v20  ;;  %v61_v34 = vld [vmem:[%s5362_s0 + $0xe0] sm:$0xff]  ;;  %v62_v35 = vld [vmem:[%s5362_s0 + $0xe8] sm:$0xff]  ;;  %v3318_v37 = vpack.c.bf16 %v60_v31, %v59_v28  ;;  %v3320_v38 = vpack.c.bf16 %v42_v33, %v41_v32  ;;  %v63_v40 = vld [vmem:[%s5362_s0 + $0xf0] sm:$0xff] }
   0xa   :  { %2811 = vmatmul.mubr.msk.bf16.vlgmr.msra.gmra.mrb[0].mxu0 %vm89_vm1, %v3275_v24  ;;  %v3322_v39 = vpack.c.bf16 %v62_v35, %v61_v34  ;;  %v43_v41 = vld [vmem:[%s5362_s0 + $0x50] sm:$0xff]  ;;  %v44_v42 = vld [vmem:[%s5362_s0 + $0x58] sm:$0xff]  ;;  %v45_v44 = vld [vmem:[%s5362_s0 + $0x60] sm:$0xff] }
   0xb   :  { %2814 = vmatprep.mubr.msk.bf16.mxu0 %vm89_vm1, %v3279_v26  ;;  %v64_v43 = vld [vmem:[%s5362_s0 + $0xf8] sm:$0xff]  ;;  %v46_v45 = vld [vmem:[%s5362_s0 + $0x68] sm:$0xff]  ;;  %v3350_v46 = vpack.c.bf16 %v44_v42, %v43_v41  ;;  %v47_v49 = vld [vmem:[%s5362_s0 + $0x70] sm:$0xff] }
   0xc   :  { %v3352_v47 = vpack.c.bf16 %v64_v43, %v63_v40  ;;  %v3354_v48 = vpack.c.bf16 %v46_v45, %v45_v44  ;;  %v48_v50 = vld [vmem:[%s5362_s0 + $0x78] sm:$0xff]  ;;  %v969_v53 = vld [vmem:[%s5364_s1] sm:$0xff]  ;;  %v971_v54 = vld [vmem:[%s5364_s1 + $0x10] sm:$0xff] }
   0xd   :  { %v3369_v51 = vpack.c.bf16 %v48_v50, %v47_v49  ;;  %1070 = vperm.xlu0 %2926, %v969_v53   ;;  %v970_v55 = vld [vmem:[%s5364_s1 + $0x8] sm:$0xff]  ;;  %1076 = vperm.xlu1 %2927, %v971_v54   ;;  %v972_v56 = vld [vmem:[%s5364_s1 + $0x18] sm:$0xff]  ;;  %v973_v57 = vld [vmem:[%s5364_s1 + $0x20] sm:$0xff] }
   0xe   :  { %2831 = vmatmul.mubr.msk.bf16.gmra.mrb[4].mxu1 %vm89_vm1, %v3277_v25  ;;  %v974_v58 = vld [vmem:[%s5364_s1 + $0x28] sm:$0xff]  ;;  %v975_v59 = vld [vmem:[%s5364_s1 + $0x30] sm:$0xff]  ;;  %v976_v60 = vld [vmem:[%s5364_s1 + $0x38] sm:$0xff] }
   0xf   :  { %2834 = vmatprep.mubr.msk.bf16.mxu1 %vm89_vm1, %v3282_v27  ;;  %v977_v61 = vld [vmem:[%s5364_s1 + $0x40] sm:$0xff]  ;;  %v978_v62 = vld [vmem:[%s5364_s1 + $0x48] sm:$0xff]  ;;  %v979_v63 = vld [vmem:[%s5364_s1 + $0x50] sm:$0xff] }
  0x10   :  { %v980_v0 = vld [vmem:[%s5364_s1 + $0x58] sm:$0xff]  ;;  %v1001_v1 = vld [vmem:[%s5365_s2] sm:$0xff]  ;;  %v1002_v2 = vld [vmem:[%s5365_s2 + $0x8] sm:$0xff] }
  0x11   :  { %1073 = vperm.xlu0 %2926, %v970_v55   ;;  %1079 = vperm.xlu1 %2927, %v972_v56   ;;  %v1003_v3 = vld [vmem:[%s5365_s2 + $0x10] sm:$0xff]  ;;  %v1004_v5 = vld [vmem:[%s5365_s2 + $0x18] sm:$0xff]  ;;  %v1005_v6 = vld [vmem:[%s5365_s2 + $0x20] sm:$0xff] }
  0x12   :  { %2815 = vmatmul.mubr.msk.bf16.gmra.mrb[4].mxu0 %vm89_vm1, %v3316_v36  ;;  %v3458_v7 = vld [vmem:[%s5366_s6] ss:$0 sm:$0xff]  ;;  %v1006_v13 = vld [vmem:[%s5365_s2 + $0x28] sm:$0xff]  ;;  %v1007_v14 = vld [vmem:[%s5365_s2 + $0x30] sm:$0xff] }
  0x13   :  { %2818 = vmatprep.mubr.msk.bf16.mxu0 %vm89_vm1, %v3320_v38  ;;  %v1009_v21 = vld [vmem:[%s5365_s2 + $0x40] sm:$0xff]  ;;  %v1010_v43 = vld [vmem:[%s5365_s2 + $0x48] sm:$0xff]  ;;  %v1011_v44 = vld [vmem:[%s5365_s2 + $0x50] sm:$0xff] }
  0x14   :  { %v1012_v56 = vld [vmem:[%s5365_s2 + $0x58] sm:$0xff] }
  0x15   :  { %1082 = vperm.xlu0 %2926, %v973_v57   ;;  %1085 = vperm.xlu1 %2927, %v974_v58  }
  0x16   :  { %2835 = vmatmul.mubr.msk.bf16.gmra.mrb[8].mxu1 %vm89_vm1, %v3318_v37 }
  0x17   :  { %2838 = vmatprep.mubr.msk.bf16.mxu1 %vm89_vm1, %v3322_v39 }
  0x19   :  { %1088 = vperm.xlu0 %2926, %v975_v59   ;;  %1091 = vperm.xlu1 %2927, %v976_v60   ;;  %v981_v59 = vld [vmem:[%s5364_s1 + $0x60] sm:$0xff] }
  0x1a   :  { %2819 = vmatmul.mubr.msk.bf16.gmra.mrb[8].mxu0 %vm89_vm1, %v3350_v46 }
  0x1b   :  { %2822 = vmatprep.mubr.msk.bf16.mxu0 %vm89_vm1, %v3354_v48 }
  0x1d   :  { %1094 = vperm.xlu0 %2926, %v977_v61   ;;  %1097 = vperm.xlu1 %2927, %v978_v62  }
  0x1e   :  { %2839 = vmatmul.mubr.msk.bf16.gmra.mrb[12].mxu1 %vm89_vm1, %v3352_v47 }
  0x1f   :  { %2844 = vmatprep.mubr.msk.bf16.mxu1 %vm89_vm1, %v65_v20 }
  0x21   :  { %1100 = vperm.xlu0 %2926, %v979_v63   ;;  %1103 = vperm.xlu1 %2927, %v980_v0  }
  0x22   :  { %2823 = vmatmul.mubr.msk.bf16.gmra.mrb[12].mxu0 %vm89_vm1, %v3369_v51 }
  0x23   :  { %2878 = vmatprep.mubr.msk.bf16.mxu0 %vm89_vm1, %v65_v20  ;;  %v1008_v20 = vld [vmem:[%s5365_s2 + $0x38] sm:$0xff] }
  0x25   :  { %1230 = vperm.xlu0 %2926, %v1001_v1   ;;  %1233 = vperm.xlu1 %2927, %v1002_v2  }
  0x26   :  { %2845 = vmatmul.mubr.msk.bf16.vlgmr.msra.gmra.mrb[16].mxu1 %vm89_vm1, %v3275_v24 }
  0x27   :  { %2848 = vmatprep.mubr.msk.bf16.mxu1 %vm89_vm1, %v3279_v26 }
  0x29   :  { %1236 = vperm.xlu0 %2926, %v1003_v3   ;;  %1239 = vperm.xlu1 %2927, %v1004_v5   ;;  %v982_v5 = vld [vmem:[%s5364_s1 + $0x68] sm:$0xff] }
  0x2d   :  { %1242 = vperm.xlu0 %2926, %v1005_v6   ;;  %1245 = vperm.xlu1 %2927, %v1006_v13  }
  0x2e   :  { %2849 = vmatmul.mubr.msk.bf16.gmra.mrb[20].mxu1 %vm89_vm1, %v3316_v36 }
  0x2f   :  { %2852 = vmatprep.mubr.msk.bf16.mxu1 %vm89_vm1, %v3320_v38 }
  0x31   :  { %1248 = vperm.xlu0 %2926, %v1007_v14   ;;  %1251 = vperm.xlu1 %2927, %v1008_v20   ;;  %v1014_v20 = vld [vmem:[%s5365_s2 + $0x68] sm:$0xff] }
  0x35   :  { %1254 = vperm.xlu0 %2926, %v1009_v21   ;;  %1257 = vperm.xlu1 %2927, %v1010_v43  }
  0x36   :  { %2853 = vmatmul.mubr.msk.bf16.gmra.mrb[24].mxu1 %vm89_vm1, %v3350_v46 }
  0x37   :  { %2856 = vmatprep.mubr.msk.bf16.mxu1 %vm89_vm1, %v3354_v48 }
  0x39   :  { %1260 = vperm.xlu0 %2926, %v1011_v44   ;;  %1263 = vperm.xlu1 %2927, %v1012_v56   ;;  %v1016_v56 = vld [vmem:[%s5365_s2 + $0x78] sm:$0xff] }
  0x3d   :  { %1106 = vperm.xlu0 %2926, %v981_v59   ;;  %1109 = vperm.xlu1 %2927, %v982_v5   ;;  %v986_v5 = vld [vmem:[%s5364_s1 + $0x88] sm:$0xff] }
  0x3e   :  { %2857 = vmatmul.mubr.msk.bf16.gmra.mrb[28].mxu1 %vm89_vm1, %v3369_v51 }
  0x3f   :  { %2860 = vmatprep.mubr.msk.bf16.mxu1 %vm89_vm1, %v3215_v4 }
  0x41   :  { %1269 = vperm.xlu1 %2927, %v1014_v20  }
  0x46   :  { %2861 = vmatmul.mubr.msk.bf16.gmra.mrb[32].mxu1 %vm89_vm1, %v3227_v8 }
  0x47   :  { %2864 = vmatprep.mubr.msk.bf16.mxu1 %vm89_vm1, %v3239_v12 }
  0x4e   :  { %2865 = vmatmul.mubr.msk.bf16.gmra.mrb[36].mxu1 %vm89_vm1, %v3277_v25 }
  0x4f   :  { %2868 = vmatprep.mubr.msk.bf16.mxu1 %vm89_vm1, %v3282_v27 }
  0x56   :  { %2869 = vmatmul.mubr.msk.bf16.gmra.mrb[40].mxu1 %vm89_vm1, %v3318_v37 }
  0x57   :  { %2872 = vmatprep.mubr.msk.bf16.mxu1 %vm89_vm1, %v3322_v39 }
  0x5e   :  { %2873 = vmatmul.mubr.msk.bf16.gmra.mrb[44].mxu1 %vm89_vm1, %v3352_v47 }
  0xd9   :  { %v2828_v9 = vpop.f32.mrb[0].mxu1 }
  0xda   :  { %v249_v10 = vadd.f32 %v2828_v9, %v3458_v7  ;;  %v240_v11 = vpop.f32.mrb[1].mxu1 }
  0xdb   :  { %v241_v15 = vadd.f32 %v3458_v7, %v240_v11  ;;  %v2829_v16 = vpop.f32.mrb[2].mxu1  ;;  %v1013_v11 = vld [vmem:[%s5365_s2 + $0x60] sm:$0xff] }
  0xdc   :  { %v252_v17 = vadd.f32 %v2829_v16, %v3458_v7  ;;  %v243_v18 = vpop.f32.mrb[3].mxu1  ;;  %1266 = vperm.xlu0 %2926, %v1013_v11  }
  0xdd   :  { %v244_v19 = vadd.f32 %v3458_v7, %v243_v18  ;;  %v2812_v23 = vpop.f32.mrb[0].mxu0 }
  0xde   :  { %v3476_v22 = vpack.c.bf16 %v252_v17, %v249_v10  ;;  %v185_v29 = vadd.f32 %v2812_v23, %v3458_v7  ;;  %v176_v30 = vpop.f32.mrb[1].mxu0  ;;  %v983_v23 = vld [vmem:[%s5364_s1 + $0x70] sm:$0xff] }
  0xdf   :  { %v3478_v28 = vpack.c.bf16 %v244_v19, %v241_v15  ;;  %v177_v31 = vadd.f32 %v3458_v7, %v176_v30  ;;  %v2813_v32 = vpop.f32.mrb[2].mxu0 }
  0xe0   :  { %v188_v34 = vadd.f32 %v2813_v32, %v3458_v7  ;;  %v179_v35 = vpop.f32.mrb[3].mxu0  ;;  %1112 = vperm.xlu0 %2926, %v983_v23   ;;  %v987_v23 = vld [vmem:[%s5364_s1 + $0x90] sm:$0xff] }
  0xe1   :  { %v2832_v33 = vpop.f32.mrb[4].mxu1  ;;  %v180_v42 = vadd.f32 %v3458_v7, %v179_v35 }
  0xe2   :  { %v265_v40 = vadd.f32 %v2832_v33, %v3458_v7  ;;  %v256_v41 = vpop.f32.mrb[5].mxu1  ;;  %v3492_v50 = vpack.c.bf16 %v188_v34, %v185_v29  ;;  %v984_v33 = vld [vmem:[%s5364_s1 + $0x78] sm:$0xff]  ;;  %v1015_v34 = vld [vmem:[%s5365_s2 + $0x70] sm:$0xff] }
  0xe3   :  { %v257_v45 = vadd.f32 %v3458_v7, %v256_v41  ;;  %v2833_v49 = vpop.f32.mrb[6].mxu1  ;;  %v3495_v54 = vpack.c.bf16 %v180_v42, %v177_v31  ;;  %1115 = vperm.xlu1 %2927, %v984_v33   ;;  %v988_v33 = vld [vmem:[%s5364_s1 + $0x98] sm:$0xff] }
  0xe4   :  { %v268_v52 = vadd.f32 %v2833_v49, %v3458_v7  ;;  %v259_v53 = vpop.f32.mrb[7].mxu1  ;;  %1272 = vperm.xlu0 %2926, %v1015_v34   ;;  %v1019_v34 = vld [vmem:[%s5365_s2 + $0x90] sm:$0xff] }
  0xe5   :  { %v260_v55 = vadd.f32 %v3458_v7, %v259_v53  ;;  %2664 = vmatprep.mubr.msk.bf16.mxu1 %vm679_vm2, %v3495_v54  ;;  %v2816_v58 = vpop.f32.mrb[4].mxu0 }
  0xe6   :  { %v3501_v57 = vpack.c.bf16 %v268_v52, %v265_v40  ;;  %v201_v61 = vadd.f32 %v2816_v58, %v3458_v7  ;;  %v192_v62 = vpop.f32.mrb[5].mxu0 }
  0xe7   :  { %v3508_v60 = vpack.c.bf16 %v260_v55, %v257_v45  ;;  %v193_v63 = vadd.f32 %v3458_v7, %v192_v62  ;;  %v2817_v0 = vpop.f32.mrb[6].mxu0  ;;  %1275 = vperm.xlu1 %2927, %v1016_v56  }
  0xe8   :  { %v204_v2 = vadd.f32 %v2817_v0, %v3458_v7  ;;  %v195_v3 = vpop.f32.mrb[7].mxu0 }
  0xe9   :  { %v2836_v1 = vpop.f32.mrb[8].mxu1  ;;  %v196_v10 = vadd.f32 %v3458_v7, %v195_v3  ;;  %v3569_v3 = vld [vmem:[%s5367_s7] ss:$0 sm:$0xff] }
  0xea   :  { %v281_v6 = vadd.f32 %v2836_v1, %v3458_v7  ;;  %v272_v9 = vpop.f32.mrb[9].mxu1  ;;  %v3522_v15 = vpack.c.bf16 %v204_v2, %v201_v61  ;;  %v985_v61 = vld [vmem:[%s5364_s1 + $0x80] sm:$0xff] }
  0xeb   :  { %v273_v13 = vadd.f32 %v3458_v7, %v272_v9  ;;  %v2837_v14 = vpop.f32.mrb[10].mxu1  ;;  %v3525_v18 = vpack.c.bf16 %v196_v10, %v193_v63  ;;  %1118 = vperm.xlu0 %2926, %v985_v61   ;;  %v1017_v9 = vld [vmem:[%s5365_s2 + $0x80] sm:$0xff]  ;;  %1121 = vperm.xlu1 %2927, %v986_v5  }
  0xec   :  { %v284_v16 = vadd.f32 %v2837_v14, %v3458_v7  ;;  %v275_v17 = vpop.f32.mrb[11].mxu1 }
  0xed   :  { %v276_v19 = vadd.f32 %v3458_v7, %v275_v17  ;;  %v2820_v35 = vpop.f32.mrb[8].mxu0 }
  0xee   :  { %v3531_v21 = vpack.c.bf16 %v284_v16, %v281_v6  ;;  %v217_v42 = vadd.f32 %v2820_v35, %v3458_v7  ;;  %v208_v43 = vpop.f32.mrb[9].mxu0 }
  0xef   :  { %v3536_v29 = vpack.c.bf16 %v276_v19, %v273_v13  ;;  %v209_v49 = vadd.f32 %v3458_v7, %v208_v43  ;;  %v2821_v52 = vpop.f32.mrb[10].mxu0  ;;  %1278 = vperm.xlu0 %2926, %v1017_v9   ;;  %v1018_v19 = vld [vmem:[%s5365_s2 + $0x88] sm:$0xff] }
  0xf0   :  { %v220_v55 = vadd.f32 %v2821_v52, %v3458_v7  ;;  %v211_v58 = vpop.f32.mrb[11].mxu0  ;;  %1281 = vperm.xlu1 %2927, %v1018_v19   ;;  %v990_v19 = vld [vmem:[%s5364_s1 + $0xa8] sm:$0xff] }
  0xf1   :  { %v2840_v30 = vpop.f32.mrb[12].mxu1  ;;  %v212_v62 = vadd.f32 %v3458_v7, %v211_v58  ;;  %v1020_v58 = vld [vmem:[%s5365_s2 + $0x98] sm:$0xff] }
  0xf2   :  { %v297_v31 = vadd.f32 %v2840_v30, %v3458_v7  ;;  %v288_v32 = vpop.f32.mrb[13].mxu1  ;;  %v3562_v0 = vpack.c.bf16 %v220_v55, %v217_v42 }
  0xf3   :  { %v289_v40 = vadd.f32 %v3458_v7, %v288_v32  ;;  %v2841_v41 = vpop.f32.mrb[14].mxu1  ;;  %v3564_v1 = vpack.c.bf16 %v212_v62, %v209_v49  ;;  %1124 = vperm.xlu0 %2926, %v987_v23   ;;  %v995_v62 = vld [vmem:[%s5364_s1 + $0xd0] sm:$0xff] }
  0xf4   :  { %v300_v44 = vadd.f32 %v2841_v41, %v3458_v7  ;;  %v291_v45 = vpop.f32.mrb[15].mxu1  ;;  %1127 = vperm.xlu1 %2927, %v988_v33  }
  0xf5   :  { %v292_v53 = vadd.f32 %v3458_v7, %v291_v45  ;;  %v2824_v35 = vpop.f32.mrb[12].mxu0 }
  0xf6   :  { %v3554_v59 = vpack.c.bf16 %v300_v44, %v297_v31  ;;  %v233_v41 = vadd.f32 %v2824_v35, %v3458_v7  ;;  %v224_v42 = vpop.f32.mrb[13].mxu0 }
  0xf7   :  { %v3560_v63 = vpack.c.bf16 %v292_v53, %v289_v40  ;;  %v225_v49 = vadd.f32 %v3458_v7, %v224_v42  ;;  %v2825_v52 = vpop.f32.mrb[14].mxu0  ;;  %1284 = vperm.xlu0 %2926, %v1019_v34  }
  0xf8   :  { %v236_v56 = vadd.f32 %v2825_v52, %v3458_v7  ;;  %v227_v61 = vpop.f32.mrb[15].mxu0  ;;  %1287 = vperm.xlu1 %2927, %v1020_v58   ;;  %v992_v58 = vld [vmem:[%s5364_s1 + $0xb8] sm:$0xff] }
  0xf9   :  { %v2846_v2 = vpop.f32.mrb[16].mxu1  ;;  %v228_v5 = vadd.f32 %v3458_v7, %v227_v61  ;;  %v1023_v61 = vld [vmem:[%s5365_s2 + $0xb0] sm:$0xff] }
  0xfa   :  { %v348_v6 = vpop.f32.mrb[17].mxu1  ;;  %v3578_v11 = vadd.f32 %v2846_v2, %v3569_v3  ;;  %v989_v2 = vld [vmem:[%s5364_s1 + $0xa0] sm:$0xff]  ;;  %v3631_v9 = vpack.c.bf16 %v236_v56, %v233_v41  ;;  %v1022_v41 = vld [vmem:[%s5365_s2 + $0xa8] sm:$0xff] }
  0xfb   :  { %v2847_v10 = vpop.f32.mrb[18].mxu1  ;;  %v3584_v16 = vadd.f32 %v3569_v3, %v348_v6  ;;  %1130 = vperm.xlu0 %2926, %v989_v2  }
  0xfc   :  { %v3581_v13 = vadd.f32 %v2847_v10, %v3569_v3  ;;  %v351_v14 = vpop.f32.mrb[19].mxu1  ;;  %v3633_v10 = vpack.c.bf16 %v228_v5, %v225_v49  ;;  %1133 = vperm.xlu1 %2927, %v990_v19  }
  0xfd   :  { %v3587_v17 = vadd.f32 %v3569_v3, %v351_v14 }
  0xfe   :  { %v664_v20 = vpack.c.bf16 %v3581_v13, %v3578_v11 }
  0xff   :  { %v663_v30 = vpack.c.bf16 %v3587_v17, %v3584_v16 }
 0x100   :  { %1293 = vperm.xlu1 %2927, %v1022_v41   ;;  %v993_v41 = vld [vmem:[%s5364_s1 + $0xc0] sm:$0xff] }
 0x101   :  { %v2850_v31 = vpop.f32.mrb[20].mxu1 }
 0x102   :  { %v364_v32 = vpop.f32.mrb[21].mxu1  ;;  %v3607_v43 = vadd.f32 %v2850_v31, %v3569_v3  ;;  %v1021_v31 = vld [vmem:[%s5365_s2 + $0xa0] sm:$0xff] }
 0x103   :  { %v2851_v40 = vpop.f32.mrb[22].mxu1  ;;  %v3614_v53 = vadd.f32 %v3569_v3, %v364_v32  ;;  %1290 = vperm.xlu0 %2926, %v1021_v31  }
 0x104   :  { %v3610_v44 = vadd.f32 %v2851_v40, %v3569_v3  ;;  %v367_v45 = vpop.f32.mrb[23].mxu1  ;;  %1139 = vperm.xlu1 %2927, %v992_v58   ;;  %v994_v58 = vld [vmem:[%s5364_s1 + $0xc8] sm:$0xff] }
 0x105   :  { %v3617_v55 = vadd.f32 %v3569_v3, %v367_v45  ;;  %v991_v45 = vld [vmem:[%s5364_s1 + $0xb0] sm:$0xff] }
 0x107   :  { %1136 = vperm.xlu0 %2926, %v991_v45   ;;  %v1026_v45 = vld [vmem:[%s5365_s2 + $0xc8] sm:$0xff] }
 0x109   :  { %v2854_v14 = vpop.f32.mrb[24].mxu1 }
 0x10a   :  { %v380_v23 = vpop.f32.mrb[25].mxu1  ;;  %v3642_v32 = vadd.f32 %v2854_v14, %v3569_v3 }
 0x10b   :  { %v2855_v7 = vpop.f32.mrb[26].mxu1  ;;  %v3648_v35 = vadd.f32 %v3569_v3, %v380_v23  ;;  %1296 = vperm.xlu0 %2926, %v1023_v61   ;;  %v1025_v61 = vld [vmem:[%s5365_s2 + $0xc0] sm:$0xff] }
 0x10c   :  { %v3645_v33 = vadd.f32 %v2855_v7, %v3569_v3  ;;  %v383_v34 = vpop.f32.mrb[27].mxu1  ;;  %v1024_v7 = vld [vmem:[%s5365_s2 + $0xb8] sm:$0xff] }
 0x10d   :  { %v3651_v40 = vadd.f32 %v3569_v3, %v383_v34  ;;  %1299 = vperm.xlu1 %2927, %v1024_v7  }
 0x10f   :  { %1142 = vperm.xlu0 %2926, %v993_v41  }
 0x111   :  { %v2858_v52 = vpop.f32.mrb[28].mxu1  ;;  %1145 = vperm.xlu1 %2927, %v994_v58  }
 0x112   :  { %v396_v56 = vpop.f32.mrb[29].mxu1  ;;  %v3670_v5 = vadd.f32 %v2858_v52, %v3569_v3 }
 0x113   :  { %v2859_v2 = vpop.f32.mrb[30].mxu1  ;;  %v3676_v23 = vadd.f32 %v3569_v3, %v396_v56  ;;  %1302 = vperm.xlu0 %2926, %v1025_v61   ;;  %v1028_v61 = vld [vmem:[%s5365_s2 + $0xd8] sm:$0xff] }
 0x114   :  { %v3673_v14 = vadd.f32 %v2859_v2, %v3569_v3  ;;  %v399_v19 = vpop.f32.mrb[31].mxu1 }
 0x115   :  { %v3679_v31 = vadd.f32 %v3569_v3, %v399_v19  ;;  %1305 = vperm.xlu1 %2927, %v1026_v45   ;;  %v1027_v45 = vld [vmem:[%s5365_s2 + $0xd0] sm:$0xff] }
 0x117   :  { %1148 = vperm.xlu0 %2926, %v995_v62  }
 0x119   :  { %v2862_v52 = vpop.f32.mrb[32].mxu1 }
 0x11a   :  { %v412_v56 = vpop.f32.mrb[33].mxu1  ;;  %v421_v19 = vadd.f32 %v2862_v52, %v3569_v3  ;;  %v729_v52 = vsel %vm679_vm2, %v663_v30, 0 }
 0x11b   :  { %v2863_v2 = vpop.f32.mrb[34].mxu1  ;;  %v413_v7 = vadd.f32 %v3569_v3, %v412_v56  ;;  %1308 = vperm.xlu0 %2926, %v1027_v45  }
 0x11c   :  { %v424_v34 = vadd.f32 %v2863_v2, %v3569_v3  ;;  %v415_v42 = vpop.f32.mrb[35].mxu1 }
 0x11d   :  { %v416_v41 = vadd.f32 %v3569_v3, %v415_v42 }
 0x11e   :  { %v672_v49 = vpack.c.bf16 %v424_v34, %v421_v19  ;;  %v996_v34 = vld [vmem:[%s5364_s1 + $0xd8] sm:$0xff]  ;;  %v997_v19 = vld [vmem:[%s5364_s1 + $0xe0] sm:$0xff] }
 0x11f   :  { %v671_v6 = vpack.c.bf16 %v416_v41, %v413_v7  ;;  %1151 = vperm.xlu1 %2927, %v996_v34   ;;  %v732_v7 = vsel %vm679_vm2, %v664_v20, 0  ;;  %1154 = vperm.xlu0 %2926, %v997_v19  }
 0x121   :  { %2916 = vmatprep.subr.msk.bf16.mxu1 %vm679_vm2, %v671_v6  ;;  %v2866_v42 = vpop.f32.mrb[36].mxu1 }
 0x122   :  { %2649 = vmatpush3.bf16.xpose.msra.mxu1 %v729_v52  ;;  %v437_v56 = vadd.f32 %v2866_v42, %v3569_v3  ;;  %v428_v58 = vpop.f32.mrb[37].mxu1 }
 0x123   :  { %2917 = vmatprep.subr.msk.bf16.mxu1 %vm679_vm2, %v672_v49  ;;  %v429_v16 = vadd.f32 %v3569_v3, %v428_v58  ;;  %v2867_v17 = vpop.f32.mrb[38].mxu1  ;;  %1311 = vperm.xlu1 %2927, %v1028_v61   ;;  %v1029_v58 = vld [vmem:[%s5365_s2 + $0xe0] sm:$0xff] }
 0x124   :  { %v440_v30 = vadd.f32 %v2867_v17, %v3569_v3  ;;  %v431_v62 = vpop.f32.mrb[39].mxu1  ;;  %1314 = vperm.xlu0 %2926, %v1029_v58  }
 0x125   :  { %v432_v6 = vadd.f32 %v3569_v3, %v431_v62 }
 0x126   :  { %v674_v2 = vpack.c.bf16 %v440_v30, %v437_v56  ;;  %v998_v56 = vld [vmem:[%s5364_s1 + $0xe8] sm:$0xff]  ;;  %v999_v30 = vld [vmem:[%s5364_s1 + $0xf0] sm:$0xff] }
 0x127   :  { %v673_v49 = vpack.c.bf16 %v432_v6, %v429_v16  ;;  %1157 = vperm.xlu1 %2927, %v998_v56   ;;  %v1030_v16 = vld [vmem:[%s5365_s2 + $0xe8] sm:$0xff]  ;;  %v5396_v6 = vpack.c.bf16 %v3617_v55, %v3614_v53 }
 0x128   :  { %1160 = vperm.xlu0 %2926, %v999_v30  }
 0x129   :  { %v2870_v41 = vpop.f32.mrb[40].mxu1  ;;  %v735_v61 = vsel %vm679_vm2, %v5396_v6, 0 }
 0x12a   :  { %2651 = vmatpush3.bf16.xpose.msra.mxu1 %v732_v7  ;;  %v453_v52 = vadd.f32 %v2870_v41, %v3569_v3  ;;  %v444_v42 = vpop.f32.mrb[41].mxu1  ;;  %v1000_v41 = vld [vmem:[%s5364_s1 + $0xf8] sm:$0xff] }
 0x12b   :  { %2918 = vmatprep.subr.msk.bf16.mxu1 %vm679_vm2, %v673_v49  ;;  %v445_v11 = vadd.f32 %v3569_v3, %v444_v42  ;;  %v2871_v13 = vpop.f32.mrb[42].mxu1  ;;  %1317 = vperm.xlu1 %2927, %v1030_v16  }
 0x12c   :  { %v456_v20 = vadd.f32 %v2871_v13, %v3569_v3  ;;  %v447_v34 = vpop.f32.mrb[43].mxu1  ;;  %v5397_v13 = vpack.c.bf16 %v3610_v44, %v3607_v43  ;;  %v5399_v44 = vpack.c.bf16 %v3645_v33, %v3642_v32 }
 0x12d   :  { %v448_v45 = vadd.f32 %v3569_v3, %v447_v34 }
 0x12e   :  { %v676_v17 = vpack.c.bf16 %v456_v20, %v453_v52  ;;  %v738_v20 = vsel %vm679_vm2, %v5397_v13, 0 }
 0x12f   :  { %v675_v62 = vpack.c.bf16 %v448_v45, %v445_v11  ;;  %1163 = vperm.xlu1 %2927, %v1000_v41   ;;  %v744_v45 = vsel %vm679_vm2, %v5399_v44, 0 }
 0x131   :  { %v2874_v19 = vpop.f32.mrb[44].mxu1 }
 0x132   :  { %2653 = vmatpush3.bf16.xpose.msra.mxu1 %v735_v61  ;;  %v469_v49 = vadd.f32 %v2874_v19, %v3569_v3  ;;  %v460_v7 = vpop.f32.mrb[45].mxu1 }
 0x133   :  { %2919 = vmatprep.subr.msk.bf16.mxu1 %vm679_vm2, %v674_v2  ;;  %v461_v52 = vadd.f32 %v3569_v3, %v460_v7  ;;  %v2875_v42 = vpop.f32.mrb[46].mxu1  ;;  %v475_v2 = vld [vmem:[%s5368_s5] sm:$0xf] }
 0x134   :  { %v472_v56 = vadd.f32 %v2875_v42, %v3569_v3  ;;  %v463_v53 = vpop.f32.mrb[47].mxu1  ;;  %2915 = vmatprep.subr.msk.bf16.mxu0 %vm138_vm0, %v475_v2  ;;  %v484_v34 = vsel %vm138_vm0, %v475_v2, 0 }
 0x135   :  { %v464_v55 = vadd.f32 %v3569_v3, %v463_v53  ;;  %2877 = vmatpush3.bf16.msra.mxu0 %v484_v34  ;;  %v5398_v3 = vpack.c.bf16 %v3651_v40, %v3648_v35 }
 0x136   :  { %v678_v58 = vpack.c.bf16 %v472_v56, %v469_v49 }
 0x137   :  { %v677_v11 = vpack.c.bf16 %v464_v55, %v461_v52  ;;  %v741_v43 = vsel %vm679_vm2, %v5398_v3, 0 }
 0x138   :  { %2879 = vmatmul.mubr.msk.bf16.vlgmr.msra.gmra.mrb[16].mxu0 %vm89_vm1, %v3275_v24  ;;  %v5400_v24 = vpack.c.bf16 %v3679_v31, %v3676_v23 }
 0x139   :  { %2882 = vmatprep.mubr.msk.bf16.mxu0 %vm89_vm1, %v3279_v26 }
 0x13a   :  { %2655 = vmatpush3.bf16.xpose.msra.mxu1 %v738_v20  ;;  %v747_v26 = vsel %vm679_vm2, %v5400_v24, 0 }
 0x13b   :  { %2920 = vmatprep.subr.msk.bf16.mxu1 %vm679_vm2, %v675_v62 }
 0x140   :  { %2883 = vmatmul.mubr.msk.bf16.gmra.mrb[20].mxu0 %vm89_vm1, %v3316_v36  ;;  %v5401_v36 = vpack.c.bf16 %v3673_v14, %v3670_v5 }
 0x141   :  { %2886 = vmatprep.mubr.msk.bf16.mxu0 %vm89_vm1, %v3320_v38 }
 0x142   :  { %2657 = vmatpush3.bf16.xpose.msra.mxu1 %v741_v43  ;;  %v750_v38 = vsel %vm679_vm2, %v5401_v36, 0 }
 0x143   :  { %2921 = vmatprep.subr.msk.bf16.mxu1 %vm679_vm2, %v676_v17 }
 0x148   :  { %2887 = vmatmul.mubr.msk.bf16.gmra.mrb[24].mxu0 %vm89_vm1, %v3350_v46 }
 0x149   :  { %2890 = vmatprep.mubr.msk.bf16.mxu0 %vm89_vm1, %v3354_v48 }
 0x14a   :  { %2659 = vmatpush3.bf16.xpose.msra.mxu1 %v744_v45 }
 0x14b   :  { %2922 = vmatprep.subr.msk.bf16.mxu1 %vm679_vm2, %v677_v11 }
 0x150   :  { %2891 = vmatmul.mubr.msk.bf16.gmra.mrb[28].mxu0 %vm89_vm1, %v3369_v51 }
 0x151   :  { %2894 = vmatprep.mubr.msk.bf16.mxu0 %vm89_vm1, %v3215_v4  ;;  %v3883_v4 = vpop.permute.xlu0 %1070 }
 0x152   :  { %2661 = vmatpush3.bf16.xpose.msra.mxu1 %v747_v26 }
 0x153   :  { %2923 = vmatprep.subr.msk.bf16.mxu1 %vm679_vm2, %v678_v58 }
 0x158   :  { %2895 = vmatmul.mubr.msk.bf16.gmra.mrb[32].mxu0 %vm89_vm1, %v3227_v8  ;;  %v3885_v8 = vpop.permute.xlu1 %1076 }
 0x159   :  { %2898 = vmatprep.mubr.msk.bf16.mxu0 %vm89_vm1, %v3239_v12  ;;  %v3887_v12 = vpop.permute.xlu0 %1073 }
 0x15a   :  { %2663 = vmatpush3.bf16.xpose.msra.mxu1 %v750_v38 }
 0x160   :  { %2899 = vmatmul.mubr.msk.bf16.gmra.mrb[36].mxu0 %vm89_vm1, %v3277_v25  ;;  %v3889_v25 = vpop.permute.xlu1 %1079 }
 0x161   :  { %2665 = vmatmul.mubr.msk.bf16.vlgmr.msra.gmra.mrb[48].mxu1 %vm679_vm2, %v3495_v54  ;;  %2902 = vmatprep.mubr.msk.bf16.mxu0 %vm89_vm1, %v3282_v27  ;;  %v3891_v27 = vpop.permute.xlu0 %1082 }
 0x162   :  { %2666 = vmatprep.mubr.msk.bf16.mxu1 %vm679_vm2, %v3492_v50 }
 0x168   :  { %2903 = vmatmul.mubr.msk.bf16.gmra.mrb[40].mxu0 %vm89_vm1, %v3318_v37  ;;  %v3893_v37 = vpop.permute.xlu1 %1085 }
 0x169   :  { %2667 = vmatmul.mubr.msk.bf16.gmra.mrb[52].mxu1 %vm679_vm2, %v3492_v50  ;;  %2906 = vmatprep.mubr.msk.bf16.mxu0 %vm89_vm1, %v3322_v39  ;;  %v3895_v39 = vpop.permute.xlu0 %1088 }
 0x16a   :  { %2668 = vmatprep.mubr.msk.bf16.mxu1 %vm679_vm2, %v3525_v18 }
 0x16c   :  { %v3897_v46 = vpop.permute.xlu1 %1091 }
 0x170   :  { %2907 = vmatmul.mubr.msk.bf16.gmra.mrb[44].mxu0 %vm89_vm1, %v3352_v47  ;;  %v3899_v47 = vpop.permute.xlu0 %1094  ;;  %v3901_v48 = vpop.permute.xlu1 %1097 }
 0x171   :  { %2669 = vmatmul.mubr.msk.bf16.gmra.mrb[56].mxu1 %vm679_vm2, %v3525_v18 }
 0x172   :  { %2670 = vmatprep.mubr.msk.bf16.mxu1 %vm679_vm2, %v3522_v15 }
 0x174   :  { %v3903_v51 = vpop.permute.xlu0 %1100 }
 0x179   :  { %2671 = vmatmul.mubr.msk.bf16.gmra.mrb[60].mxu1 %vm679_vm2, %v3522_v15 }
 0x17a   :  { %2672 = vmatprep.mubr.msk.bf16.mxu1 %vm679_vm2, %v3564_v1 }
 0x181   :  { %2673 = vmatmul.mubr.msk.bf16.gmra.mrb[64].mxu1 %vm679_vm2, %v3564_v1 }
 0x182   :  { %2674 = vmatprep.mubr.msk.bf16.mxu1 %vm679_vm2, %v3562_v0 }
 0x189   :  { %2675 = vmatmul.mubr.msk.bf16.gmra.mrb[68].mxu1 %vm679_vm2, %v3562_v0 }
 0x18a   :  { %2676 = vmatprep.mubr.msk.bf16.mxu1 %vm679_vm2, %v3633_v10 }
 0x191   :  { %2677 = vmatmul.mubr.msk.bf16.gmra.mrb[72].mxu1 %vm679_vm2, %v3633_v10 }
 0x192   :  { %2678 = vmatprep.mubr.msk.bf16.mxu1 %vm679_vm2, %v3631_v9 }
 0x199   :  { %2679 = vmatmul.mubr.msk.bf16.gmra.mrb[76].mxu1 %vm679_vm2, %v3631_v9 }
 0x19a   :  { %2680 = vmatprep.mubr.msk.bf16.mxu1 %vm679_vm2, %v3478_v28 }
 0x1a1   :  { %2681 = vmatmul.mubr.msk.bf16.gmra.mrb[80].mxu1 %vm679_vm2, %v3478_v28  ;;  %v3907_v28 = vpop.permute.xlu0 %1230 }
 0x1a2   :  { %2682 = vmatprep.mubr.msk.bf16.mxu1 %vm679_vm2, %v3476_v22 }
 0x1a5   :  { %v3911_v54 = vpop.permute.xlu0 %1236 }
 0x1a9   :  { %2683 = vmatmul.mubr.msk.bf16.gmra.mrb[84].mxu1 %vm679_vm2, %v3476_v22  ;;  %v3905_v22 = vpop.permute.xlu1 %1103  ;;  %v3929_v9 = vpop.permute.xlu0 %1242 }
 0x1aa   :  { %2684 = vmatprep.mubr.msk.bf16.mxu1 %vm679_vm2, %v3508_v60 }
 0x1ad   :  { %v3909_v50 = vpop.permute.xlu1 %1233  ;;  %v3960_v7 = vpop.permute.xlu0 %1248 }
 0x1b1   :  { %2685 = vmatmul.mubr.msk.bf16.gmra.mrb[88].mxu1 %vm679_vm2, %v3508_v60  ;;  %v3916_v60 = vld [vmem:[%s5369_s8] ss:$0 sm:$0xff]  ;;  %v3999_v26 = vpop.permute.xlu0 %1254 }
 0x1b2   :  { %2686 = vmatprep.mubr.msk.bf16.mxu1 %vm679_vm2, %v3501_v57 }
 0x1b9   :  { %2687 = vmatmul.mubr.msk.bf16.gmra.mrb[92].mxu1 %vm679_vm2, %v3501_v57 }
 0x1ba   :  { %2688 = vmatprep.mubr.msk.bf16.mxu1 %vm679_vm2, %v3536_v29 }
 0x1c1   :  { %2689 = vmatmul.mubr.msk.bf16.gmra.mrb[96].mxu1 %vm679_vm2, %v3536_v29 }
 0x1c2   :  { %2690 = vmatprep.mubr.msk.bf16.mxu1 %vm679_vm2, %v3531_v21 }
 0x1c9   :  { %2691 = vmatmul.mubr.msk.bf16.gmra.mrb[100].mxu1 %vm679_vm2, %v3531_v21 }
 0x1ca   :  { %2692 = vmatprep.mubr.msk.bf16.mxu1 %vm679_vm2, %v3560_v63 }
 0x1d1   :  { %2693 = vmatmul.mubr.msk.bf16.gmra.mrb[104].mxu1 %vm679_vm2, %v3560_v63  ;;  %v3924_v63 = vpop.permute.xlu1 %1239 }
 0x1d2   :  { %2694 = vmatprep.mubr.msk.bf16.mxu1 %vm679_vm2, %v3554_v59 }
 0x1d5   :  { %v3953_v6 = vpop.permute.xlu1 %1245 }
 0x1d9   :  { %2695 = vmatmul.mubr.msk.bf16.gmra.mrb[108].mxu1 %vm679_vm2, %v3554_v59  ;;  %v5371_v59 = vlaneseq  ;;  %v3990_v44 = vpop.permute.xlu1 %1251 }
 0x1db   :  { %v3945_v31 = vand.u32 127, %v5371_v59 }
 0x1dd   :  { %v3968_v56 = vadd.s32 128, %v3945_v31  ;;  %vm1165_vm3 = vcmp.ge.s32.totalorder %v3945_v31, %v3883_v4  ;;  %vm1325_vm4 = vcmp.lt.s32.totalorder %v3945_v31, %v3907_v28  ;;  %vm1167_vm7 = vcmp.ge.s32.totalorder %v3945_v31, %v3887_v12 }
 0x1de   :  { %vm1327_vm8 = vcmp.lt.s32.totalorder %v3945_v31, %v3909_v50  ;;  %vm1389_vm9 = vmand %vm1165_vm3, %vm1325_vm4  ;;  %vm1169_vm15 = vcmp.ge.s32.totalorder %v3945_v31, %v3885_v8  ;;  %vm1329_vm0 = vcmp.lt.s32.totalorder %v3945_v31, %v3911_v54  ;;  %vm1171_vm4 = vcmp.ge.s32.totalorder %v3945_v31, %v3889_v25 }
 0x1df   :  { %vm1166_vm5 = vcmp.ge.s32.totalorder %v3968_v56, %v3883_v4  ;;  %vm1326_vm6 = vcmp.lt.s32.totalorder %v3968_v56, %v3907_v28  ;;  %vm1168_vm10 = vcmp.ge.s32.totalorder %v3968_v56, %v3887_v12  ;;  %vm1328_vm11 = vcmp.lt.s32.totalorder %v3968_v56, %v3909_v50  ;;  %vm1391_vm13 = vmand %vm1167_vm7, %vm1327_vm8  ;;  %v4060_v50 = vpop.permute.xlu1 %1257 }
 0x1e0   :  { %vm1390_vm12 = vmand %vm1166_vm5, %vm1326_vm6  ;;  %vm1170_vm1 = vcmp.ge.s32.totalorder %v3968_v56, %v3885_v8  ;;  %vm1330_vm3 = vcmp.lt.s32.totalorder %v3968_v56, %v3911_v54  ;;  %vm1331_vm5 = vcmp.lt.s32.totalorder %v3945_v31, %v3924_v63  ;;  %vm1172_vm7 = vcmp.ge.s32.totalorder %v3968_v56, %v3889_v25 }
 0x1e1   :  { %vm1392_vm14 = vmand %vm1168_vm10, %vm1328_vm11  ;;  %vm1332_vm8 = vcmp.lt.s32.totalorder %v3968_v56, %v3924_v63 }
 0x1e2   :  { %vm1393_vm6 = vmand %vm1169_vm15, %vm1329_vm0  ;;  %vm1334_vm15 = vcmp.lt.s32.totalorder %v3968_v56, %v3929_v9  ;;  %vm1175_vm0 = vcmp.ge.s32.totalorder %v3945_v31, %v3893_v37 }
 0x1e3   :  { %vm1395_vm10 = vmand %vm1171_vm4, %vm1331_vm5  ;;  %vm1176_vm4 = vcmp.ge.s32.totalorder %v3968_v56, %v3893_v37  ;;  %vm1336_vm5 = vcmp.lt.s32.totalorder %v3968_v56, %v3953_v6 }
 0x1e4   :  { %vm1396_vm11 = vmand %vm1172_vm7, %vm1332_vm8 }
 0x1e5   :  { %vm1400_vm8 = vmand %vm1176_vm4, %vm1336_vm5 }
 0x20b   :  { %v2880_v57 = vpop.f32.mrb[16].mxu0 }
 0x20c   :  { %v520_v15 = vpop.f32.mrb[17].mxu0  ;;  %v3919_v18 = vadd.f32 %v2880_v57, %v3916_v60 }
 0x20d   :  { %v3922_v21 = vadd.f32 %v3916_v60, %v520_v15  ;;  %v2881_v29 = vpop.f32.mrb[18].mxu0 }
 0x20e   :  { %v3927_v0 = vadd.f32 %v2881_v29, %v3916_v60  ;;  %v523_v1 = vpop.f32.mrb[19].mxu0 }
 0x20f   :  { %v3932_v10 = vadd.f32 %v3916_v60, %v523_v1 }
 0x210   :  { %v1934_v33 = vpack.c.bf16 %v3927_v0, %v3919_v18 }
 0x211   :  { %v1933_v5 = vpack.c.bf16 %v3932_v10, %v3922_v21 }
 0x213   :  { %v2884_v32 = vpop.f32.mrb[20].mxu0 }
 0x214   :  { %v3937_v35 = vadd.f32 %v2884_v32, %v3916_v60  ;;  %v536_v40 = vpop.f32.mrb[21].mxu0 }
 0x215   :  { %v3942_v14 = vadd.f32 %v3916_v60, %v536_v40  ;;  %v2885_v23 = vpop.f32.mrb[22].mxu0 }
 0x216   :  { %v3948_v16 = vadd.f32 %v2885_v23, %v3916_v60  ;;  %v539_v17 = vpop.f32.mrb[23].mxu0 }
 0x217   :  { %v3951_v30 = vadd.f32 %v3916_v60, %v539_v17 }
 0x218   :  { %v1936_v61 = vpack.c.bf16 %v3948_v16, %v3937_v35 }
 0x219   :  { %v1935_v41 = vpack.c.bf16 %v3951_v30, %v3942_v14 }
 0x21b   :  { %v2888_v62 = vpop.f32.mrb[24].mxu0 }
 0x21c   :  { %v3958_v19 = vadd.f32 %v2888_v62, %v3916_v60  ;;  %v552_v49 = vpop.f32.mrb[25].mxu0 }
 0x21d   :  { %v3965_v52 = vadd.f32 %v3916_v60, %v552_v49  ;;  %v2889_v42 = vpop.f32.mrb[26].mxu0 }
 0x21e   :  { %v3971_v53 = vadd.f32 %v2889_v42, %v3916_v60  ;;  %v555_v55 = vpop.f32.mrb[27].mxu0 }
 0x21f   :  { %v3974_v58 = vadd.f32 %v3916_v60, %v555_v55 }
 0x220   :  { %v1938_v13 = vpack.c.bf16 %v3971_v53, %v3958_v19 }
 0x221   :  { %v1937_v34 = vpack.c.bf16 %v3974_v58, %v3965_v52 }
 0x223   :  { %v2892_v11 = vpop.f32.mrb[28].mxu0 }
 0x224   :  { %v3979_v20 = vadd.f32 %v2892_v11, %v3916_v60  ;;  %v568_v2 = vpop.f32.mrb[29].mxu0 }
 0x225   :  { %v3988_v3 = vadd.f32 %v3916_v60, %v568_v2  ;;  %v2893_v43 = vpop.f32.mrb[30].mxu0 }
 0x226   :  { %v3997_v45 = vadd.f32 %v2893_v43, %v3916_v60  ;;  %v571_v24 = vpop.f32.mrb[31].mxu0 }
 0x227   :  { %v4006_v36 = vadd.f32 %v3916_v60, %v571_v24 }
 0x228   :  { %v1940_v15 = vpack.c.bf16 %v3997_v45, %v3979_v20 }
 0x229   :  { %v1939_v23 = vpack.c.bf16 %v4006_v36, %v3988_v3 }
 0x22b   :  { %v2896_v38 = vpop.f32.mrb[32].mxu0 }
 0x22c   :  { %v593_v29 = vadd.f32 %v2896_v38, %v3916_v60  ;;  %v584_v1 = vpop.f32.mrb[33].mxu0 }
 0x22d   :  { %v585_v17 = vadd.f32 %v3916_v60, %v584_v1  ;;  %v2897_v62 = vpop.f32.mrb[34].mxu0 }
 0x22e   :  { %v596_v28 = vadd.f32 %v2897_v62, %v3916_v60  ;;  %v587_v4 = vpop.f32.mrb[35].mxu0 }
 0x22f   :  { %v588_v43 = vadd.f32 %v3916_v60, %v587_v4 }
 0x230   :  { %v1942_v38 = vpack.c.bf16 %v596_v28, %v593_v29  ;;  %v4066_v29 = vpop.permute.xlu0 %1260 }
 0x231   :  { %v1941_v12 = vpack.c.bf16 %v588_v43, %v585_v17 }
 0x233   :  { %v2900_v1 = vpop.f32.mrb[36].mxu0  ;;  %2696 = vmatprep.subr.bf16.mxu0 %v1941_v12 }
 0x234   :  { %v810_v57 = vpop.f32.mrb[48].mxu1  ;;  %v609_v17 = vadd.f32 %v2900_v1, %v3916_v60  ;;  %v600_v62 = vpop.f32.mrb[37].mxu0  ;;  %2697 = vmatpush3.bf16.msra.mxu0 %v1933_v5 }
 0x235   :  { %v4021_v32 = vsel %vm1389_vm9, %v810_v57, -1e+12  ;;  %v812_v40 = vpop.f32.mrb[49].mxu1  ;;  %vm1394_vm9 = vmand %vm1170_vm1, %vm1330_vm3  ;;  %v601_v4 = vadd.f32 %v3916_v60, %v600_v62  ;;  %2698 = vmatprep.subr.bf16.mxu0 %v1942_v38  ;;  %v4120_v1 = vpop.permute.xlu1 %1263  ;;  %vm1335_vm1 = vcmp.lt.s32.totalorder %v3945_v31, %v3953_v6 }
 0x236   :  { %v4032_v49 = vsel %vm1390_vm12, %v812_v40, -1e+12  ;;  %v814_v42 = vpop.f32.mrb[50].mxu1  ;;  %vm1173_vm12 = vcmp.ge.s32.totalorder %v3945_v31, %v3891_v27  ;;  %v4126_v18 = vpop.permute.xlu0 %1106  ;;  %vm1399_vm7 = vmand %vm1175_vm0, %vm1335_vm1  ;;  %vm1180_vm0 = vcmp.ge.s32.totalorder %v3968_v56, %v3897_v46  ;;  %vm1340_vm1 = vcmp.lt.s32.totalorder %v3968_v56, %v3990_v44 }
 0x237   :  { %v4041_v55 = vsel %vm1391_vm13, %v814_v42, -1e+12  ;;  %v816_v11 = vpop.f32.mrb[51].mxu1  ;;  %v1517_v2 = vmax.f32 %v4021_v32, %v4032_v49  ;;  %vm1333_vm13 = vcmp.lt.s32.totalorder %v3945_v31, %v3929_v9  ;;  %vm1404_vm5 = vmand %vm1180_vm0, %vm1340_vm1 }
 0x238   :  { %v4052_v24 = vsel %vm1392_vm14, %v816_v11, -1e+12  ;;  %v2901_v11 = vpop.f32.mrb[38].mxu0  ;;  %2699 = vmatpush3.bf16.msra.mxu0 %v1934_v33  ;;  %vm1174_vm14 = vcmp.ge.s32.totalorder %v3968_v56, %v3891_v27  ;;  %vm1397_vm3 = vmand %vm1173_vm12, %vm1333_vm13  ;;  %vm1338_vm12 = vcmp.lt.s32.totalorder %v3968_v56, %v3960_v7  ;;  %vm1179_vm13 = vcmp.ge.s32.totalorder %v3945_v31, %v3897_v46 }
 0x239   :  { %1518 = vmax.xlane.f32.xlu0 %v1517_v2  ;;  %v1520_v57 = vmax.f32 %v4041_v55, %v4052_v24  ;;  %v612_v54 = vadd.f32 %v2901_v11, %v3916_v60  ;;  %v603_v21 = vpop.f32.mrb[39].mxu0 }
 0x23a   :  { %v604_v38 = vadd.f32 %v3916_v60, %v603_v21  ;;  %v4186_v35 = vpop.permute.xlu0 %1266 }
 0x23b   :  { %1521 = vmax.xlane.f32.xlu1 %v1520_v57  ;;  %v1944_v12 = vpack.c.bf16 %v612_v54, %v609_v17  ;;  %v2904_v0 = vpop.f32.mrb[40].mxu0 }
 0x23c   :  { %v820_v40 = vpop.f32.mrb[52].mxu1  ;;  %v1943_v25 = vpack.c.bf16 %v604_v38, %v601_v4  ;;  %v616_v17 = vpop.f32.mrb[41].mxu0 }
 0x23d   :  { %v4080_v42 = vsel %vm1393_vm6, %v820_v40, -1e+12  ;;  %v822_v28 = vpop.f32.mrb[53].mxu1  ;;  %v625_v40 = vadd.f32 %v2904_v0, %v3916_v60  ;;  %vm1398_vm6 = vmand %vm1174_vm14, %vm1334_vm15  ;;  %v617_v4 = vadd.f32 %v3916_v60, %v616_v17  ;;  %v2905_v11 = vpop.f32.mrb[42].mxu0  ;;  %vm1339_vm14 = vcmp.lt.s32.totalorder %v3945_v31, %v3990_v44 }
 0x23e   :  { %v4089_v2 = vsel %vm1394_vm9, %v822_v28, -1e+12  ;;  %v824_v43 = vpop.f32.mrb[54].mxu1  ;;  %2700 = vmatprep.subr.bf16.mxu0 %v1943_v25  ;;  %v628_v9 = vadd.f32 %v2905_v11, %v3916_v60  ;;  %v619_v14 = vpop.f32.mrb[43].mxu0  ;;  %vm1177_vm9 = vcmp.ge.s32.totalorder %v3945_v31, %v3895_v39  ;;  %vm1403_vm4 = vmand %vm1179_vm13, %vm1339_vm14  ;;  %vm1184_vm13 = vcmp.ge.s32.totalorder %v3968_v56, %v3901_v48 }
 0x23f   :  { %v4098_v10 = vsel %vm1395_vm10, %v824_v43, -1e+12  ;;  %v826_v8 = vpop.f32.mrb[55].mxu1  ;;  %v1523_v5 = vmax.f32 %v4080_v42, %v4089_v2  ;;  %2701 = vmatpush3.bf16.msra.mxu0 %v1935_v41  ;;  %v620_v21 = vadd.f32 %v3916_v60, %v619_v14  ;;  %vm1337_vm10 = vcmp.lt.s32.totalorder %v3945_v31, %v3960_v7  ;;  %v4184_v38 = vpop.permute.xlu1 %1109 }
 0x240   :  { %v4109_v57 = vsel %vm1396_vm11, %v826_v8, -1e+12  ;;  %2702 = vmatprep.subr.bf16.mxu0 %v1944_v12  ;;  %vm1178_vm11 = vcmp.ge.s32.totalorder %v3968_v56, %v3895_v39  ;;  %vm1401_vm15 = vmand %vm1177_vm9, %vm1337_vm10  ;;  %vm1342_vm9 = vcmp.lt.s32.totalorder %v3968_v56, %v3999_v26  ;;  %v4246_v19 = vpop.permute.xlu0 %1112  ;;  %vm1183_vm10 = vcmp.ge.s32.totalorder %v3945_v31, %v3901_v48 }
 0x241   :  { %1524 = vmax.xlane.f32.xlu0 %v1523_v5  ;;  %v1526_v63 = vmax.f32 %v4098_v10, %v4109_v57  ;;  %v1946_v5 = vpack.c.bf16 %v628_v9, %v625_v40  ;;  %v1945_v37 = vpack.c.bf16 %v620_v21, %v617_v4  ;;  %vm1344_vm14 = vcmp.lt.s32.totalorder %v3968_v56, %v4060_v50 }
 0x242   :  { %vm1408_vm1 = vmand %vm1184_vm13, %vm1344_vm14 }
 0x243   :  { %1527 = vmax.xlane.f32.xlu1 %v1526_v63  ;;  %2703 = vmatpush3.bf16.msra.mxu0 %v1936_v61  ;;  %v2908_v61 = vpop.f32.mrb[44].mxu0 }
 0x244   :  { %v830_v33 = vpop.f32.mrb[56].mxu1  ;;  %2704 = vmatprep.subr.bf16.mxu0 %v1945_v37  ;;  %v632_v25 = vpop.f32.mrb[45].mxu0  ;;  %v641_v52 = vadd.f32 %v2908_v61, %v3916_v60 }
 0x245   :  { %v4140_v62 = vsel %vm1397_vm3, %v830_v33, -1e+12  ;;  %v832_v28 = vpop.f32.mrb[57].mxu1  ;;  %vm1402_vm3 = vmand %vm1178_vm11, %vm1338_vm12  ;;  %v633_v7 = vadd.f32 %v3916_v60, %v632_v25  ;;  %v2909_v58 = vpop.f32.mrb[46].mxu0  ;;  %vm1343_vm11 = vcmp.lt.s32.totalorder %v3945_v31, %v4060_v50 }
 0x246   :  { %v4149_v43 = vsel %vm1398_vm6, %v832_v28, -1e+12  ;;  %v834_v54 = vpop.f32.mrb[58].mxu1  ;;  %v644_v17 = vadd.f32 %v2909_v58, %v3916_v60  ;;  %v635_v28 = vpop.f32.mrb[47].mxu0  ;;  %vm1181_vm6 = vcmp.ge.s32.totalorder %v3945_v31, %v3899_v47  ;;  %vm1407_vm0 = vmand %vm1183_vm10, %vm1343_vm11  ;;  %vm1188_vm10 = vcmp.ge.s32.totalorder %v3968_v56, %v3905_v22 }
 0x247   :  { %v4158_v30 = vsel %vm1399_vm7, %v834_v54, -1e+12  ;;  %v836_v27 = vpop.f32.mrb[59].mxu1  ;;  %v1529_v41 = vmax.f32 %v4140_v62, %v4149_v43  ;;  %2705 = vmatpush3.bf16.msra.mxu0 %v1937_v34  ;;  %v636_v11 = vadd.f32 %v3916_v60, %v635_v28  ;;  %vm1341_vm7 = vcmp.lt.s32.totalorder %v3945_v31, %v3999_v26  ;;  %v4240_v54 = vpop.permute.xlu1 %1269 }
 0x248   :  { %v4169_v8 = vsel %vm1400_vm8, %v836_v27, -1e+12  ;;  %2706 = vmatprep.subr.bf16.mxu0 %v1946_v5  ;;  %v1948_v46 = vpack.c.bf16 %v644_v17, %v641_v52  ;;  %vm1182_vm8 = vcmp.ge.s32.totalorder %v3968_v56, %v3899_v47  ;;  %vm1405_vm12 = vmand %vm1181_vm6, %vm1341_vm7  ;;  %v4271_v21 = vpop.permute.xlu0 %1272  ;;  %vm1346_vm6 = vcmp.lt.s32.totalorder %v3968_v56, %v4066_v29 }
 0x249   :  { %1530 = vmax.xlane.f32.xlu0 %v1529_v41  ;;  %v1532_v6 = vmax.f32 %v4158_v30, %v4169_v8  ;;  %v1947_v60 = vpack.c.bf16 %v636_v11, %v633_v7  ;;  %vm1187_vm7 = vcmp.ge.s32.totalorder %v3945_v31, %v3905_v22  ;;  %vm1348_vm11 = vcmp.lt.s32.totalorder %v3968_v56, %v4120_v1 }
 0x24a   :  { %vm1412_vm14 = vmand %vm1188_vm10, %vm1348_vm11 }
 0x24b   :  { %1533 = vmax.xlane.f32.xlu1 %v1532_v6  ;;  %2707 = vmatpush3.bf16.msra.mxu0 %v1938_v13  ;;  %v4267_v27 = vpop.permute.xlu1 %1115 }
 0x24c   :  { %v840_v16 = vpop.f32.mrb[60].mxu1  ;;  %2708 = vmatprep.subr.bf16.mxu0 %v1947_v60 }
 0x24d   :  { %v4199_v12 = vsel %vm1401_vm15, %v840_v16, -1e+12  ;;  %v842_v63 = vpop.f32.mrb[61].mxu1  ;;  %vm1406_vm15 = vmand %vm1182_vm8, %vm1342_vm9  ;;  %vm1347_vm8 = vcmp.lt.s32.totalorder %v3945_v31, %v4120_v1 }
 0x24e   :  { %v4207_v0 = vsel %vm1402_vm3, %v842_v63, -1e+12  ;;  %v844_v33 = vpop.f32.mrb[62].mxu1  ;;  %vm1185_vm3 = vcmp.ge.s32.totalorder %v3945_v31, %v3903_v51  ;;  %vm1411_vm13 = vmand %vm1187_vm7, %vm1347_vm8  ;;  %vm1192_vm7 = vcmp.ge.s32.totalorder %v3968_v56, %v4184_v38  ;;  %vm1352_vm8 = vcmp.lt.s32.totalorder %v3968_v56, %v4240_v54 }
 0x24f   :  { %v4217_v34 = vsel %vm1403_vm4, %v844_v33, -1e+12  ;;  %v846_v39 = vpop.f32.mrb[63].mxu1  ;;  %v1535_v40 = vmax.f32 %v4199_v12, %v4207_v0  ;;  %2709 = vmatpush3.bf16.msra.mxu0 %v1939_v23  ;;  %vm1345_vm4 = vcmp.lt.s32.totalorder %v3945_v31, %v4066_v29  ;;  %v4296_v45 = vpop.permute.xlu1 %1275  ;;  %vm1416_vm11 = vmand %vm1192_vm7, %vm1352_vm8 }
 0x250   :  { %v4228_v4 = vsel %vm1404_vm5, %v846_v39, -1e+12  ;;  %2710 = vmatprep.subr.bf16.mxu0 %v1948_v46  ;;  %vm1186_vm5 = vcmp.ge.s32.totalorder %v3968_v56, %v3903_v51  ;;  %vm1409_vm9 = vmand %vm1185_vm3, %vm1345_vm4  ;;  %v4300_v29 = vpop.permute.xlu0 %1118  ;;  %vm1350_vm3 = vcmp.lt.s32.totalorder %v3968_v56, %v4186_v35  ;;  %vm1191_vm4 = vcmp.ge.s32.totalorder %v3945_v31, %v4184_v38 }
 0x251   :  { %5402 = vst [vmem:[#allocation2_spill] sm:$0xff] %v4228_v4  ;;  %1536 = vmax.xlane.f32.xlu0 %v1535_v40  ;;  %v1538_v44 = vmax.f32 %v4217_v34, %v4228_v4  ;;  %vm1197_vm7 = vcmp.ge.s32.totalorder %v3945_v31, %v4300_v29 }
 0x253   :  { %1539 = vmax.xlane.f32.xlu1 %v1538_v44  ;;  %2711 = vmatpush3.bf16.msra.mxu0 %v1940_v15  ;;  %v4322_v16 = vpop.permute.xlu1 %1121 }
 0x254   :  { %v850_v53 = vpop.f32.mrb[64].mxu1 }
 0x255   :  { %v4256_v47 = vsel %vm1405_vm12, %v850_v53, -1e+12  ;;  %v852_v13 = vpop.f32.mrb[65].mxu1  ;;  %vm1410_vm12 = vmand %vm1186_vm5, %vm1346_vm6  ;;  %vm1351_vm5 = vcmp.lt.s32.totalorder %v3945_v31, %v4240_v54 }
 0x256   :  { %5403 = vst [vmem:[#allocation3_spill] sm:$0xff] %v4256_v47  ;;  %v4261_v26 = vsel %vm1406_vm15, %v852_v13, -1e+12  ;;  %v854_v9 = vpop.f32.mrb[66].mxu1  ;;  %vm1189_vm15 = vcmp.ge.s32.totalorder %v3945_v31, %v4126_v18  ;;  %vm1415_vm10 = vmand %vm1191_vm4, %vm1351_vm5  ;;  %vm1196_vm4 = vcmp.ge.s32.totalorder %v3968_v56, %v4267_v27  ;;  %vm1356_vm5 = vcmp.lt.s32.totalorder %v3968_v56, %v4296_v45 }
 0x257   :  { %5404 = vst [vmem:[#allocation4_spill] sm:$0xff] %v4261_v26  ;;  %v4263_v14 = vsel %vm1407_vm0, %v854_v9, -1e+12  ;;  %v856_v48 = vpop.f32.mrb[67].mxu1  ;;  %v1541_v50 = vmax.f32 %v4256_v47, %v4261_v26  ;;  %vm1349_vm0 = vcmp.lt.s32.totalorder %v3945_v31, %v4186_v35  ;;  %v4342_v40 = vpop.permute.xlu1 %1281 }
 0x258   :  { %5405 = vst [vmem:[#allocation5_spill] sm:$0xff] %v4263_v14  ;;  %v4269_v41 = vsel %vm1408_vm1, %v856_v48, -1e+12  ;;  %vm1190_vm1 = vcmp.ge.s32.totalorder %v3968_v56, %v4126_v18  ;;  %vm1413_vm6 = vmand %vm1189_vm15, %vm1349_vm0  ;;  %v4328_v18 = vpop.permute.xlu0 %1278  ;;  %vm1354_vm15 = vcmp.lt.s32.totalorder %v3968_v56, %v4271_v21  ;;  %vm1195_vm0 = vcmp.ge.s32.totalorder %v3945_v31, %v4267_v27 }
 0x259   :  { %5406 = vst [vmem:[#allocation6_spill] sm:$0xff] %v4269_v41  ;;  %1542 = vmax.xlane.f32.xlu0 %v1541_v50  ;;  %v1544_v3 = vmax.f32 %v4263_v14, %v4269_v41  ;;  %vm1357_vm8 = vcmp.lt.s32.totalorder %v3945_v31, %v4328_v18 }
 0x25b   :  { %1545 = vmax.xlane.f32.xlu1 %v1544_v3  ;;  %v4346_v54 = vpop.permute.xlu1 %1127 }
 0x25c   :  { %v860_v36 = vpop.f32.mrb[68].mxu1  ;;  %v4344_v17 = vpop.permute.xlu0 %1124 }
 0x25d   :  { %v4294_v20 = vsel %vm1409_vm9, %v860_v36, -1e+12  ;;  %v862_v51 = vpop.f32.mrb[69].mxu1  ;;  %vm1414_vm9 = vmand %vm1190_vm1, %vm1350_vm3  ;;  %v1032_v36 = vld [vmem:[%s5365_s2 + $0xf8] sm:$0xff]  ;;  %vm1355_vm1 = vcmp.lt.s32.totalorder %v3945_v31, %v4296_v45 }
 0x25e   :  { %5407 = vst [vmem:[#allocation7_spill] sm:$0xff] %v4294_v20  ;;  %v4298_v15 = vsel %vm1410_vm12, %v862_v51, -1e+12  ;;  %v864_v23 = vpop.f32.mrb[70].mxu1  ;;  %vm1193_vm12 = vcmp.ge.s32.totalorder %v3945_v31, %v4246_v19 }
 0x25f   :  { %5408 = vst [vmem:[#allocation8_spill] sm:$0xff] %v4298_v15  ;;  %v4302_v5 = vsel %vm1411_vm13, %v864_v23, -1e+12  ;;  %v866_v6 = vpop.f32.mrb[71].mxu1  ;;  %v1547_v22 = vmax.f32 %v4294_v20, %v4298_v15  ;;  %v4354_v9 = vpop.permute.xlu1 %1287  ;;  %vm1353_vm13 = vcmp.lt.s32.totalorder %v3945_v31, %v4271_v21 }
 0x260   :  { %5409 = vst [vmem:[#allocation9_spill] sm:$0xff] %v4302_v5  ;;  %v4306_v1 = vsel %vm1412_vm14, %v866_v6, -1e+12  ;;  %v4348_v60 = vpop.permute.xlu0 %1284  ;;  %v1031_v6 = vld [vmem:[%s5365_s2 + $0xf0] sm:$0xff]  ;;  %vm1194_vm14 = vcmp.ge.s32.totalorder %v3968_v56, %v4246_v19  ;;  %vm1417_vm3 = vmand %vm1193_vm12, %vm1353_vm13  ;;  %vm1201_vm13 = vcmp.ge.s32.totalorder %v3945_v31, %v4344_v17 }
 0x261   :  { %5410 = vst [vmem:[#allocation10_spill] sm:$0xff] %v4306_v1  ;;  %1548 = vmax.xlane.f32.xlu0 %v1547_v22  ;;  %v1550_v37 = vmax.f32 %v4302_v5, %v4306_v1  ;;  %vm1420_vm12 = vmand %vm1196_vm4, %vm1356_vm5  ;;  %vm1199_vm4 = vcmp.ge.s32.totalorder %v3945_v31, %v4322_v16  ;;  %vm1359_vm5 = vcmp.lt.s32.totalorder %v3945_v31, %v4342_v40 }
 0x263   :  { %1551 = vmax.xlane.f32.xlu1 %v1550_v37  ;;  %v4365_v51 = vpop.permute.xlu1 %1133 }
 0x264   :  { %v870_v61 = vpop.f32.mrb[72].mxu1  ;;  %v4358_v50 = vpop.permute.xlu0 %1130 }
 0x265   :  { %v4330_v35 = vsel %vm1413_vm6, %v870_v61, -1e+12  ;;  %v872_v63 = vpop.f32.mrb[73].mxu1  ;;  %vm1418_vm6 = vmand %vm1194_vm14, %vm1354_vm15  ;;  %vm1361_vm14 = vcmp.lt.s32.totalorder %v3945_v31, %v4348_v60 }
 0x266   :  { %5411 = vst [vmem:[#allocation11_spill] sm:$0xff] %v4330_v35  ;;  %v4332_v25 = vsel %vm1414_vm9, %v872_v63, -1e+12  ;;  %v874_v33 = vpop.f32.mrb[74].mxu1  ;;  %vm1419_vm9 = vmand %vm1195_vm0, %vm1355_vm1  ;;  %vm1202_vm0 = vcmp.ge.s32.totalorder %v3968_v56, %v4344_v17  ;;  %vm1362_vm1 = vcmp.lt.s32.totalorder %v3968_v56, %v4348_v60 }
 0x267   :  { %5412 = vst [vmem:[#allocation12_spill] sm:$0xff] %v4332_v25  ;;  %v4334_v52 = vsel %vm1415_vm10, %v874_v33, -1e+12  ;;  %v876_v7 = vpop.f32.mrb[75].mxu1  ;;  %v1553_v38 = vmax.f32 %v4330_v35, %v4332_v25  ;;  %v4380_v33 = vpop.permute.xlu1 %1293  ;;  %vm1198_vm10 = vcmp.ge.s32.totalorder %v3968_v56, %v4300_v29  ;;  %vm1421_vm15 = vmand %vm1197_vm7, %vm1357_vm8  ;;  %vm1360_vm7 = vcmp.lt.s32.totalorder %v3968_v56, %v4342_v40 }
 0x268   :  { %5413 = vst [vmem:[#allocation13_spill] sm:$0xff] %v4334_v52  ;;  %v4338_v58 = vsel %vm1416_vm11, %v876_v7, -1e+12  ;;  %v4372_v22 = vpop.permute.xlu0 %1290  ;;  %vm1358_vm11 = vcmp.lt.s32.totalorder %v3968_v56, %v4328_v18  ;;  %vm1425_vm8 = vmand %vm1201_vm13, %vm1361_vm14  ;;  %vm1206_vm13 = vcmp.ge.s32.totalorder %v3968_v56, %v4358_v50 }
 0x269   :  { %5414 = vst [vmem:[#allocation14_spill] sm:$0xff] %v4338_v58  ;;  %1554 = vmax.xlane.f32.xlu0 %v1553_v38  ;;  %v1556_v39 = vmax.f32 %v4334_v52, %v4338_v58  ;;  %vm1366_vm14 = vcmp.lt.s32.totalorder %v3968_v56, %v4372_v22 }
 0x26b   :  { %1557 = vmax.xlane.f32.xlu1 %v1556_v39  ;;  %v4392_v58 = vpop.permute.xlu1 %1139 }
 0x26c   :  { %v880_v28 = vpop.f32.mrb[76].mxu1  ;;  %v4382_v7 = vpop.permute.xlu0 %1136 }
 0x26d   :  { %v882_v11 = vpop.f32.mrb[77].mxu1  ;;  %v4440_v21 = vsel %vm1417_vm3, %v880_v28, -1e+12  ;;  %vm1422_vm3 = vmand %vm1198_vm10, %vm1358_vm11  ;;  %vm1205_vm10 = vcmp.ge.s32.totalorder %v3945_v31, %v4358_v50  ;;  %vm1365_vm11 = vcmp.lt.s32.totalorder %v3945_v31, %v4372_v22 }
 0x26e   :  { %v884_v44 = vpop.f32.mrb[78].mxu1  ;;  %v4442_v4 = vsel %vm1418_vm6, %v882_v11, -1e+12  ;;  %vm1200_vm6 = vcmp.ge.s32.totalorder %v3968_v56, %v4322_v16 }
 0x26f   :  { %v886_v46 = vpop.f32.mrb[79].mxu1  ;;  %v4400_v35 = vpop.permute.xlu1 %1299  ;;  %5415 = vst [vmem:[#allocation15_spill] sm:$0xff] %v4442_v4  ;;  %v4456_v28 = vsel %vm1419_vm9, %v884_v44, -1e+12  ;;  %v1559_v18 = vmax.f32 %v4440_v21, %v4442_v4  ;;  %vm1426_vm9 = vmand %vm1202_vm0, %vm1362_vm1  ;;  %vm1203_vm0 = vcmp.ge.s32.totalorder %v3945_v31, %v4346_v54  ;;  %vm1363_vm1 = vcmp.lt.s32.totalorder %v3945_v31, %v4354_v9 }
 0x270   :  { %v4394_v52 = vpop.permute.xlu0 %1296  ;;  %5416 = vst [vmem:[#allocation16_spill] sm:$0xff] %v4456_v28  ;;  %v4458_v11 = vsel %vm1420_vm12, %v886_v46, -1e+12  ;;  %vm1423_vm12 = vmand %vm1199_vm4, %vm1359_vm5  ;;  %vm1364_vm4 = vcmp.lt.s32.totalorder %v3968_v56, %v4354_v9 }
 0x271   :  { %5417 = vst [vmem:[#allocation17_spill] sm:$0xff] %v4458_v11  ;;  %vm1429_vm5 = vmand %vm1205_vm10, %vm1365_vm11  ;;  %vm1210_vm10 = vcmp.ge.s32.totalorder %v3968_v56, %v4382_v7  ;;  %vm1370_vm11 = vcmp.lt.s32.totalorder %v3968_v56, %v4394_v52 }
 0x273   :  { %v4408_v20 = vpop.permute.xlu1 %1145 }
 0x274   :  { %v4350_v53 = vpop.f32.mrb[80].mxu1  ;;  %v4404_v5 = vpop.permute.xlu0 %1142 }
 0x275   :  { %v4352_v13 = vpop.f32.mrb[81].mxu1  ;;  %v4473_v44 = vsel %vm1421_vm15, %v4350_v53, -1e+12  ;;  %vm1424_vm15 = vmand %vm1200_vm6, %vm1360_vm7  ;;  %vm1209_vm7 = vcmp.ge.s32.totalorder %v3945_v31, %v4382_v7 }
 0x276   :  { %v4356_v48 = vpop.f32.mrb[82].mxu1  ;;  %v4476_v46 = vsel %vm1422_vm3, %v4352_v13, -1e+12  ;;  %v1562_v13 = vmax.f32 %v4456_v28, %v4458_v11  ;;  %vm1204_vm3 = vcmp.ge.s32.totalorder %v3968_v56, %v4346_v54  ;;  %vm1430_vm6 = vmand %vm1206_vm13, %vm1366_vm14  ;;  %vm1207_vm13 = vcmp.ge.s32.totalorder %v3945_v31, %v4365_v51 }
 0x277   :  { %v4360_v3 = vpop.f32.mrb[83].mxu1  ;;  %v4448_v27 = vpop.permute.xlu1 %1305  ;;  %v4533_v28 = vsel %vm1423_vm12, %v4356_v48, -1e+12  ;;  %vm1428_vm12 = vmand %vm1204_vm3, %vm1364_vm4  ;;  %vm1367_vm14 = vcmp.lt.s32.totalorder %v3945_v31, %v4380_v33  ;;  %vm1213_vm4 = vcmp.ge.s32.totalorder %v3945_v31, %v4404_v5 }
 0x278   :  { %v4416_v14 = vpop.permute.xlu0 %1302  ;;  %v4536_v40 = vsel %vm1424_vm15, %v4360_v3, -1e+12  ;;  %vm1208_vm15 = vcmp.ge.s32.totalorder %v3968_v56, %v4365_v51  ;;  %vm1434_vm3 = vmand %vm1210_vm10, %vm1370_vm11  ;;  %vm1211_vm10 = vcmp.ge.s32.totalorder %v3945_v31, %v4392_v58  ;;  %vm1371_vm11 = vcmp.lt.s32.totalorder %v3945_v31, %v4400_v35 }
 0x279   :  { %v1568_v50 = vmax.f32 %v4533_v28, %v4536_v40 }
 0x27b   :  { %v4516_v11 = vpop.permute.xlu1 %1151 }
 0x27c   :  { %1323 = vperm.xlu1 %2927, %v1032_v36   ;;  %v4367_v23 = vpop.f32.mrb[84].mxu1  ;;  %v4454_v45 = vpop.permute.xlu0 %1148 }
 0x27d   :  { %v4374_v37 = vpop.f32.mrb[85].mxu1  ;;  %v4505_v17 = vsel %vm1425_vm8, %v4367_v23, -1e+12  ;;  %v1565_v23 = vmax.f32 %v4473_v44, %v4476_v46  ;;  %vm1369_vm8 = vcmp.lt.s32.totalorder %v3945_v31, %v4394_v52 }
 0x27e   :  { %v4376_v61 = vpop.f32.mrb[86].mxu1  ;;  %v4508_v60 = vsel %vm1426_vm9, %v4374_v37, -1e+12  ;;  %vm1427_vm9 = vmand %vm1203_vm0, %vm1363_vm1  ;;  %vm1368_vm0 = vcmp.lt.s32.totalorder %v3968_v56, %v4380_v33 }
 0x27f   :  { %1320 = vperm.xlu0 %2926, %v1031_v6   ;;  %v4378_v63 = vpop.f32.mrb[87].mxu1  ;;  %v1571_v16 = vmax.f32 %v4505_v17, %v4508_v60  ;;  %v4579_v3 = vsel %vm1427_vm9, %v4376_v61, -1e+12  ;;  %vm1433_vm1 = vmand %vm1209_vm7, %vm1369_vm8  ;;  %v4596_v61 = vpop.permute.xlu1 %1311  ;;  %vm1214_vm7 = vcmp.ge.s32.totalorder %v3968_v56, %v4404_v5  ;;  %vm1374_vm8 = vcmp.lt.s32.totalorder %v3968_v56, %v4416_v14 }
 0x280   :  { %v4530_v37 = vpop.permute.xlu0 %1308  ;;  %v4582_v22 = vsel %vm1428_vm12, %v4378_v63, -1e+12  ;;  %vm1432_vm9 = vmand %vm1208_vm15, %vm1368_vm0  ;;  %vm1212_vm12 = vcmp.ge.s32.totalorder %v3968_v56, %v4392_v58  ;;  %vm1217_vm0 = vcmp.ge.s32.totalorder %v3945_v31, %v4454_v45 }
 0x281   :  { %vm1438_vm15 = vmand %vm1214_vm7, %vm1374_vm8  ;;  %vm1215_vm7 = vcmp.ge.s32.totalorder %v3945_v31, %v4408_v20  ;;  %vm1375_vm8 = vcmp.lt.s32.totalorder %v3945_v31, %v4448_v27 }
 0x283   :  { %v1158_v5 = vpop.permute.xlu1 %1157 }
 0x284   :  { %v4384_v38 = vpop.f32.mrb[88].mxu1 }
 0x285   :  { %v4386_v39 = vpop.f32.mrb[89].mxu1  ;;  %v4561_v9 = vsel %vm1429_vm5, %v4384_v38, -1e+12  ;;  %vm1373_vm5 = vcmp.lt.s32.totalorder %v3945_v31, %v4416_v14 }
 0x286   :  { %v4388_v36 = vpop.f32.mrb[90].mxu1  ;;  %v4564_v48 = vsel %vm1430_vm6, %v4386_v39, -1e+12  ;;  %v4609_v39 = vpop.permute.xlu0 %1154  ;;  %vm1431_vm6 = vmand %vm1207_vm13, %vm1367_vm14  ;;  %vm1372_vm13 = vcmp.lt.s32.totalorder %v3968_v56, %v4400_v35 }
 0x287   :  { %v4390_v59 = vpop.f32.mrb[91].mxu1  ;;  %v1577_v63 = vmax.f32 %v4561_v9, %v4564_v48  ;;  %vm1437_vm14 = vmand %vm1213_vm4, %vm1373_vm5  ;;  %vm1218_vm4 = vcmp.ge.s32.totalorder %v3968_v56, %v4454_v45  ;;  %vm1378_vm5 = vcmp.lt.s32.totalorder %v3968_v56, %v4530_v37 }
 0x28a   :  { %v1315_v58 = vpop.permute.xlu0 %1314 }
 0x28c   :  { %v4396_v25 = vpop.f32.mrb[92].mxu1 }
 0x28d   :  { %v4398_v6 = vpop.f32.mrb[93].mxu1  ;;  %v4618_v7 = vsel %vm1433_vm1, %v4396_v25, -1e+12  ;;  %v1574_v25 = vmax.f32 %v4579_v3, %v4582_v22  ;;  %vm1377_vm1 = vcmp.lt.s32.totalorder %v3945_v31, %v4530_v37 }
 0x28e   :  { %v4402_v1 = vpop.f32.mrb[94].mxu1 }
 0x28f   :  { %v4406_v15 = vpop.f32.mrb[95].mxu1 }
 0x294   :  { %v4414_v41 = vpop.f32.mrb[96].mxu1 }
 0x295   :  { %v4422_v26 = vpop.f32.mrb[97].mxu1  ;;  %v4664_v35 = vsel %vm1437_vm14, %v4414_v41, -1e+12  ;;  %vm1381_vm14 = vcmp.lt.s32.totalorder %v3945_v31, %v1315_v58 }
 0x296   :  { %v4428_v47 = vpop.f32.mrb[98].mxu1  ;;  %v4667_v14 = vsel %vm1438_vm15, %v4422_v26, -1e+12  ;;  %vm1439_vm15 = vmand %vm1215_vm7, %vm1375_vm8  ;;  %vm1380_vm7 = vcmp.lt.s32.totalorder %v3968_v56, %v4596_v61 }
 0x297   :  { %v4434_v19 = vpop.f32.mrb[99].mxu1 }
 0x29c   :  { %v4468_v29 = vpop.f32.mrb[100].mxu1 }
 0x29d   :  { %v4488_v4 = vpop.f32.mrb[101].mxu1 }
 0x29e   :  { %1560 = vmax.xlane.f32.xlu0 %v1559_v18  ;;  %v4494_v53 = vpop.f32.mrb[102].mxu1 }
 0x29f   :  { %v4514_v18 = vpop.f32.mrb[103].mxu1 }
 0x2a0   :  { %1563 = vmax.xlane.f32.xlu1 %v1562_v13  ;;  %v4621_v13 = vsel %vm1434_vm3, %v4398_v6, -1e+12  ;;  %v4642_v6 = vsel %vm1431_vm6, %v4388_v36, -1e+12  ;;  %vm1435_vm3 = vmand %vm1211_vm10, %vm1371_vm11  ;;  %vm1376_vm10 = vcmp.lt.s32.totalorder %v3968_v56, %v4448_v27 }
 0x2a1   :  { %vm1436_vm6 = vmand %vm1212_vm12, %vm1372_vm13  ;;  %v4682_v51 = vsel %vm1435_vm3, %v4402_v1, -1e+12  ;;  %vm1221_vm13 = vcmp.ge.s32.totalorder %v3945_v31, %v4609_v39  ;;  %v1589_v1 = vmax.f32 %v4664_v35, %v4667_v14 }
 0x2a2   :  { %1566 = vmax.xlane.f32.xlu0 %v1565_v23  ;;  %v4685_v33 = vsel %vm1436_vm6, %v4406_v15, -1e+12  ;;  %vm1441_vm11 = vmand %vm1217_vm0, %vm1377_vm1  ;;  %vm1222_vm0 = vcmp.ge.s32.totalorder %v3968_v56, %v4609_v39  ;;  %vm1382_vm1 = vcmp.lt.s32.totalorder %v3968_v56, %v1315_v58  ;;  %vm1220_vm6 = vcmp.ge.s32.totalorder %v3968_v56, %v4516_v11 }
 0x2a3   :  { %vm1442_vm12 = vmand %vm1218_vm4, %vm1378_vm5  ;;  %v4719_v45 = vsel %vm1441_vm11, %v4468_v29, -1e+12  ;;  %vm1219_vm4 = vcmp.ge.s32.totalorder %v3945_v31, %v4516_v11  ;;  %vm1379_vm5 = vcmp.lt.s32.totalorder %v3945_v31, %v4596_v61  ;;  %v4742_v29 = vsel %vm1439_vm15, %v4428_v47, -1e+12 }
 0x2a4   :  { %1572 = vmax.xlane.f32.xlu1 %v1571_v16  ;;  %v4574_v54 = vpop.f32.mrb[104].mxu1  ;;  %v4645_v16 = vsel %vm1432_vm9, %v4390_v59, -1e+12  ;;  %v1583_v59 = vmax.f32 %v4618_v7, %v4621_v13  ;;  %vm1216_vm9 = vcmp.ge.s32.totalorder %v3968_v56, %v4408_v20  ;;  %v4722_v37 = vsel %vm1442_vm12, %v4488_v4, -1e+12  ;;  %5418 = vst [vmem:[#allocation18_spill] sm:$0xff] %v4742_v29  ;;  %vm1445_vm8 = vmand %vm1221_vm13, %vm1381_vm14  ;;  %v1318_v20 = vpop.permute.xlu1 %1317 }
 0x2a5   :  { %v4594_v38 = vpop.f32.mrb[105].mxu1  ;;  %v1580_v26 = vmax.f32 %v4642_v6, %v4645_v16  ;;  %vm1440_vm3 = vmand %vm1216_vm9, %vm1376_vm10  ;;  %v1586_v4 = vmax.f32 %v4682_v51, %v4685_v33  ;;  %v1595_v47 = vmax.f32 %v4719_v45, %v4722_v37  ;;  %vm1223_vm12 = vcmp.ge.s32.totalorder %v3945_v31, %v1158_v5 }
 0x2a6   :  { %1569 = vmax.xlane.f32.xlu0 %v1568_v50  ;;  %v4605_v52 = vpop.f32.mrb[106].mxu1  ;;  %vm1446_vm9 = vmand %vm1222_vm0, %vm1382_vm1  ;;  %vm1383_vm15 = vcmp.lt.s32.totalorder %v3945_v31, %v1318_v20  ;;  %vm1224_vm13 = vcmp.ge.s32.totalorder %v3968_v56, %v1158_v5  ;;  %vm1384_vm14 = vcmp.lt.s32.totalorder %v3968_v56, %v1318_v20 }
 0x2a7   :  { %v4627_v23 = vpop.f32.mrb[107].mxu1  ;;  %vm1443_vm10 = vmand %vm1219_vm4, %vm1379_vm5  ;;  %v4762_v27 = vsel %vm1446_vm9, %v4594_v38, -1e+12 }
 0x2a8   :  { %1578 = vmax.xlane.f32.xlu1 %v1577_v63  ;;  %v4745_v63 = vsel %vm1440_vm3, %v4434_v19, -1e+12  ;;  %v4759_v19 = vsel %vm1445_vm8, %v4574_v54, -1e+12  ;;  %5421 = vst [vmem:[#allocation21_spill] sm:$0xff] %v4762_v27  ;;  %vm1444_vm11 = vmand %vm1220_vm6, %vm1380_vm7  ;;  %v4790_v5 = vpop.permute.xlu1 %1163 }
 0x2a9   :  { %5419 = vst [vmem:[#allocation19_spill] sm:$0xff] %v4745_v63  ;;  %5420 = vst [vmem:[#allocation20_spill] sm:$0xff] %v4759_v19  ;;  %v1592_v11 = vmax.f32 %v4742_v29, %v4745_v63  ;;  %v4769_v61 = vsel %vm1443_vm10, %v4494_v53, -1e+12  ;;  %v4772_v39 = vsel %vm1444_vm11, %v4514_v18, -1e+12  ;;  %v1601_v54 = vmax.f32 %v4759_v19, %v4762_v27 }
 0x2aa   :  { %1575 = vmax.xlane.f32.xlu0 %v1574_v25  ;;  %5422 = vst [vmem:[#allocation22_spill] sm:$0xff] %v4769_v61  ;;  %5423 = vst [vmem:[#allocation23_spill] sm:$0xff] %v4772_v39  ;;  %v1598_v38 = vmax.f32 %v4769_v61, %v4772_v39  ;;  %v5436_v27 = vld [vmem:[#allocation12_spill] sm:$0xff]  ;;  %vm1227_vm3 = vcmp.ge.s32.totalorder %v3945_v31, %v4790_v5  ;;  %vm1228_vm6 = vcmp.ge.s32.totalorder %v3968_v56, %v4790_v5 }
 0x2ab   :  { %vm1447_vm0 = vmand %vm1223_vm12, %vm1383_vm15 }
 0x2ac   :  { %1584 = vmax.xlane.f32.xlu1 %v1583_v59  ;;  %v4677_v41 = vpop.f32.mrb[108].mxu1  ;;  %vm1448_vm1 = vmand %vm1224_vm13, %vm1384_vm14  ;;  %v4781_v53 = vsel %vm1447_vm0, %v4605_v52, -1e+12  ;;  %v4788_v59 = vpop.permute.xlu0 %1160 }
 0x2ad   :  { %v4697_v36 = vpop.f32.mrb[109].mxu1  ;;  %5424 = vst [vmem:[#allocation24_spill] sm:$0xff] %v4781_v53  ;;  %v4784_v18 = vsel %vm1448_vm1, %v4627_v23, -1e+12  ;;  %vm1225_vm8 = vcmp.ge.s32.totalorder %v3945_v31, %v4788_v59  ;;  %vm1226_vm12 = vcmp.ge.s32.totalorder %v3968_v56, %v4788_v59 }
 0x2ae   :  { %1581 = vmax.xlane.f32.xlu0 %v1580_v26  ;;  %v4708_v15 = vpop.f32.mrb[110].mxu1  ;;  %5425 = vst [vmem:[#allocation25_spill] sm:$0xff] %v4784_v18  ;;  %v1604_v25 = vmax.f32 %v4781_v53, %v4784_v18 }
 0x2af   :  { %v4727_v50 = vpop.f32.mrb[111].mxu1 }
 0x2b0   :  { %1590 = vmax.xlane.f32.xlu1 %v1589_v1 }
 0x2b2   :  { %1587 = vmax.xlane.f32.xlu0 %v1586_v4 }
 0x2b4   :  { %1596 = vmax.xlane.f32.xlu1 %v1595_v47 }
 0x2b6   :  { %1593 = vmax.xlane.f32.xlu0 %v1592_v11 }
 0x2b8   :  { %1602 = vmax.xlane.f32.xlu1 %v1601_v54 }
 0x2ba   :  { %1599 = vmax.xlane.f32.xlu0 %v1598_v38 }
 0x2be   :  { %1605 = vmax.xlane.f32.xlu0 %v1604_v25 }
 0x2c6   :  { %v1519_v26 = vpop.xlane.xlu0 %1518 }
 0x2c7   :  { %v1613_v58 = vsub.f32 %v4021_v32, %v1519_v26  ;;  %v1614_v1 = vsub.f32 %v4032_v49, %v1519_v26 }
 0x2c8   :  { %v1522_v4 = vpop.xlane.xlu1 %1521 }
 0x2c9   :  { %v1677_v52 = vmul.f32 1.442695, %v1613_v58  ;;  %v1615_v47 = vsub.f32 %v4041_v55, %v1522_v4  ;;  %v1616_v23 = vsub.f32 %v4052_v24, %v1522_v4  ;;  %v1679_v20 = vmul.f32 1.442695, %v1614_v1 }
 0x2cb   :  { %v1681_v11 = vmul.f32 1.442695, %v1615_v47  ;;  %v1683_v54 = vmul.f32 1.442695, %v1616_v23  ;;  %2928 = vpow2.f32 %v1677_v52 }
 0x2cd   :  { %2930 = vpow2.f32 %v1681_v11 }
 0x2ce   :  { %2932 = vpow2.f32 %v1683_v54  ;;  %v1525_v38 = vpop.xlane.xlu0 %1524 }
 0x2cf   :  { %2934 = vpow2.f32 %v1679_v20  ;;  %v1617_v25 = vsub.f32 %v4080_v42, %v1525_v38  ;;  %v1618_v32 = vsub.f32 %v4089_v2, %v1525_v38 }
 0x2d0   :  { %v1528_v18 = vpop.xlane.xlu1 %1527 }
 0x2d1   :  { %v1685_v49 = vmul.f32 1.442695, %v1617_v25  ;;  %v1619_v26 = vsub.f32 %v4098_v10, %v1528_v18  ;;  %v1620_v55 = vsub.f32 %v4109_v57, %v1528_v18  ;;  %v1687_v58 = vmul.f32 1.442695, %v1618_v32 }
 0x2d3   :  { %v1689_v24 = vmul.f32 1.442695, %v1619_v26  ;;  %v1691_v1 = vmul.f32 1.442695, %v1620_v55  ;;  %2936 = vpow2.f32 %v1685_v49 }
 0x2d5   :  { %2938 = vpow2.f32 %v1689_v24  ;;  %v4800_v4 = vpop.eup %2928 }
 0x2d6   :  { %2940 = vpow2.f32 %v1691_v1  ;;  %v1531_v52 = vpop.xlane.xlu0 %1530 }
 0x2d7   :  { %v4802_v47 = vpop.eup %2930  ;;  %2942 = vpow2.f32 %v1687_v58  ;;  %v1621_v42 = vsub.f32 %v4140_v62, %v1531_v52  ;;  %v1622_v2 = vsub.f32 %v4149_v43, %v1531_v52 }
 0x2d8   :  { %v4806_v23 = vpop.eup %2932  ;;  %v1534_v10 = vpop.xlane.xlu1 %1533  ;;  %v1901_v54 = vpack.c.bf16 %v4802_v47, %v4800_v4 }
 0x2d9   :  { %v4808_v57 = vpop.eup %2934  ;;  %v1693_v18 = vmul.f32 1.442695, %v1621_v42  ;;  %v1623_v20 = vsub.f32 %v4158_v30, %v1534_v10  ;;  %v1624_v11 = vsub.f32 %v4169_v8, %v1534_v10  ;;  %v1695_v25 = vmul.f32 1.442695, %v1622_v2  ;;  %v5426_v42 = vld [vmem:[#allocation2_spill] sm:$0xff] }
 0x2da   :  { %v1902_v38 = vpack.c.bf16 %v4806_v23, %v4808_v57 }
 0x2db   :  { %v1697_v62 = vmul.f32 1.442695, %v1623_v20  ;;  %v1699_v32 = vmul.f32 1.442695, %v1624_v11  ;;  %2944 = vpow2.f32 %v1693_v18 }
 0x2dc   :  { %1981 = vmatprep.mubr.bf16.mxu0 %v1902_v38  ;;  %v5427_v38 = vld [vmem:[#allocation3_spill] sm:$0xff] }
 0x2dd   :  { %2946 = vpow2.f32 %v1697_v62  ;;  %1982 = vmatmul.mubr.bf16.vlgmr.msra.gmra.mrb[48].mxu0 %v1901_v54  ;;  %v4816_v43 = vpop.eup %2936  ;;  %v5428_v62 = vld [vmem:[#allocation4_spill] sm:$0xff] }
 0x2de   :  { %2948 = vpow2.f32 %v1699_v32  ;;  %v1537_v49 = vpop.xlane.xlu0 %1536 }
 0x2df   :  { %v4818_v30 = vpop.eup %2938  ;;  %2950 = vpow2.f32 %v1695_v25  ;;  %v1625_v8 = vsub.f32 %v4199_v12, %v1537_v49  ;;  %v1626_v26 = vsub.f32 %v4207_v0, %v1537_v49 }
 0x2e0   :  { %v4822_v55 = vpop.eup %2940  ;;  %v1540_v58 = vpop.xlane.xlu1 %1539  ;;  %v1903_v10 = vpack.c.bf16 %v4818_v30, %v4816_v43 }
 0x2e1   :  { %v4824_v24 = vpop.eup %2942  ;;  %v1701_v1 = vmul.f32 1.442695, %v1625_v8  ;;  %v1627_v52 = vsub.f32 %v4217_v34, %v1540_v58  ;;  %v1628_v2 = vsub.f32 %v5426_v42, %v1540_v58  ;;  %v1703_v20 = vmul.f32 1.442695, %v1626_v26  ;;  %v5430_v42 = vld [vmem:[#allocation6_spill] sm:$0xff] }
 0x2e2   :  { %v1904_v18 = vpack.c.bf16 %v4822_v55, %v4824_v24 }
 0x2e3   :  { %v1705_v12 = vmul.f32 1.442695, %v1627_v52  ;;  %v1707_v11 = vmul.f32 1.442695, %v1628_v2  ;;  %2952 = vpow2.f32 %v1701_v1  ;;  %v5429_v1 = vld [vmem:[#allocation5_spill] sm:$0xff] }
 0x2e4   :  { %1989 = vmatprep.mubr.bf16.mxu0 %v1904_v18 }
 0x2e5   :  { %2954 = vpow2.f32 %v1705_v12  ;;  %1990 = vmatmul.mubr.bf16.gmra.mrb[52].mxu0 %v1903_v10  ;;  %v4832_v0 = vpop.eup %2944 }
 0x2e6   :  { %2956 = vpow2.f32 %v1707_v11  ;;  %v1543_v54 = vpop.xlane.xlu0 %1542 }
 0x2e7   :  { %v4834_v34 = vpop.eup %2946  ;;  %2958 = vpow2.f32 %v1703_v20  ;;  %v1629_v25 = vsub.f32 %v5427_v38, %v1543_v54  ;;  %v1630_v32 = vsub.f32 %v5428_v62, %v1543_v54  ;;  %v5431_v62 = vld [vmem:[#allocation7_spill] sm:$0xff] }
 0x2e8   :  { %v4838_v49 = vpop.eup %2948  ;;  %v1546_v8 = vpop.xlane.xlu1 %1545  ;;  %v1905_v10 = vpack.c.bf16 %v4834_v34, %v4832_v0 }
 0x2e9   :  { %v4840_v26 = vpop.eup %2950  ;;  %v1709_v58 = vmul.f32 1.442695, %v1629_v25  ;;  %v1631_v52 = vsub.f32 %v5429_v1, %v1546_v8  ;;  %v1632_v2 = vsub.f32 %v5430_v42, %v1546_v8  ;;  %v1711_v20 = vmul.f32 1.442695, %v1630_v32  ;;  %v5432_v1 = vld [vmem:[#allocation8_spill] sm:$0xff] }
 0x2ea   :  { %v1906_v18 = vpack.c.bf16 %v4838_v49, %v4840_v26 }
 0x2eb   :  { %v1713_v12 = vmul.f32 1.442695, %v1631_v52  ;;  %v1715_v11 = vmul.f32 1.442695, %v1632_v2  ;;  %2960 = vpow2.f32 %v1709_v58 }
 0x2ec   :  { %1997 = vmatprep.mubr.bf16.mxu0 %v1906_v18  ;;  %v5433_v18 = vld [vmem:[#allocation9_spill] sm:$0xff] }
 0x2ed   :  { %2962 = vpow2.f32 %v1713_v12  ;;  %1998 = vmatmul.mubr.bf16.gmra.mrb[56].mxu0 %v1905_v10  ;;  %v4848_v54 = vpop.eup %2952 }
 0x2ee   :  { %2964 = vpow2.f32 %v1715_v11  ;;  %v1549_v38 = vpop.xlane.xlu0 %1548  ;;  %v5434_v11 = vld [vmem:[#allocation10_spill] sm:$0xff] }
 0x2ef   :  { %v4850_v25 = vpop.eup %2954  ;;  %2966 = vpow2.f32 %v1711_v20  ;;  %v1633_v8 = vsub.f32 %v5431_v62, %v1549_v38  ;;  %v1634_v42 = vsub.f32 %v5432_v1, %v1549_v38 }
 0x2f0   :  { %v4854_v53 = vpop.eup %2956  ;;  %v1552_v32 = vpop.xlane.xlu1 %1551  ;;  %v1907_v58 = vpack.c.bf16 %v4850_v25, %v4848_v54 }
 0x2f1   :  { %v4858_v52 = vpop.eup %2958  ;;  %v1717_v2 = vmul.f32 1.442695, %v1633_v8  ;;  %v1719_v10 = vmul.f32 1.442695, %v1634_v42  ;;  %v1635_v12 = vsub.f32 %v5433_v18, %v1552_v32  ;;  %v1636_v39 = vsub.f32 %v5434_v11, %v1552_v32  ;;  %v5435_v42 = vld [vmem:[#allocation11_spill] sm:$0xff] }
 0x2f2   :  { %v1908_v20 = vpack.c.bf16 %v4854_v53, %v4858_v52 }
 0x2f3   :  { %2968 = vpow2.f32 %v1717_v2  ;;  %v1721_v62 = vmul.f32 1.442695, %v1635_v12  ;;  %v1723_v38 = vmul.f32 1.442695, %v1636_v39  ;;  %v5437_v12 = vld [vmem:[#allocation13_spill] sm:$0xff] }
 0x2f4   :  { %2970 = vpow2.f32 %v1719_v10  ;;  %2005 = vmatprep.mubr.bf16.mxu0 %v1908_v20 }
 0x2f5   :  { %2972 = vpow2.f32 %v1721_v62  ;;  %2006 = vmatmul.mubr.bf16.gmra.mrb[60].mxu0 %v1907_v58  ;;  %v4864_v1 = vpop.eup %2960  ;;  %v5438_v62 = vld [vmem:[#allocation14_spill] sm:$0xff] }
 0x2f6   :  { %2974 = vpow2.f32 %v1723_v38  ;;  %v1555_v61 = vpop.xlane.xlu0 %1554 }
 0x2f7   :  { %v4866_v8 = vpop.eup %2962  ;;  %v1637_v18 = vsub.f32 %v5435_v42, %v1555_v61  ;;  %v1638_v32 = vsub.f32 %v5436_v27, %v1555_v61 }
 0x2f8   :  { %v4870_v11 = vpop.eup %2964  ;;  %v1558_v19 = vpop.xlane.xlu1 %1557  ;;  %v1909_v39 = vpack.c.bf16 %v4866_v8, %v4864_v1 }
 0x2f9   :  { %v4874_v2 = vpop.eup %2966  ;;  %v1725_v10 = vmul.f32 1.442695, %v1637_v18  ;;  %v1727_v58 = vmul.f32 1.442695, %v1638_v32  ;;  %v1639_v20 = vsub.f32 %v5437_v12, %v1558_v19  ;;  %v1640_v38 = vsub.f32 %v5438_v62, %v1558_v19 }
 0x2fa   :  { %v1910_v63 = vpack.c.bf16 %v4870_v11, %v4874_v2 }
 0x2fb   :  { %2976 = vpow2.f32 %v1725_v10  ;;  %v1729_v42 = vmul.f32 1.442695, %v1639_v20  ;;  %v1731_v27 = vmul.f32 1.442695, %v1640_v38 }
 0x2fc   :  { %2978 = vpow2.f32 %v1727_v58  ;;  %2013 = vmatprep.mubr.bf16.mxu0 %v1910_v63  ;;  %v1324_v61 = vpop.permute.xlu1 %1323 }
 0x2fd   :  { %v2969_v29 = vpop.eup %2968  ;;  %2980 = vpow2.f32 %v1729_v42  ;;  %2014 = vmatmul.mubr.bf16.gmra.mrb[64].mxu0 %v1909_v39  ;;  %vm1387_vm4 = vcmp.lt.s32.totalorder %v3945_v31, %v1324_v61  ;;  %vm1388_vm5 = vcmp.lt.s32.totalorder %v3968_v56, %v1324_v61  ;;  %v1814_v42 = vadd.f32 %v4822_v55, %v4818_v30 }
 0x2fe   :  { %v2971_v19 = vpop.eup %2970  ;;  %2982 = vpow2.f32 %v1731_v27  ;;  %vm1451_vm7 = vmand %vm1227_vm3, %vm1387_vm4  ;;  %v1321_v18 = vpop.permute.xlu0 %1320  ;;  %v1811_v61 = vadd.f32 %v4824_v24, %v4816_v43  ;;  %v1832_v43 = vadd.f32 %v4870_v11, %v4866_v8  ;;  %v1829_v30 = vadd.f32 %v4874_v2, %v4864_v1  ;;  %v5440_v11 = vld [vmem:[#allocation16_spill] sm:$0xff]  ;;  %v5441_v1 = vld [vmem:[#allocation17_spill] sm:$0xff] }
 0x2ff   :  { %v2973_v32 = vpop.eup %2972  ;;  %vm1452_vm9 = vmand %vm1228_vm6, %vm1388_vm5  ;;  %vm1385_vm10 = vcmp.lt.s32.totalorder %v3945_v31, %v1321_v18  ;;  %vm1386_vm11 = vcmp.lt.s32.totalorder %v3968_v56, %v1321_v18  ;;  %v4891_v63 = vsel %vm1451_vm7, %v4708_v15, -1e+12  ;;  %v1835_v24 = vadd.f32 %v2971_v19, %v2969_v29 }
 0x300   :  { %v2975_v39 = vpop.eup %2974  ;;  %vm1449_vm15 = vmand %vm1225_vm8, %vm1385_vm10  ;;  %v4896_v5 = vsel %vm1452_vm9, %v4727_v50, -1e+12  ;;  %v1911_v12 = vpack.c.bf16 %v2973_v32, %v2969_v29  ;;  %v1808_v50 = vadd.f32 %v4806_v23, %v4802_v47  ;;  %v1820_v47 = vadd.f32 %v4838_v49, %v4834_v34 }
 0x301   :  { %vm1450_vm13 = vmand %vm1226_vm12, %vm1386_vm11  ;;  %v1912_v10 = vpack.c.bf16 %v2975_v39, %v2971_v19  ;;  %v1610_v58 = vmax.f32 %v4891_v63, %v4896_v5  ;;  %v4901_v31 = vsel %vm1449_vm15, %v4677_v41, -1e+12  ;;  %v1805_v41 = vadd.f32 %v4808_v57, %v4800_v4 }
 0x302   :  { %v4904_v15 = vsel %vm1450_vm13, %v4697_v36, -1e+12  ;;  %v1817_v4 = vadd.f32 %v4840_v26, %v4832_v0  ;;  %v1826_v23 = vadd.f32 %v4854_v53, %v4850_v25  ;;  %v1823_v57 = vadd.f32 %v4858_v52, %v4848_v54  ;;  %v5439_v26 = vld [vmem:[#allocation15_spill] sm:$0xff] }
 0x303   :  { %2021 = vmatprep.mubr.bf16.mxu0 %v1912_v10  ;;  %1611 = vmax.xlane.f32.xlu0 %v1610_v58  ;;  %v1607_v56 = vmax.f32 %v4901_v31, %v4904_v15  ;;  %v1838_v55 = vadd.f32 %v2975_v39, %v2973_v32 }
 0x305   :  { %v2977_v59 = vpop.eup %2976  ;;  %2022 = vmatmul.mubr.bf16.gmra.mrb[68].mxu0 %v1911_v12  ;;  %1608 = vmax.xlane.f32.xlu1 %v1607_v56 }
 0x306   :  { %v2979_v20 = vpop.eup %2978 }
 0x307   :  { %v2981_v62 = vpop.eup %2980  ;;  %1809 = vadd.xlane.f32.xlu0 %v1808_v50  ;;  %v1841_v53 = vadd.f32 %v2979_v20, %v2977_v59 }
 0x308   :  { %v2983_v38 = vpop.eup %2982  ;;  %v1913_v27 = vpack.c.bf16 %v2981_v62, %v2977_v59 }
 0x309   :  { %1806 = vadd.xlane.f32.xlu1 %v1805_v41  ;;  %v1914_v36 = vpack.c.bf16 %v2983_v38, %v2979_v20  ;;  %v1844_v0 = vadd.f32 %v2983_v38, %v2981_v62 }
 0x30b   :  { %2029 = vmatprep.mubr.bf16.mxu0 %v1914_v36  ;;  %1815 = vadd.xlane.f32.xlu0 %v1814_v42 }
 0x30d   :  { %2030 = vmatmul.mubr.bf16.gmra.mrb[72].mxu0 %v1913_v27  ;;  %1812 = vadd.xlane.f32.xlu1 %v1811_v61 }
 0x30f   :  { %1821 = vadd.xlane.f32.xlu0 %v1820_v47 }
 0x311   :  { %1818 = vadd.xlane.f32.xlu1 %v1817_v4 }
 0x313   :  { %1827 = vadd.xlane.f32.xlu0 %v1826_v23 }
 0x315   :  { %1824 = vadd.xlane.f32.xlu1 %v1823_v57 }
 0x317   :  { %1833 = vadd.xlane.f32.xlu0 %v1832_v43 }
 0x319   :  { %1830 = vadd.xlane.f32.xlu1 %v1829_v30 }
 0x31b   :  { %1839 = vadd.xlane.f32.xlu0 %v1838_v55 }
 0x31d   :  { %1836 = vadd.xlane.f32.xlu1 %v1835_v24 }
 0x31f   :  { %1845 = vadd.xlane.f32.xlu0 %v1844_v0 }
 0x321   :  { %1842 = vadd.xlane.f32.xlu1 %v1841_v53 }
 0x32b   :  { %v1561_v34 = vpop.xlane.xlu0 %1560 }
 0x32c   :  { %v1641_v49 = vsub.f32 %v4440_v21, %v1561_v34  ;;  %v1642_v54 = vsub.f32 %v5439_v26, %v1561_v34 }
 0x32d   :  { %v1564_v25 = vpop.xlane.xlu1 %1563 }
 0x32e   :  { %v1733_v52 = vmul.f32 1.442695, %v1641_v49  ;;  %v1735_v8 = vmul.f32 1.442695, %v1642_v54  ;;  %v1643_v18 = vsub.f32 %v5440_v11, %v1564_v25  ;;  %v1644_v2 = vsub.f32 %v5441_v1, %v1564_v25 }
 0x32f   :  { %v1567_v32 = vpop.xlane.xlu0 %1566 }
 0x330   :  { %2984 = vpow2.f32 %v1733_v52  ;;  %v1737_v29 = vmul.f32 1.442695, %v1643_v18  ;;  %v1739_v19 = vmul.f32 1.442695, %v1644_v2  ;;  %v1645_v39 = vsub.f32 %v4473_v44, %v1567_v32 }
 0x331   :  { %2986 = vpow2.f32 %v1735_v8  ;;  %v1646_v10 = vsub.f32 %v4476_v46, %v1567_v32  ;;  %v1573_v58 = vpop.xlane.xlu1 %1572 }
 0x332   :  { %2988 = vpow2.f32 %v1737_v29  ;;  %v1741_v21 = vmul.f32 1.442695, %v1645_v39  ;;  %v1649_v12 = vsub.f32 %v4505_v17, %v1573_v58  ;;  %v1650_v56 = vsub.f32 %v4508_v60, %v1573_v58 }
 0x333   :  { %2990 = vpow2.f32 %v1739_v19  ;;  %v1743_v59 = vmul.f32 1.442695, %v1646_v10  ;;  %v1570_v50 = vpop.xlane.xlu0 %1569 }
 0x334   :  { %2992 = vpow2.f32 %v1741_v21  ;;  %v1749_v20 = vmul.f32 1.442695, %v1649_v12  ;;  %v1751_v62 = vmul.f32 1.442695, %v1650_v56  ;;  %v1647_v41 = vsub.f32 %v4533_v28, %v1570_v50 }
 0x335   :  { %2994 = vpow2.f32 %v1743_v59  ;;  %v1648_v44 = vsub.f32 %v4536_v40, %v1570_v50  ;;  %v1579_v38 = vpop.xlane.xlu1 %1578 }
 0x336   :  { %2996 = vpow2.f32 %v1749_v20  ;;  %v1745_v46 = vmul.f32 1.442695, %v1647_v41  ;;  %v1653_v36 = vsub.f32 %v4561_v9, %v1579_v38  ;;  %v1654_v17 = vsub.f32 %v4564_v48, %v1579_v38 }
 0x337   :  { %2998 = vpow2.f32 %v1751_v62  ;;  %v1747_v60 = vmul.f32 1.442695, %v1648_v44  ;;  %v1576_v42 = vpop.xlane.xlu0 %1575  ;;  %v5442_v62 = vld [vmem:[#allocation18_spill] sm:$0xff] }
 0x338   :  { %3000 = vpow2.f32 %v1745_v46  ;;  %v1757_v27 = vmul.f32 1.442695, %v1653_v36  ;;  %v1759_v61 = vmul.f32 1.442695, %v1654_v17  ;;  %v1651_v47 = vsub.f32 %v4579_v3, %v1576_v42 }
 0x339   :  { %3002 = vpow2.f32 %v1747_v60  ;;  %v1652_v28 = vsub.f32 %v4582_v22, %v1576_v42  ;;  %v1585_v4 = vpop.xlane.xlu1 %1584  ;;  %v5444_v42 = vld [vmem:[#allocation20_spill] sm:$0xff] }
 0x33a   :  { %v2985_v40 = vpop.eup %2984  ;;  %3004 = vpow2.f32 %v1757_v27  ;;  %v1753_v23 = vmul.f32 1.442695, %v1651_v47  ;;  %v1657_v57 = vsub.f32 %v4618_v7, %v1585_v4  ;;  %v1658_v9 = vsub.f32 %v4621_v13, %v1585_v4 }
 0x33b   :  { %v2987_v48 = vpop.eup %2986  ;;  %3006 = vpow2.f32 %v1759_v61  ;;  %v1755_v43 = vmul.f32 1.442695, %v1652_v28  ;;  %v1582_v30 = vpop.xlane.xlu0 %1581  ;;  %v5445_v61 = vld [vmem:[#allocation21_spill] sm:$0xff] }
 0x33c   :  { %v2989_v55 = vpop.eup %2988  ;;  %3008 = vpow2.f32 %v1753_v23  ;;  %v1765_v24 = vmul.f32 1.442695, %v1657_v57  ;;  %v1767_v0 = vmul.f32 1.442695, %v1658_v9  ;;  %v1655_v3 = vsub.f32 %v4642_v6, %v1582_v30 }
 0x33d   :  { %v2991_v53 = vpop.eup %2990  ;;  %3010 = vpow2.f32 %v1755_v43  ;;  %v1656_v22 = vsub.f32 %v4645_v16, %v1582_v30  ;;  %v1591_v34 = vpop.xlane.xlu1 %1590  ;;  %v1847_v49 = vadd.f32 %v2987_v48, %v2985_v40  ;;  %v1915_v26 = vpack.c.bf16 %v2989_v55, %v2985_v40  ;;  %v5446_v30 = vld [vmem:[#allocation22_spill] sm:$0xff] }
 0x33e   :  { %v4946_v7 = vpop.eup %2992  ;;  %3012 = vpow2.f32 %v1765_v24  ;;  %v1761_v13 = vmul.f32 1.442695, %v1655_v3  ;;  %v1661_v54 = vsub.f32 %v4664_v35, %v1591_v34  ;;  %v1662_v25 = vsub.f32 %v4667_v14, %v1591_v34 }
 0x33f   :  { %v2995_v52 = vpop.eup %2994  ;;  %3014 = vpow2.f32 %v1767_v0  ;;  %v1763_v8 = vmul.f32 1.442695, %v1656_v22  ;;  %1848 = vadd.xlane.f32.xlu1 %v1847_v49  ;;  %v1916_v6 = vpack.c.bf16 %v2991_v53, %v2987_v48  ;;  %v1588_v11 = vpop.xlane.xlu0 %1587  ;;  %v1850_v18 = vadd.f32 %v2991_v53, %v2989_v55  ;;  %v5447_v0 = vld [vmem:[#allocation23_spill] sm:$0xff] }
 0x340   :  { %v4950_v1 = vpop.eup %2996  ;;  %3016 = vpow2.f32 %v1761_v13  ;;  %v1773_v16 = vmul.f32 1.442695, %v1661_v54  ;;  %v1775_v2 = vmul.f32 1.442695, %v1662_v25  ;;  %v1659_v32 = vsub.f32 %v4682_v51, %v1588_v11  ;;  %v5448_v25 = vld [vmem:[#allocation24_spill] sm:$0xff] }
 0x341   :  { %v2999_v29 = vpop.eup %2998  ;;  %3018 = vpow2.f32 %v1763_v8  ;;  %2037 = vmatprep.mubr.bf16.mxu0 %v1916_v6  ;;  %v1660_v35 = vsub.f32 %v4685_v33, %v1588_v11  ;;  %1851 = vadd.xlane.f32.xlu0 %v1850_v18  ;;  %v1597_v14 = vpop.xlane.xlu1 %1596  ;;  %v1853_v19 = vadd.f32 %v2995_v52, %v4946_v7  ;;  %v5449_v8 = vld [vmem:[#allocation25_spill] sm:$0xff] }
 0x342   :  { %v3001_v39 = vpop.eup %3000  ;;  %3020 = vpow2.f32 %v1773_v16  ;;  %v1769_v10 = vmul.f32 1.442695, %v1659_v32  ;;  %2038 = vmatmul.mubr.bf16.gmra.mrb[76].mxu0 %v1915_v26  ;;  %v1665_v58 = vsub.f32 %v4719_v45, %v1597_v14  ;;  %v1666_v21 = vsub.f32 %v4722_v37, %v1597_v14  ;;  %v5443_v45 = vld [vmem:[#allocation19_spill] sm:$0xff] }
 0x343   :  { %v3003_v12 = vpop.eup %3002  ;;  %3022 = vpow2.f32 %v1775_v2  ;;  %v1771_v51 = vmul.f32 1.442695, %v1660_v35  ;;  %1854 = vadd.xlane.f32.xlu1 %v1853_v19  ;;  %v1594_v56 = vpop.xlane.xlu0 %1593  ;;  %v1859_v59 = vadd.f32 %v2999_v29, %v4950_v1  ;;  %v1917_v23 = vpack.c.bf16 %v3001_v39, %v4946_v7 }
 0x344   :  { %v4958_v33 = vpop.eup %3004  ;;  %3024 = vpow2.f32 %v1769_v10  ;;  %v1781_v50 = vmul.f32 1.442695, %v1665_v58  ;;  %v1783_v20 = vmul.f32 1.442695, %v1666_v21  ;;  %v1663_v41 = vsub.f32 %v5442_v62, %v1594_v56 }
 0x345   :  { %v4961_v44 = vpop.eup %3006  ;;  %3026 = vpow2.f32 %v1771_v51  ;;  %v1664_v38 = vsub.f32 %v5443_v45, %v1594_v56  ;;  %v1918_v37 = vpack.c.bf16 %v3003_v12, %v2995_v52  ;;  %v1603_v46 = vpop.xlane.xlu1 %1602  ;;  %v1856_v36 = vadd.f32 %v3003_v12, %v3001_v39 }
 0x346   :  { %v3009_v17 = vpop.eup %3008  ;;  %3028 = vpow2.f32 %v1781_v50  ;;  %v1777_v60 = vmul.f32 1.442695, %v1663_v41  ;;  %v1669_v27 = vsub.f32 %v5444_v42, %v1603_v46  ;;  %v1670_v47 = vsub.f32 %v5445_v61, %v1603_v46 }
 0x347   :  { %v3011_v28 = vpop.eup %3010  ;;  %3030 = vpow2.f32 %v1783_v20  ;;  %v1779_v4 = vmul.f32 1.442695, %v1664_v38  ;;  %2045 = vmatprep.mubr.bf16.mxu0 %v1918_v37  ;;  %1860 = vadd.xlane.f32.xlu1 %v1859_v59  ;;  %v1600_v40 = vpop.xlane.xlu0 %1599  ;;  %v1865_v57 = vadd.f32 %v4961_v44, %v4958_v33  ;;  %v1919_v19 = vpack.c.bf16 %v3009_v17, %v4950_v1 }
 0x348   :  { %v4969_v9 = vpop.eup %3012  ;;  %3032 = vpow2.f32 %v1777_v60  ;;  %v1789_v48 = vmul.f32 1.442695, %v1669_v27  ;;  %v1791_v43 = vmul.f32 1.442695, %v1670_v47  ;;  %1857 = vadd.xlane.f32.xlu0 %v1856_v36  ;;  %v1667_v55 = vsub.f32 %v5446_v30, %v1600_v40 }
 0x349   :  { %v3015_v24 = vpop.eup %3014  ;;  %3034 = vpow2.f32 %v1779_v4  ;;  %v1668_v3 = vsub.f32 %v5447_v0, %v1600_v40  ;;  %v1920_v53 = vpack.c.bf16 %v3011_v28, %v2999_v29  ;;  %v1862_v22 = vadd.f32 %v3011_v28, %v3009_v17 }
 0x34a   :  { %v3017_v34 = vpop.eup %3016  ;;  %3036 = vpow2.f32 %v1789_v48  ;;  %v1785_v49 = vmul.f32 1.442695, %v1667_v55  ;;  %2046 = vmatmul.mubr.bf16.gmra.mrb[80].mxu0 %v1917_v23  ;;  %v1871_v16 = vadd.f32 %v3015_v24, %v4969_v9 }
 0x34b   :  { %v3019_v26 = vpop.eup %3018  ;;  %3038 = vpow2.f32 %v1791_v43  ;;  %v1787_v7 = vmul.f32 1.442695, %v1668_v3  ;;  %2053 = vmatprep.mubr.bf16.mxu0 %v1920_v53  ;;  %1866 = vadd.xlane.f32.xlu1 %v1865_v57  ;;  %v1606_v13 = vpop.xlane.xlu0 %1605  ;;  %v1921_v1 = vpack.c.bf16 %v3017_v34, %v4958_v33 }
 0x34c   :  { %v3021_v54 = vpop.eup %3020  ;;  %3040 = vpow2.f32 %v1785_v49  ;;  %1863 = vadd.xlane.f32.xlu0 %v1862_v22  ;;  %v1671_v52 = vsub.f32 %v5448_v25, %v1606_v13  ;;  %v1672_v6 = vsub.f32 %v5449_v8, %v1606_v13  ;;  %v1868_v11 = vadd.f32 %v3019_v26, %v3017_v34 }
 0x34d   :  { %v3023_v18 = vpop.eup %3022  ;;  %3042 = vpow2.f32 %v1787_v7  ;;  %v1922_v58 = vpack.c.bf16 %v3019_v26, %v4961_v44 }
 0x34e   :  { %v3025_v2 = vpop.eup %3024  ;;  %v1793_v32 = vmul.f32 1.442695, %v1671_v52  ;;  %v1795_v29 = vmul.f32 1.442695, %v1672_v6  ;;  %v1877_v21 = vadd.f32 %v3023_v18, %v3021_v54  ;;  %v3120_v6 = vld [vmem:[%s5365_s2] sm:$0xff] }
 0x34f   :  { %v3027_v35 = vpop.eup %3026  ;;  %1872 = vadd.xlane.f32.xlu1 %v1871_v16  ;;  %v1923_v17 = vpack.c.bf16 %v3025_v2, %v4969_v9 }
 0x350   :  { %v3029_v14 = vpop.eup %3028  ;;  %3044 = vpow2.f32 %v1793_v32  ;;  %1869 = vadd.xlane.f32.xlu0 %v1868_v11  ;;  %v1874_v39 = vadd.f32 %v3027_v35, %v3025_v2  ;;  %v1924_v38 = vpack.c.bf16 %v3027_v35, %v3015_v24 }
 0x351   :  { %v3031_v10 = vpop.eup %3030  ;;  %3046 = vpow2.f32 %v1795_v29  ;;  %v3153_v29 = vmov 0.0  }
 0x352   :  { %v3033_v12 = vpop.eup %3032  ;;  %2054 = vmatmul.mubr.bf16.gmra.mrb[84].mxu0 %v1919_v19  ;;  %v1883_v20 = vadd.f32 %v3031_v10, %v3029_v14 }
 0x353   :  { %v3035_v51 = vpop.eup %3034  ;;  %2061 = vmatprep.mubr.bf16.mxu0 %v1922_v58  ;;  %1878 = vadd.xlane.f32.xlu1 %v1877_v21  ;;  %v1925_v42 = vpack.c.bf16 %v3033_v12, %v3021_v54  ;;  %v5450_v54 = vlaneseq }
 0x354   :  { %v3037_v56 = vpop.eup %3036  ;;  %1875 = vadd.xlane.f32.xlu0 %v1874_v39  ;;  %v1880_v59 = vadd.f32 %v3035_v51, %v3033_v12  ;;  %v1926_v60 = vpack.c.bf16 %v3035_v51, %v3023_v18 }
 0x355   :  { %v3039_v50 = vpop.eup %3038  ;;  %v4985_v25 = vshrl.u32 %v5450_v54, 7 }
 0x356   :  { %v3041_v62 = vpop.eup %3040  ;;  %v1889_v44 = vadd.f32 %v3039_v50, %v3037_v56 }
 0x357   :  { %v3043_v41 = vpop.eup %3042  ;;  %1884 = vadd.xlane.f32.xlu1 %v1883_v20  ;;  %v1927_v33 = vpack.c.bf16 %v3041_v62, %v3029_v14  ;;  %v1038_v8 = vadd.s32 8, %v4985_v25  ;;  %vm2110_vm14 = vcmp.lt.s32.totalorder %v4985_v25, %v3120_v6  ;;  %v1039_v11 = vadd.s32 16, %v4985_v25  ;;  %v3121_v14 = vld [vmem:[%s5365_s2 + $0x8] sm:$0xff] }
 0x358   :  { %1881 = vadd.xlane.f32.xlu0 %v1880_v59  ;;  %v1886_v45 = vadd.f32 %v3043_v41, %v3041_v62  ;;  %v1928_v27 = vpack.c.bf16 %v3043_v41, %v3031_v10  ;;  %v2565_v35 = vsel %vm2110_vm14, 1.0, %v3153_v29  ;;  %v1041_v19 = vadd.s32 32, %v4985_v25  ;;  %v3122_v10 = vld [vmem:[%s5365_s2 + $0x10] sm:$0xff] }
 0x359   :  { %vm2111_vm0 = vcmp.lt.s32.totalorder %v1038_v8, %v3121_v14  ;;  %vm2112_vm1 = vcmp.lt.s32.totalorder %v1039_v11, %v3122_v10  ;;  %v1040_v58 = vadd.s32 24, %v4985_v25  ;;  %v3129_v11 = vld [vmem:[%s5365_s2 + $0x50] sm:$0xff] }
 0x35a   :  { %v3045_v37 = vpop.eup %3044  ;;  %2062 = vmatmul.mubr.bf16.gmra.mrb[88].mxu0 %v1921_v1  ;;  %v2566_v59 = vsel %vm2111_vm0, 1.0, %v3153_v29  ;;  %v2567_v1 = vsel %vm2112_vm1, 1.0, %v3153_v29 }
 0x35b   :  { %v3047_v46 = vpop.eup %3046  ;;  %2069 = vmatprep.mubr.bf16.mxu0 %v1924_v38  ;;  %1890 = vadd.xlane.f32.xlu1 %v1889_v44  ;;  %v1929_v47 = vpack.c.bf16 %v3045_v37, %v3037_v56  ;;  %v1043_v38 = vadd.s32 48, %v4985_v25 }
 0x35c   :  { %1887 = vadd.xlane.f32.xlu0 %v1886_v45  ;;  %v1892_v36 = vadd.f32 %v3047_v46, %v3045_v37  ;;  %v1930_v61 = vpack.c.bf16 %v3047_v46, %v3039_v50  ;;  %v3123_v45 = vld [vmem:[%s5365_s2 + $0x20] sm:$0xff]  ;;  %v3124_v37 = vld [vmem:[%s5365_s2 + $0x18] sm:$0xff]  ;;  %v1042_v46 = vadd.s32 40, %v4985_v25 }
 0x35d   :  { %vm2114_vm3 = vcmp.lt.s32.totalorder %v1041_v19, %v3123_v45  ;;  %vm2113_vm4 = vcmp.lt.s32.totalorder %v1040_v58, %v3124_v37 }
 0x360   :  { %1893 = vadd.xlane.f32.xlu0 %v1892_v36 }
 0x362   :  { %2070 = vmatmul.mubr.bf16.gmra.mrb[92].mxu0 %v1923_v17 }
 0x363   :  { %2077 = vmatprep.mubr.bf16.mxu0 %v1926_v60  ;;  %v2569_v60 = vsel %vm2114_vm3, 1.0, %v3153_v29 }
 0x36a   :  { %2078 = vmatmul.mubr.bf16.gmra.mrb[96].mxu0 %v1925_v42 }
 0x36b   :  { %2085 = vmatprep.mubr.bf16.mxu0 %v1928_v27 }
 0x372   :  { %2086 = vmatmul.mubr.bf16.gmra.mrb[100].mxu0 %v1927_v33 }
 0x373   :  { %2093 = vmatprep.mubr.bf16.mxu0 %v1930_v61  ;;  %v2568_v61 = vsel %vm2113_vm4, 1.0, %v3153_v29 }
 0x37a   :  { %2094 = vmatmul.mubr.bf16.gmra.mrb[104].mxu0 %v1929_v47  ;;  %v3125_v47 = vld [vmem:[%s5365_s2 + $0x30] sm:$0xff] }
 0x37b   :  { %vm2116_vm5 = vcmp.lt.s32.totalorder %v1043_v38, %v3125_v47 }
 0x390   :  { %v1612_v28 = vpop.xlane.xlu0 %1611 }
 0x391   :  { %v1675_v4 = vsub.f32 %v4891_v63, %v1612_v28  ;;  %v1676_v40 = vsub.f32 %v4896_v5, %v1612_v28  ;;  %v1045_v28 = vadd.s32 64, %v4985_v25 }
 0x392   :  { %v1609_v23 = vpop.xlane.xlu1 %1608 }
 0x393   :  { %v1801_v57 = vmul.f32 1.442695, %v1675_v4  ;;  %v1803_v9 = vmul.f32 1.442695, %v1676_v40  ;;  %v1673_v48 = vsub.f32 %v4901_v31, %v1609_v23  ;;  %v1674_v43 = vsub.f32 %v4904_v15, %v1609_v23  ;;  %v3126_v40 = vld [vmem:[%s5365_s2 + $0x28] sm:$0xff] }
 0x394   :  { %v1810_v0 = vpop.xlane.xlu0 %1809  ;;  %vm2115_vm6 = vcmp.lt.s32.totalorder %v1042_v46, %v3126_v40  ;;  %v1044_v23 = vadd.s32 56, %v4985_v25 }
 0x395   :  { %3048 = vpow2.f32 %v1801_v57  ;;  %v1797_v30 = vmul.f32 1.442695, %v1673_v48  ;;  %v1799_v55 = vmul.f32 1.442695, %v1674_v43 }
 0x396   :  { %3050 = vpow2.f32 %v1803_v9  ;;  %v1807_v24 = vpop.xlane.xlu1 %1806 }
 0x397   :  { %3052 = vpow2.f32 %v1797_v30 }
 0x398   :  { %3054 = vpow2.f32 %v1799_v55  ;;  %v1816_v49 = vpop.xlane.xlu0 %1815 }
 0x399   :  { %3056 = vrcp.f32 %v1807_v24 }
 0x39a   :  { %v1813_v3 = vpop.xlane.xlu1 %1812  ;;  %3058 = vrcp.f32 %v1810_v0  ;;  %v2571_v0 = vsel %vm2116_vm5, 1.0, %v3153_v29 }
 0x39b   :  { %3060 = vrcp.f32 %v1813_v3 }
 0x39c   :  { %v1822_v13 = vpop.xlane.xlu0 %1821 }
 0x39e   :  { %v1819_v7 = vpop.xlane.xlu1 %1818 }
 0x39f   :  { %v3049_v53 = vpop.eup %3048  ;;  %3062 = vrcp.f32 %v1819_v7 }
 0x3a0   :  { %v3051_v63 = vpop.eup %3050  ;;  %v1828_v18 = vpop.xlane.xlu0 %1827  ;;  %3064 = vrcp.f32 %v1816_v49  ;;  %v3128_v49 = vld [vmem:[%s5365_s2 + $0x38] sm:$0xff] }
 0x3a1   :  { %v3053_v22 = vpop.eup %3052  ;;  %v1898_v5 = vadd.f32 %v3051_v63, %v3049_v53  ;;  %vm2117_vm8 = vcmp.lt.s32.totalorder %v1044_v23, %v3128_v49 }
 0x3a2   :  { %v3055_v34 = vpop.eup %3054  ;;  %v1931_v26 = vpack.c.bf16 %v3049_v53, %v3053_v22  ;;  %v1825_v52 = vpop.xlane.xlu1 %1824  ;;  %v2572_v6 = vsel %vm2117_vm8, 1.0, %v3153_v29 }
 0x3a3   :  { %1899 = vadd.xlane.f32.xlu0 %v1898_v5  ;;  %v1895_v31 = vadd.f32 %v3055_v34, %v3053_v22  ;;  %v1932_v15 = vpack.c.bf16 %v3051_v63, %v3055_v34  ;;  %v3057_v32 = vpop.eup %3056  ;;  %3066 = vrcp.f32 %v1825_v52  ;;  %v2570_v22 = vsel %vm2115_vm6, 1.0, %v3153_v29  ;;  %v3127_v5 = vld [vmem:[%s5365_s2 + $0x40] sm:$0xff] }
 0x3a4   :  { %3068 = vrcp.f32 %v1822_v13  ;;  %v3059_v56 = vpop.eup %3058  ;;  %v1834_v50 = vpop.xlane.xlu0 %1833  ;;  %v2238_v62 = vmul.f32 %v3057_v32, %v2565_v35  ;;  %vm2118_vm7 = vcmp.lt.s32.totalorder %v1045_v28, %v3127_v5  ;;  %v1047_v34 = vadd.s32 80, %v4985_v25 }
 0x3a5   :  { %1896 = vadd.xlane.f32.xlu1 %v1895_v31  ;;  %2101 = vmatprep.mubr.bf16.mxu0 %v1932_v15  ;;  %v3061_v41 = vpop.eup %3060  ;;  %v2239_v36 = vmul.f32 %v3059_v56, %v2566_v59  ;;  %v2573_v15 = vsel %vm2118_vm7, 1.0, %v3153_v29  ;;  %v1048_v32 = vadd.s32 88, %v4985_v25 }
 0x3a6   :  { %2102 = vmatmul.mubr.bf16.gmra.mrb[108].mxu0 %v1931_v26  ;;  %v1831_v16 = vpop.xlane.xlu1 %1830  ;;  %v2240_v27 = vmul.f32 %v3061_v41, %v2567_v1  ;;  %v1046_v26 = vadd.s32 72, %v4985_v25  ;;  %vm2120_vm9 = vcmp.lt.s32.totalorder %v1047_v34, %v3129_v11  ;;  %v1050_v41 = vadd.s32 104, %v4985_v25 }
 0x3a7   :  { %3070 = vrcp.f32 %v1831_v16  ;;  %v2575_v58 = vsel %vm2120_vm9, 1.0, %v3153_v29 }
 0x3a8   :  { %3072 = vrcp.f32 %v1828_v18  ;;  %v1840_v57 = vpop.xlane.xlu0 %1839  ;;  %v1049_v18 = vadd.s32 96, %v4985_v25 }
 0x3a9   :  { %v3063_v17 = vpop.eup %3062 }
 0x3aa   :  { %v1837_v44 = vpop.xlane.xlu1 %1836  ;;  %v3065_v33 = vpop.eup %3064  ;;  %v2242_v55 = vmul.f32 %v3063_v17, %v2569_v60  ;;  %v3133_v60 = vld [vmem:[%s5365_s2 + $0x68] sm:$0xff] }
 0x3ab   :  { %3074 = vrcp.f32 %v1837_v44  ;;  %v2241_v53 = vmul.f32 %v3065_v33, %v2568_v61  ;;  %vm2123_vm15 = vcmp.lt.s32.totalorder %v1050_v41, %v3133_v60  ;;  %v1059_v60 = vadd.s32 176, %v4985_v25 }
 0x3ac   :  { %3076 = vrcp.f32 %v1834_v50  ;;  %v1846_v13 = vpop.xlane.xlu0 %1845  ;;  %v3131_v50 = vld [vmem:[%s5365_s2 + $0x60] sm:$0xff]  ;;  %v2578_v23 = vsel %vm2123_vm15, 1.0, %v3153_v29 }
 0x3ad   :  { %v3067_v24 = vpop.eup %3066  ;;  %vm2122_vm11 = vcmp.lt.s32.totalorder %v1049_v18, %v3131_v50 }
 0x3ae   :  { %v1843_v43 = vpop.xlane.xlu1 %1842  ;;  %v3069_v63 = vpop.eup %3068  ;;  %v2244_v7 = vmul.f32 %v3067_v24, %v2571_v0  ;;  %v2577_v38 = vsel %vm2122_vm11, 1.0, %v3153_v29  ;;  %v3134_v0 = vld [vmem:[%s5365_s2 + $0x70] sm:$0xff] }
 0x3af   :  { %3078 = vrcp.f32 %v1843_v43  ;;  %v2243_v52 = vmul.f32 %v3069_v63, %v2570_v22  ;;  %v1052_v43 = vadd.s32 120, %v4985_v25 }
 0x3b0   :  { %v2712_v2 = vpop.f32.mrb[48].mxu0  ;;  %3080 = vrcp.f32 %v1840_v57  ;;  %v1051_v57 = vadd.s32 112, %v4985_v25 }
 0x3b1   :  { %v2713_v39 = vpop.f32.mrb[49].mxu0  ;;  %v3071_v31 = vpop.eup %3070  ;;  %3082 = vrcp.f32 %v1846_v13  ;;  %v1054_v13 = vadd.s32 136, %v4985_v25 }
 0x3b2   :  { %v5002_v21 = vadd.f32 %v2713_v39, %v2712_v2  ;;  %v2715_v12 = vpop.f32.mrb[50].mxu0  ;;  %v3073_v8 = vpop.eup %3072  ;;  %v3130_v2 = vld [vmem:[%s5365_s2 + $0x48] sm:$0xff]  ;;  %v2246_v39 = vmul.f32 %v3071_v31, %v2573_v15  ;;  %vm2124_vm13 = vcmp.lt.s32.totalorder %v1051_v57, %v3134_v0  ;;  %v3136_v15 = vld [vmem:[%s5365_s2 + $0x80] sm:$0xff] }
 0x3b3   :  { %v2716_v51 = vpop.f32.mrb[51].mxu0  ;;  %vm2119_vm10 = vcmp.lt.s32.totalorder %v1046_v26, %v3130_v2  ;;  %v2579_v49 = vsel %vm2124_vm13, 1.0, %v3153_v29  ;;  %v3135_v26 = vld [vmem:[%s5365_s2 + $0x78] sm:$0xff] }
 0x3b4   :  { %v5005_v20 = vadd.f32 %v2716_v51, %v2715_v12  ;;  %v2245_v51 = vmul.f32 %v3073_v8, %v2572_v6  ;;  %v2574_v59 = vsel %vm2119_vm10, 1.0, %v3153_v29  ;;  %vm2125_vm14 = vcmp.lt.s32.totalorder %v1052_v43, %v3135_v26 }
 0x3b5   :  { %v3075_v10 = vpop.eup %3074  ;;  %v2580_v6 = vsel %vm2125_vm14, 1.0, %v3153_v29 }
 0x3b6   :  { %2272 = vperm.xlu1 %2927, %v2238_v62   ;;  %v3077_v56 = vpop.eup %3076  ;;  %v3132_v62 = vld [vmem:[%s5365_s2 + $0x58] sm:$0xff]  ;;  %v2248_v1 = vmul.f32 %v3075_v10, %v2575_v58 }
 0x3b7   :  { %vm2121_vm12 = vcmp.lt.s32.totalorder %v1048_v32, %v3132_v62  ;;  %v2247_v37 = vmul.f32 %v3077_v56, %v2574_v59 }
 0x3b8   :  { %v2718_v42 = vpop.f32.mrb[52].mxu0 }
 0x3b9   :  { %v2719_v4 = vpop.f32.mrb[53].mxu0  ;;  %2277 = vperm.xlu0 %2926, %v2239_v36   ;;  %v3079_v45 = vpop.eup %3078  ;;  %v2576_v36 = vsel %vm2121_vm12, 1.0, %v3153_v29 }
 0x3ba   :  { %v5026_v9 = vadd.f32 %v2719_v4, %v2718_v42  ;;  %v2721_v48 = vpop.f32.mrb[54].mxu0  ;;  %2282 = vperm.xlu1 %2927, %v2240_v27   ;;  %v3081_v46 = vpop.eup %3080  ;;  %v2250_v61 = vmul.f32 %v3079_v45, %v2577_v38 }
 0x3bb   :  { %v2722_v30 = vpop.f32.mrb[55].mxu0  ;;  %v2249_v4 = vmul.f32 %v3081_v46, %v2576_v36  ;;  %v3083_v40 = vpop.eup %3082  ;;  %v3139_v36 = vld [vmem:[%s5365_s2 + $0x98] sm:$0xff] }
 0x3bc   :  { %v5030_v3 = vadd.f32 %v2722_v30, %v2721_v48  ;;  %v2251_v24 = vmul.f32 %v3083_v40, %v2578_v23 }
 0x3bd   :  { %2292 = vperm.xlu0 %2926, %v2242_v55  }
 0x3be   :  { %2287 = vperm.xlu1 %2927, %v2241_v53   ;;  %v1053_v53 = vadd.s32 128, %v4985_v25 }
 0x3c0   :  { %v2724_v54 = vpop.f32.mrb[56].mxu0  ;;  %vm2126_vm0 = vcmp.lt.s32.totalorder %v1053_v53, %v3136_v15 }
 0x3c1   :  { %v2725_v16 = vpop.f32.mrb[57].mxu0  ;;  %2302 = vperm.xlu0 %2926, %v2244_v7   ;;  %v2581_v11 = vsel %vm2126_vm0, 1.0, %v3153_v29 }
 0x3c2   :  { %v5052_v35 = vadd.f32 %v2725_v16, %v2724_v54  ;;  %v2727_v14 = vpop.f32.mrb[58].mxu0  ;;  %2297 = vperm.xlu1 %2927, %v2243_v52   ;;  %v1055_v54 = vadd.s32 144, %v4985_v25 }
 0x3c3   :  { %v2728_v19 = vpop.f32.mrb[59].mxu0 }
 0x3c4   :  { %v5055_v12 = vadd.f32 %v2728_v19, %v2727_v14  ;;  %v3137_v14 = vld [vmem:[%s5365_s2 + $0x88] sm:$0xff]  ;;  %v3138_v19 = vld [vmem:[%s5365_s2 + $0x90] sm:$0xff] }
 0x3c5   :  { %2312 = vperm.xlu0 %2926, %v2246_v39   ;;  %vm2127_vm1 = vcmp.lt.s32.totalorder %v1054_v13, %v3137_v14  ;;  %vm2128_vm3 = vcmp.lt.s32.totalorder %v1055_v54, %v3138_v19  ;;  %v1056_v39 = vadd.s32 152, %v4985_v25 }
 0x3c6   :  { %2307 = vperm.xlu1 %2927, %v2245_v51   ;;  %v1057_v51 = vadd.s32 160, %v4985_v25 }
 0x3c7   :  { %vm2129_vm4 = vcmp.lt.s32.totalorder %v1056_v39, %v3139_v36 }
 0x3c8   :  { %v2730_v44 = vpop.f32.mrb[60].mxu0  ;;  %v2584_v23 = vsel %vm2129_vm4, 1.0, %v3153_v29 }
 0x3c9   :  { %v2731_v17 = vpop.f32.mrb[61].mxu0  ;;  %2322 = vperm.xlu0 %2926, %v2248_v1  }
 0x3ca   :  { %v5070_v42 = vadd.f32 %v2731_v17, %v2730_v44  ;;  %v2733_v27 = vpop.f32.mrb[62].mxu0  ;;  %2317 = vperm.xlu1 %2927, %v2247_v37   ;;  %v2582_v44 = vsel %vm2127_vm1, 1.0, %v3153_v29  ;;  %v2583_v37 = vsel %vm2128_vm3, 1.0, %v3153_v29  ;;  %v3140_v17 = vld [vmem:[%s5365_s2 + $0xa0] sm:$0xff] }
 0x3cb   :  { %v2734_v33 = vpop.f32.mrb[63].mxu0  ;;  %vm2130_vm5 = vcmp.lt.s32.totalorder %v1057_v51, %v3140_v17 }
 0x3cc   :  { %v5072_v47 = vadd.f32 %v2734_v33, %v2733_v27  ;;  %v1849_v28 = vpop.xlane.xlu1 %1848  ;;  %v1058_v33 = vadd.s32 168, %v4985_v25  ;;  %v2585_v57 = vsel %vm2130_vm5, 1.0, %v3153_v29 }
 0x3cd   :  { %3084 = vrcp.f32 %v1849_v28  ;;  %2332 = vperm.xlu0 %2926, %v2250_v61  }
 0x3ce   :  { %2327 = vperm.xlu1 %2927, %v2249_v4   ;;  %v1852_v48 = vpop.xlane.xlu0 %1851 }
 0x3cf   :  { %3086 = vrcp.f32 %v1852_v48 }
 0x3d0   :  { %v2736_v30 = vpop.f32.mrb[64].mxu0  ;;  %v1855_v55 = vpop.xlane.xlu1 %1854 }
 0x3d1   :  { %3088 = vrcp.f32 %v1855_v55  ;;  %v2737_v63 = vpop.f32.mrb[65].mxu0  ;;  %v3141_v55 = vld [vmem:[%s5365_s2 + $0xb0] sm:$0xff] }
 0x3d2   :  { %v5081_v22 = vadd.f32 %v2737_v63, %v2736_v30  ;;  %v2739_v5 = vpop.f32.mrb[66].mxu0  ;;  %2337 = vperm.xlu1 %2927, %v2251_v24   ;;  %vm2132_vm6 = vcmp.lt.s32.totalorder %v1059_v60, %v3141_v55  ;;  %v1061_v24 = vadd.s32 192, %v4985_v25 }
 0x3d3   :  { %v2740_v34 = vpop.f32.mrb[67].mxu0  ;;  %v2587_v54 = vsel %vm2132_vm6, 1.0, %v3153_v29 }
 0x3d4   :  { %v5087_v7 = vadd.f32 %v2740_v34, %v2739_v5  ;;  %v1861_v31 = vpop.xlane.xlu1 %1860  ;;  %v3142_v5 = vld [vmem:[%s5365_s2 + $0xa8] sm:$0xff]  ;;  %v1060_v34 = vadd.s32 184, %v4985_v25 }
 0x3d5   :  { %3090 = vrcp.f32 %v1861_v31  ;;  %v1858_v52 = vpop.xlane.xlu0 %1857  ;;  %vm2131_vm7 = vcmp.lt.s32.totalorder %v1058_v33, %v3142_v5 }
 0x3d6   :  { %3092 = vrcp.f32 %v1858_v52 }
 0x3d7   :  { %v3085_v8 = vpop.eup %3084 }
 0x3d8   :  { %v2742_v18 = vpop.f32.mrb[68].mxu0  ;;  %v1867_v16 = vpop.xlane.xlu1 %1866  ;;  %v2252_v2 = vmul.f32 %v3085_v8, %v2579_v49 }
 0x3d9   :  { %v3087_v32 = vpop.eup %3086  ;;  %3094 = vrcp.f32 %v1867_v16  ;;  %v1864_v10 = vpop.xlane.xlu0 %1863 }
 0x3da   :  { %v2743_v58 = vpop.f32.mrb[69].mxu0  ;;  %3096 = vrcp.f32 %v1864_v10  ;;  %2342 = vperm.xlu0 %2926, %v2252_v2   ;;  %v2253_v50 = vmul.f32 %v3087_v32, %v2580_v6  ;;  %v2586_v6 = vsel %vm2131_vm7, 1.0, %v3153_v29  ;;  %v3144_v2 = vld [vmem:[%s5365_s2 + $0xb8] sm:$0xff]  ;;  %v1062_v32 = vadd.s32 200, %v4985_v25 }
 0x3db   :  { %v5104_v56 = vadd.f32 %v2743_v58, %v2742_v18  ;;  %v2745_v59 = vpop.f32.mrb[70].mxu0  ;;  %v3089_v62 = vpop.eup %3088  ;;  %v1063_v18 = vadd.s32 208, %v4985_v25  ;;  %vm2133_vm9 = vcmp.lt.s32.totalorder %v1060_v34, %v3144_v2 }
 0x3dc   :  { %v2746_v41 = vpop.f32.mrb[71].mxu0  ;;  %v1873_v45 = vpop.xlane.xlu1 %1872  ;;  %2347 = vperm.xlu1 %2927, %v2253_v50   ;;  %v2254_v38 = vmul.f32 %v3089_v62, %v2581_v11  ;;  %v3143_v11 = vld [vmem:[%s5365_s2 + $0xc0] sm:$0xff]  ;;  %v3145_v50 = vld [vmem:[%s5365_s2 + $0xd0] sm:$0xff]  ;;  %v1065_v62 = vadd.s32 224, %v4985_v25 }
 0x3dd   :  { %v5106_v1 = vadd.f32 %v2746_v41, %v2745_v59  ;;  %3098 = vrcp.f32 %v1873_v45  ;;  %v1870_v46 = vpop.xlane.xlu0 %1869  ;;  %vm2134_vm8 = vcmp.lt.s32.totalorder %v1061_v24, %v3143_v11  ;;  %v2588_v59 = vsel %vm2133_vm9, 1.0, %v3153_v29  ;;  %v3146_v45 = vld [vmem:[%s5365_s2 + $0xc8] sm:$0xff] }
 0x3de   :  { %3100 = vrcp.f32 %v1870_v46  ;;  %2352 = vperm.xlu0 %2926, %v2254_v38   ;;  %v2589_v10 = vsel %vm2134_vm8, 1.0, %v3153_v29  ;;  %vm2136_vm10 = vcmp.lt.s32.totalorder %v1063_v18, %v3145_v50  ;;  %vm2135_vm11 = vcmp.lt.s32.totalorder %v1062_v32, %v3146_v45 }
 0x3df   :  { %v3091_v27 = vpop.eup %3090  ;;  %v1064_v38 = vadd.s32 216, %v4985_v25  ;;  %v2591_v46 = vsel %vm2136_vm10, 1.0, %v3153_v29  ;;  %v2590_v60 = vsel %vm2135_vm11, 1.0, %v3153_v29 }
 0x3e0   :  { %v3093_v61 = vpop.eup %3092  ;;  %v2748_v28 = vpop.f32.mrb[72].mxu0  ;;  %v2256_v40 = vmul.f32 %v3091_v27, %v2583_v37  ;;  %v3147_v27 = vld [vmem:[%s5365_s2 + $0xe0] sm:$0xff] }
 0x3e1   :  { %v1879_v4 = vpop.xlane.xlu1 %1878  ;;  %v1876_v48 = vpop.xlane.xlu0 %1875  ;;  %v2255_v30 = vmul.f32 %v3093_v61, %v2582_v44  ;;  %vm2138_vm12 = vcmp.lt.s32.totalorder %v1065_v62, %v3147_v27  ;;  %v3148_v61 = vld [vmem:[%s5365_s2 + $0xd8] sm:$0xff] }
 0x3e2   :  { %3102 = vrcp.f32 %v1879_v4  ;;  %v2749_v43 = vpop.f32.mrb[73].mxu0  ;;  %2362 = vperm.xlu0 %2926, %v2256_v40   ;;  %vm2137_vm15 = vcmp.lt.s32.totalorder %v1064_v38, %v3148_v61 }
 0x3e3   :  { %3104 = vrcp.f32 %v1876_v48  ;;  %v5126_v0 = vadd.f32 %v2749_v43, %v2748_v28  ;;  %v2751_v53 = vpop.f32.mrb[74].mxu0  ;;  %v3095_v63 = vpop.eup %3094  ;;  %2357 = vperm.xlu1 %2927, %v2255_v30   ;;  %v1066_v28 = vadd.s32 232, %v4985_v25  ;;  %v2592_v48 = vsel %vm2137_vm15, 1.0, %v3153_v29  ;;  %v3149_v30 = vld [vmem:[%s5365_s2 + $0xe8] sm:$0xff] }
 0x3e4   :  { %v2752_v49 = vpop.f32.mrb[75].mxu0  ;;  %v3097_v26 = vpop.eup %3096  ;;  %v2258_v13 = vmul.f32 %v3095_v63, %v2585_v57 }
 0x3e5   :  { %v5132_v31 = vadd.f32 %v2752_v49, %v2751_v53  ;;  %v1885_v15 = vpop.xlane.xlu1 %1884  ;;  %v1882_v52 = vpop.xlane.xlu0 %1881  ;;  %v2257_v8 = vmul.f32 %v3097_v26, %v2584_v23  ;;  %v2593_v23 = vsel %vm2138_vm12, 1.0, %v3153_v29  ;;  %vm2139_vm13 = vcmp.lt.s32.totalorder %v1066_v28, %v3149_v30 }
 0x3e6   :  { %3106 = vrcp.f32 %v1885_v15  ;;  %2372 = vperm.xlu0 %2926, %v2258_v13   ;;  %v2594_v63 = vsel %vm2139_vm13, 1.0, %v3153_v29 }
 0x3e7   :  { %3108 = vrcp.f32 %v1882_v52  ;;  %v3099_v16 = vpop.eup %3098  ;;  %2367 = vperm.xlu1 %2927, %v2257_v8  }
 0x3e8   :  { %v3101_v14 = vpop.eup %3100  ;;  %v2260_v39 = vmul.f32 %v3099_v16, %v2587_v54 }
 0x3e9   :  { %v1891_v19 = vpop.xlane.xlu1 %1890  ;;  %v1888_v58 = vpop.xlane.xlu0 %1887  ;;  %v2259_v51 = vmul.f32 %v3101_v14, %v2586_v6 }
 0x3ea   :  { %3110 = vrcp.f32 %v1891_v19  ;;  %2382 = vperm.xlu0 %2926, %v2260_v39  }
 0x3eb   :  { %3112 = vrcp.f32 %v1888_v58  ;;  %2377 = vperm.xlu1 %2927, %v2259_v51  }
 0x3ec   :  { %v3103_v41 = vpop.eup %3102 }
 0x3ed   :  { %v3105_v44 = vpop.eup %3104  ;;  %v2262_v37 = vmul.f32 %v3103_v41, %v2589_v10  ;;  %v1894_v36 = vpop.xlane.xlu0 %1893 }
 0x3ee   :  { %v2261_v17 = vmul.f32 %v3105_v44, %v2588_v59  ;;  %3114 = vrcp.f32 %v1894_v36  ;;  %v1068_v44 = vadd.s32 248, %v4985_v25 }
 0x3ef   :  { %2392 = vperm.xlu0 %2926, %v2262_v37  }
 0x3f0   :  { %v3107_v33 = vpop.eup %3106  ;;  %2387 = vperm.xlu1 %2927, %v2261_v17   ;;  %v3150_v17 = vld [vmem:[%s5365_s2 + $0xf8] sm:$0xff] }
 0x3f1   :  { %v3109_v4 = vpop.eup %3108  ;;  %v2264_v40 = vmul.f32 %v3107_v33, %v2591_v46  ;;  %v1067_v46 = vadd.s32 240, %v4985_v25  ;;  %vm2141_vm14 = vcmp.lt.s32.totalorder %v1068_v44, %v3150_v17 }
 0x3f2   :  { %v2263_v57 = vmul.f32 %v3109_v4, %v2590_v60  ;;  %v3151_v4 = vld [vmem:[%s5365_s2 + $0xf0] sm:$0xff] }
 0x3f3   :  { %2402 = vperm.xlu0 %2926, %v2264_v40   ;;  %vm2140_vm0 = vcmp.lt.s32.totalorder %v1067_v46, %v3151_v4 }
 0x3f4   :  { %v3111_v43 = vpop.eup %3110  ;;  %2397 = vperm.xlu1 %2927, %v2263_v57   ;;  %v2595_v30 = vsel %vm2140_vm0, 1.0, %v3153_v29 }
 0x3f5   :  { %v3113_v55 = vpop.eup %3112  ;;  %v2266_v24 = vmul.f32 %v3111_v43, %v2593_v23  ;;  %v2596_v23 = vsel %vm2141_vm14, 1.0, %v3153_v29 }
 0x3f6   :  { %v2265_v53 = vmul.f32 %v3113_v55, %v2592_v48 }
 0x3f7   :  { %2412 = vperm.xlu0 %2926, %v2266_v24  }
 0x3f8   :  { %2407 = vperm.xlu1 %2927, %v2265_v53   ;;  %v3115_v5 = vpop.eup %3114 }
 0x3f9   :  { %v2267_v34 = vmul.f32 %v3115_v5, %v2594_v63 }
 0x3fc   :  { %2417 = vperm.xlu1 %2927, %v2267_v34  }
 0x415   :  { %v2754_v49 = vpop.f32.mrb[76].mxu0 }
 0x416   :  { %v2755_v26 = vpop.f32.mrb[77].mxu0 }
 0x417   :  { %v5170_v15 = vadd.f32 %v2755_v26, %v2754_v49  ;;  %v2757_v13 = vpop.f32.mrb[78].mxu0 }
 0x418   :  { %v2758_v54 = vpop.f32.mrb[79].mxu0 }
 0x419   :  { %v5172_v52 = vadd.f32 %v2758_v54, %v2757_v13 }
 0x41d   :  { %v2760_v8 = vpop.f32.mrb[80].mxu0 }
 0x41e   :  { %v2761_v6 = vpop.f32.mrb[81].mxu0 }
 0x41f   :  { %v5174_v11 = vadd.f32 %v2761_v6, %v2760_v8  ;;  %v2763_v18 = vpop.f32.mrb[82].mxu0 }
 0x420   :  { %v2764_v16 = vpop.f32.mrb[83].mxu0 }
 0x421   :  { %v5176_v2 = vadd.f32 %v2764_v16, %v2763_v18 }
 0x425   :  { %v2766_v32 = vpop.f32.mrb[84].mxu0 }
 0x426   :  { %v2767_v14 = vpop.f32.mrb[85].mxu0 }
 0x427   :  { %v5178_v19 = vadd.f32 %v2767_v14, %v2766_v32  ;;  %v2769_v39 = vpop.f32.mrb[86].mxu0 }
 0x428   :  { %v2770_v10 = vpop.f32.mrb[87].mxu0 }
 0x429   :  { %v5180_v58 = vadd.f32 %v2770_v10, %v2769_v39 }
 0x42d   :  { %v2772_v51 = vpop.f32.mrb[88].mxu0 }
 0x42e   :  { %v2773_v59 = vpop.f32.mrb[89].mxu0 }
 0x42f   :  { %v5182_v50 = vadd.f32 %v2773_v59, %v2772_v51  ;;  %v2775_v62 = vpop.f32.mrb[90].mxu0 }
 0x430   :  { %v2776_v41 = vpop.f32.mrb[91].mxu0  ;;  %v1900_v45 = vpop.xlane.xlu0 %1899 }
 0x431   :  { %v5184_v38 = vadd.f32 %v2776_v41, %v2775_v62  ;;  %3116 = vrcp.f32 %v1900_v45 }
 0x432   :  { %v1897_v37 = vpop.xlane.xlu1 %1896 }
 0x433   :  { %3118 = vrcp.f32 %v1897_v37 }
 0x435   :  { %v2778_v36 = vpop.f32.mrb[92].mxu0 }
 0x436   :  { %v2779_v60 = vpop.f32.mrb[93].mxu0  ;;  %v2273_v27 = vpop.permute.xlu1 %2272 }
 0x437   :  { %v5191_v33 = vadd.f32 %v2779_v60, %v2778_v36  ;;  %v2430_v61 = vmul.f32 %v5002_v21, %v2273_v27  ;;  %v2781_v28 = vpop.f32.mrb[94].mxu0 }
 0x438   :  { %v2782_v40 = vpop.f32.mrb[95].mxu0  ;;  %v2278_v25 = vpop.permute.xlu0 %2277 }
 0x439   :  { %2462 = vst.msk [vmem:[%s5370_s9] sm:$0xff] %vm679_vm2, %v2430_v61  ;;  %v5202_v57 = vadd.f32 %v2782_v40, %v2781_v28  ;;  %v2431_v48 = vmul.f32 %v5005_v20, %v2278_v25 }
 0x43a   :  { %v2283_v21 = vpop.permute.xlu1 %2282 }
 0x43b   :  { %v3117_v43 = vpop.eup %3116  ;;  %2463 = vst.msk [vmem:[%s5370_s9 + $0x8] sm:$0xff] %vm679_vm2, %v2431_v48  ;;  %v2432_v55 = vmul.f32 %v5026_v9, %v2283_v21 }
 0x43c   :  { %v2293_v24 = vpop.permute.xlu0 %2292  ;;  %v2269_v53 = vmul.f32 %v3117_v43, %v2596_v23 }
 0x43d   :  { %v3119_v63 = vpop.eup %3118  ;;  %2464 = vst.msk [vmem:[%s5370_s9 + $0x10] sm:$0xff] %vm679_vm2, %v2432_v55  ;;  %v2434_v20 = vmul.f32 %v5052_v35, %v2293_v24  ;;  %v2784_v5 = vpop.f32.mrb[96].mxu0 }
 0x43e   :  { %v2785_v34 = vpop.f32.mrb[97].mxu0  ;;  %v2288_v29 = vpop.permute.xlu1 %2287  ;;  %2427 = vperm.xlu1 %2927, %v2269_v53   ;;  %v2268_v49 = vmul.f32 %v3119_v63, %v2595_v30 }
 0x43f   :  { %2466 = vst.msk [vmem:[%s5370_s9 + $0x20] sm:$0xff] %vm679_vm2, %v2434_v20  ;;  %v5220_v9 = vadd.f32 %v2785_v34, %v2784_v5  ;;  %v2433_v26 = vmul.f32 %v5030_v3, %v2288_v29  ;;  %v2787_v13 = vpop.f32.mrb[98].mxu0 }
 0x440   :  { %v2788_v54 = vpop.f32.mrb[99].mxu0  ;;  %2422 = vperm.xlu0 %2926, %v2268_v49   ;;  %v2303_v8 = vpop.permute.xlu0 %2302 }
 0x441   :  { %2465 = vst.msk [vmem:[%s5370_s9 + $0x18] sm:$0xff] %vm679_vm2, %v2433_v26  ;;  %v5227_v35 = vadd.f32 %v2788_v54, %v2787_v13  ;;  %v2436_v6 = vmul.f32 %v5070_v42, %v2303_v8 }
 0x442   :  { %v2298_v18 = vpop.permute.xlu1 %2297 }
 0x443   :  { %2468 = vst.msk [vmem:[%s5370_s9 + $0x30] sm:$0xff] %vm679_vm2, %v2436_v6  ;;  %v2435_v3 = vmul.f32 %v5055_v12, %v2298_v18 }
 0x444   :  { %v2313_v16 = vpop.permute.xlu0 %2312 }
 0x445   :  { %2467 = vst.msk [vmem:[%s5370_s9 + $0x28] sm:$0xff] %vm679_vm2, %v2435_v3  ;;  %v2438_v32 = vmul.f32 %v5081_v22, %v2313_v16  ;;  %v2790_v14 = vpop.f32.mrb[100].mxu0 }
 0x446   :  { %v2791_v39 = vpop.f32.mrb[101].mxu0  ;;  %v2308_v10 = vpop.permute.xlu1 %2307 }
 0x447   :  { %2470 = vst.msk [vmem:[%s5370_s9 + $0x40] sm:$0xff] %vm679_vm2, %v2438_v32  ;;  %v2792_v42 = vadd.f32 %v2791_v39, %v2790_v14  ;;  %v2437_v51 = vmul.f32 %v5072_v47, %v2308_v10  ;;  %v2793_v12 = vpop.f32.mrb[102].mxu0 }
 0x448   :  { %v2794_v59 = vpop.f32.mrb[103].mxu0  ;;  %v2323_v62 = vpop.permute.xlu0 %2322 }
 0x449   :  { %2469 = vst.msk [vmem:[%s5370_s9 + $0x38] sm:$0xff] %vm679_vm2, %v2437_v51  ;;  %v5249_v22 = vadd.f32 %v2794_v59, %v2793_v12  ;;  %v2440_v41 = vmul.f32 %v5104_v56, %v2323_v62 }
 0x44a   :  { %v2318_v45 = vpop.permute.xlu1 %2317 }
 0x44b   :  { %2472 = vst.msk [vmem:[%s5370_s9 + $0x50] sm:$0xff] %vm679_vm2, %v2440_v41  ;;  %v2439_v47 = vmul.f32 %v5087_v7, %v2318_v45 }
 0x44c   :  { %v2333_v44 = vpop.permute.xlu0 %2332 }
 0x44d   :  { %2471 = vst.msk [vmem:[%s5370_s9 + $0x48] sm:$0xff] %vm679_vm2, %v2439_v47  ;;  %v2442_v37 = vmul.f32 %v5126_v0, %v2333_v44  ;;  %v2796_v46 = vpop.f32.mrb[104].mxu0 }
 0x44e   :  { %v2797_v36 = vpop.f32.mrb[105].mxu0  ;;  %v2328_v17 = vpop.permute.xlu1 %2327 }
 0x44f   :  { %2474 = vst.msk [vmem:[%s5370_s9 + $0x60] sm:$0xff] %vm679_vm2, %v2442_v37  ;;  %v2798_v56 = vadd.f32 %v2797_v36, %v2796_v46  ;;  %v2441_v60 = vmul.f32 %v5106_v1, %v2328_v17  ;;  %v2799_v7 = vpop.f32.mrb[106].mxu0 }
 0x450   :  { %v2800_v27 = vpop.f32.mrb[107].mxu0 }
 0x451   :  { %2473 = vst.msk [vmem:[%s5370_s9 + $0x58] sm:$0xff] %vm679_vm2, %v2441_v60  ;;  %v2801_v61 = vadd.f32 %v2800_v27, %v2799_v7 }
 0x452   :  { %v2338_v0 = vpop.permute.xlu1 %2337 }
 0x453   :  { %v2443_v28 = vmul.f32 %v5132_v31, %v2338_v0 }
 0x455   :  { %2475 = vst.msk [vmem:[%s5370_s9 + $0x68] sm:$0xff] %vm679_vm2, %v2443_v28 }
 0x459   :  { %v2343_v4 = vpop.permute.xlu0 %2342 }
 0x45a   :  { %v2444_v40 = vmul.f32 %v5170_v15, %v2343_v4 }
 0x45b   :  { %v2348_v1 = vpop.permute.xlu1 %2347 }
 0x45c   :  { %2476 = vst.msk [vmem:[%s5370_s9 + $0x70] sm:$0xff] %vm679_vm2, %v2444_v40  ;;  %v2445_v25 = vmul.f32 %v5172_v52, %v2348_v1 }
 0x45d   :  { %v2353_v23 = vpop.permute.xlu0 %2352 }
 0x45e   :  { %2477 = vst.msk [vmem:[%s5370_s9 + $0x78] sm:$0xff] %vm679_vm2, %v2445_v25  ;;  %v2446_v31 = vmul.f32 %v5174_v11, %v2353_v23 }
 0x460   :  { %2478 = vst.msk [vmem:[%s5370_s9 + $0x80] sm:$0xff] %vm679_vm2, %v2446_v31 }
 0x461   :  { %v2363_v15 = vpop.permute.xlu0 %2362 }
 0x462   :  { %v2358_v48 = vpop.permute.xlu1 %2357  ;;  %v2448_v21 = vmul.f32 %v5178_v19, %v2363_v15 }
 0x463   :  { %v2447_v43 = vmul.f32 %v5176_v2, %v2358_v48 }
 0x464   :  { %2480 = vst.msk [vmem:[%s5370_s9 + $0x90] sm:$0xff] %vm679_vm2, %v2448_v21 }
 0x465   :  { %2479 = vst.msk [vmem:[%s5370_s9 + $0x88] sm:$0xff] %vm679_vm2, %v2447_v43  ;;  %v2373_v52 = vpop.permute.xlu0 %2372 }
 0x466   :  { %v2368_v11 = vpop.permute.xlu1 %2367  ;;  %v2450_v30 = vmul.f32 %v5182_v50, %v2373_v52 }
 0x467   :  { %v2449_v55 = vmul.f32 %v5180_v58, %v2368_v11 }
 0x468   :  { %2482 = vst.msk [vmem:[%s5370_s9 + $0xa0] sm:$0xff] %vm679_vm2, %v2450_v30 }
 0x469   :  { %2481 = vst.msk [vmem:[%s5370_s9 + $0x98] sm:$0xff] %vm679_vm2, %v2449_v55  ;;  %v2383_v2 = vpop.permute.xlu0 %2382 }
 0x46a   :  { %v2378_v19 = vpop.permute.xlu1 %2377  ;;  %v2452_v24 = vmul.f32 %v5191_v33, %v2383_v2 }
 0x46b   :  { %v2451_v53 = vmul.f32 %v5184_v38, %v2378_v19 }
 0x46c   :  { %2484 = vst.msk [vmem:[%s5370_s9 + $0xb0] sm:$0xff] %vm679_vm2, %v2452_v24 }
 0x46d   :  { %2483 = vst.msk [vmem:[%s5370_s9 + $0xa8] sm:$0xff] %vm679_vm2, %v2451_v53 }
 0x46e   :  { %v2393_v58 = vpop.permute.xlu0 %2392 }
 0x46f   :  { %v2388_v50 = vpop.permute.xlu1 %2387  ;;  %v2454_v63 = vmul.f32 %v5220_v9, %v2393_v58 }
 0x470   :  { %v2453_v20 = vmul.f32 %v5202_v57, %v2388_v50 }
 0x471   :  { %2486 = vst.msk [vmem:[%s5370_s9 + $0xc0] sm:$0xff] %vm679_vm2, %v2454_v63 }
 0x472   :  { %2485 = vst.msk [vmem:[%s5370_s9 + $0xb8] sm:$0xff] %vm679_vm2, %v2453_v20  ;;  %v2403_v38 = vpop.permute.xlu0 %2402 }
 0x473   :  { %v2398_v33 = vpop.permute.xlu1 %2397  ;;  %v2456_v5 = vmul.f32 %v2792_v42, %v2403_v38 }
 0x474   :  { %v2455_v34 = vmul.f32 %v5227_v35, %v2398_v33 }
 0x475   :  { %2488 = vst.msk [vmem:[%s5370_s9 + $0xd0] sm:$0xff] %vm679_vm2, %v2456_v5 }
 0x476   :  { %2487 = vst.msk [vmem:[%s5370_s9 + $0xc8] sm:$0xff] %vm679_vm2, %v2455_v34  ;;  %v2413_v57 = vpop.permute.xlu0 %2412 }
 0x477   :  { %v2408_v29 = vpop.permute.xlu1 %2407  ;;  %v2458_v49 = vmul.f32 %v2798_v56, %v2413_v57 }
 0x478   :  { %v2457_v9 = vmul.f32 %v5249_v22, %v2408_v29 }
 0x479   :  { %2490 = vst.msk [vmem:[%s5370_s9 + $0xe0] sm:$0xff] %vm679_vm2, %v2458_v49  ;;  %v2802_v26 = vpop.f32.mrb[108].mxu0 }
 0x47a   :  { %2489 = vst.msk [vmem:[%s5370_s9 + $0xd8] sm:$0xff] %vm679_vm2, %v2457_v9  ;;  %v2803_v54 = vpop.f32.mrb[109].mxu0 }
 0x47b   :  { %v2418_v13 = vpop.permute.xlu1 %2417  ;;  %v2804_v35 = vadd.f32 %v2803_v54, %v2802_v26  ;;  %v2805_v6 = vpop.f32.mrb[110].mxu0 }
 0x47c   :  { %v2459_v8 = vmul.f32 %v2801_v61, %v2418_v13  ;;  %v2806_v18 = vpop.f32.mrb[111].mxu0 }
 0x47d   :  { %v2807_v3 = vadd.f32 %v2806_v18, %v2805_v6 }
 0x47e   :  { %2491 = vst.msk [vmem:[%s5370_s9 + $0xe8] sm:$0xff] %vm679_vm2, %v2459_v8 }
 0x4bd   :  { %v2428_v16 = vpop.permute.xlu1 %2427 }
 0x4be   :  { %v2461_v32 = vmul.f32 %v2807_v3, %v2428_v16 }
 0x4bf   :  { %v2423_v14 = vpop.permute.xlu0 %2422 }
 0x4c0   :  { %2493 = vst.msk [vmem:[%s5370_s9 + $0xf8] sm:$0xff] %vm679_vm2, %v2461_v32  ;;  %v2460_v39 = vmul.f32 %v2804_v35, %v2423_v14 }
 0x4c2   :  { %2492 = vst.msk [vmem:[%s5370_s9 + $0xf0] sm:$0xff] %vm679_vm2, %v2460_v39 }

</bundles_post_ra>
